<compile_context>
chip_gen: v7x
topology: tpu7x:2x2x1
jax: 0.10.0
libtpu: 0.0.40
codegen_flags: <defaults>
</compile_context>

<pallas_src>
import functools

import jax
import jax.numpy as jnp
from jax import lax
from jax.experimental import pallas as pl
from jax.experimental.pallas import tpu as pltpu


# ----------------------------------------------------------------------------
# Pallas kernel: grid = (batch, channel-tiles of the 3x3-conv reduction).
# ----------------------------------------------------------------------------
def _decoder_psp_kernel(x_ref, w_ref, sb_ref, wcls_ref, bcls_ref, rh_ref, rw_ref,
                        o_ref, acc_ref, *, H, Wp, C_mid, n_cls, row_blk,
                        n_row_blocks):
    # x_ref:    (H+2, Wq, tk)       zero-padded NHWC input tile (tk channels), f32
    # w_ref:    (3, 3, tk, C_mid)   3x3 conv weight slice, [dy, dx, c, o], f32
    # sb_ref:   (2, C_mid)          row 0: BN scale, row 1: BN shift (conv bias folded)
    # wcls_ref: (C_mid, n_cls)      1x1 classification conv weight
    # bcls_ref: (1, n_cls)          classification bias (lane-dense)
    # rh_ref:   (H_out, H)          bilinear row-interp matrix (align_corners=True)
    # rw_ref:   (W_out, Wp)         bilinear col-interp matrix (zero cols for W pad)
    # o_ref:    (n_cls, H_out, W_out)
    # acc_ref:  (H, Wp, C_mid) f32  VMEM accumulator, persists across the k axis
    k = pl.program_id(1)

    @pl.when(k == 0)
    def _():
        acc_ref[...] = jnp.zeros_like(acc_ref)

    # --- 3x3 conv over this channel tile: 9 tap matmuls, each accumulated
    #     directly into the VMEM accumulator (no big `part` temporary). ---
    for dy in range(3):
        for dx in range(3):
            patch = x_ref[dy:dy + H, dx:dx + Wp, :]                  # (H, Wp, tk)
            acc_ref[...] += jnp.einsum(
                'hwk,ko->hwo', patch, w_ref[dy, dx],
                preferred_element_type=jnp.float32)

    @pl.when(k == pl.num_programs(1) - 1)
    def _():
        # --- BatchNorm (eval-mode, folded scale/shift) + ReLU, in place ---
        sb = sb_ref[...]
        scale = sb[0:1, :].reshape(1, 1, C_mid)
        shift = sb[1:2, :].reshape(1, 1, C_mid)
        acc_ref[...] = jnp.maximum(acc_ref[...] * scale + shift, 0.0)

        # TODO(synk): Dropout(p=0.1) is identity in eval mode; training-mode
        #             random masking/scaling is not implemented here.

        # --- 1x1 classification conv in hwc layout; only the small
        #     (H, Wp, n_cls) result is transposed to class-leading. ---
        cls_hwc = jnp.einsum('hwm,mc->hwc', acc_ref[...], wcls_ref[...],
                             preferred_element_type=jnp.float32)     # (H, Wp, n_cls)
        cls_hwc = cls_hwc + bcls_ref[...].reshape(1, 1, n_cls)
        cls_chw = jnp.transpose(cls_hwc, (2, 0, 1))                  # (n_cls, H, Wp)

        rw = rw_ref[...]                                             # hoisted

        # --- bilinear upsample (align_corners=True), row-tiled over H_out so
        #     epilogue temporaries stay small; lane-dense (.., W_out) stores. ---
        def row_block(i, carry):
            i0 = pl.multiple_of(i * row_blk, row_blk)
            rh_blk = rh_ref[pl.ds(i0, row_blk), :]                   # (TH, H)
            t = jnp.einsum('Ih,chw->cIw', rh_blk, cls_chw,
                           preferred_element_type=jnp.float32)       # (n_cls, TH, Wp)
            blk = jnp.einsum('cIw,Jw->cIJ', t, rw,
                             preferred_element_type=jnp.float32)     # (n_cls, TH, W_out)
            o_ref[:, pl.ds(i0, row_blk), :] = blk.astype(o_ref.dtype)
            return carry

        lax.fori_loop(0, n_row_blocks, row_block, 0)


# ----------------------------------------------------------------------------
# Glue: padding, weight packing, interpolation matrices, pallas_call.
# ----------------------------------------------------------------------------
def _interp_matrix(out_size, in_size):
    """Row-interpolation matrix (out_size, in_size), bilinear align_corners=True."""
    out_idx = jnp.arange(out_size, dtype=jnp.float32)
    denom = max(out_size - 1, 1)
    src = out_idx * (in_size - 1) / denom
    i0 = jnp.clip(jnp.floor(src).astype(jnp.int32), 0, in_size - 1)
    i1 = jnp.clip(i0 + 1, 0, in_size - 1)
    frac = src - i0.astype(jnp.float32)
    m = jnp.zeros((out_size, in_size), jnp.float32)
    rows = jnp.arange(out_size)
    m = m.at[rows, i0].add(1.0 - frac)
    m = m.at[rows, i1].add(frac)
    return m


def _largest_tile(total, target, quantum=128):
    """Largest multiple-of-`quantum` divisor of `total` that is <= target."""
    best = None
    d = quantum
    while d <= min(total, target):
        if total % d == 0:
            best = d
        d += quantum
    return best if best is not None else total


def _largest_divisor(n, cap, prefer=8):
    """Largest divisor of n that is <= cap, preferring multiples of `prefer`."""
    best, best_pref = 1, None
    for d in range(1, min(n, cap) + 1):
        if n % d == 0:
            best = d
            if d % prefer == 0:
                best_pref = d
    return best_pref if best_pref is not None else best


def _tpu_vmem_capacity():
    try:
        return int(pltpu.get_tpu_info().vmem_capacity_bytes)
    except Exception:
        return None


def decoder_psp_feature(x_nchw, params, height, width, *, tk=None, row_block=None):
    """Forward pass of DecoderPSPFeature. x_nchw: (N, C_in, H, W) float32.

    Returns (N, n_classes, height, width) float32 (NCHW, same as PyTorch).
    """
    N, C_in, H, W = x_nchw.shape
    C_mid = params['w_conv'].shape[0]
    n_cls = params['w_cls'].shape[0]
    eps = 1e-5

    Wp = ((W + 7) // 8) * 8                    # conv-output / accumulator width
    Wq = ((Wp + 2 + 7) // 8) * 8               # padded input width (>= Wp + 2)

    vmem_cap = _tpu_vmem_capacity()

    # --- channel tile for the 3x3-conv reduction (generation-aware target) ---
    if tk is None:
        target = 256 if (vmem_cap is not None and vmem_cap <= 64 * 2**20) else 512
        tk = _largest_tile(C_in, target)
    assert C_in % tk == 0, (C_in, tk)
    KT = C_in // tk

    # --- x: NCHW -> NHWC, zero-pad for 3x3/pad=1 plus right pad to Wq.
    #     (No 3x-channel staging array, no extra concat HBM pass.) ---
    x_nhwc = jnp.transpose(x_nchw, (0, 2, 3, 1)).astype(jnp.float32)
    x_pad = jnp.pad(x_nhwc, ((0, 0), (1, 1), (1, Wq - W - 1), (0, 0)))
    # x_pad: (N, H+2, Wq, C_in), zeros outside the valid region.

    # --- fold conv bias + eval-mode BatchNorm into per-channel scale/shift ---
    scale = params['gamma'] / jnp.sqrt(params['rvar'] + eps)
    shift = params['beta'] + scale * (params['b_conv'] - params['rmean'])
    sb = jnp.stack([scale, shift]).astype(jnp.float32)               # (2, C_mid)

    # Conv weight (C_mid, C_in, 3, 3) -> (3[dy], 3[dx], C_in, C_mid), f32.
    w3 = jnp.transpose(params['w_conv'], (2, 3, 1, 0)).astype(jnp.float32)
    # 1x1 conv weight (n_cls, C_mid, 1, 1) -> (C_mid, n_cls); bias lane-dense.
    wcls = jnp.transpose(params['w_cls'][:, :, 0, 0], (1, 0)).astype(jnp.float32)
    bcls = params['b_cls'].astype(jnp.float32).reshape(1, n_cls)

    rh = _interp_matrix(height, H).astype(jnp.float32)               # (H_out, H)
    rw = _interp_matrix(width, W).astype(jnp.float32)                # (W_out, W)
    if Wp > W:
        rw = jnp.pad(rw, ((0, 0), (0, Wp - W)))                      # ignore pad cols

    # --- H_out row-block size for the epilogue (divides height) ---
    if row_block is None:
        row_block = _largest_divisor(height, 128, prefer=8)
    assert height % row_block == 0, (height, row_block)
    n_row_blocks = height // row_block

    kernel = functools.partial(_decoder_psp_kernel,
                               H=H, Wp=Wp, C_mid=C_mid, n_cls=n_cls,
                               row_blk=row_block, n_row_blocks=n_row_blocks)

    # --- VMEM budget: double buffers counted once, no extra 2x, no 48 MiB clamp.
    by_x = 2 * (H + 2) * Wq * tk * 4
    by_w = 2 * 9 * tk * C_mid * 4
    by_small = 2 * (2 * C_mid + C_mid * n_cls + n_cls + height * H + width * Wp) * 4
    by_out = 2 * n_cls * height * width * 4
    by_acc = H * Wp * C_mid * 4
    by_epi = (2 * H * Wp * n_cls + n_cls * row_block * (Wp + width)) * 4
    est = by_x + by_w + by_small + by_out + by_acc + by_epi
    cap = (vmem_cap - 8 * 2**20) if vmem_cap else 100 * 2**20
    vmem_limit = int(max(32 * 2**20, min(cap, est + 8 * 2**20)))

    out = pl.pallas_call(
        kernel,
        grid=(N, KT),
        in_specs=[
            pl.BlockSpec((None, H + 2, Wq, tk), lambda n, k: (n, 0, 0, k)),
            pl.BlockSpec((3, 3, tk, C_mid), lambda n, k: (0, 0, k, 0)),
            pl.BlockSpec((2, C_mid), lambda n, k: (0, 0)),
            pl.BlockSpec((C_mid, n_cls), lambda n, k: (0, 0)),
            pl.BlockSpec((1, n_cls), lambda n, k: (0, 0)),
            pl.BlockSpec((height, H), lambda n, k: (0, 0)),
            pl.BlockSpec((width, Wp), lambda n, k: (0, 0)),
        ],
        out_specs=pl.BlockSpec((None, n_cls, height, width), lambda n, k: (n, 0, 0, 0)),
        out_shape=jax.ShapeDtypeStruct((N, n_cls, height, width), jnp.float32),
        scratch_shapes=[pltpu.VMEM((H, Wp, C_mid), jnp.float32)],
        compiler_params=pltpu.CompilerParams(
            dimension_semantics=("parallel", "arbitrary"),
            vmem_limit_bytes=vmem_limit),
    )(x_pad, w3, sb, wcls, bcls, rh, rw)

    return out                                                       # NCHW


# ----------------------------------------------------------------------------
# Pure-JAX f32 reference (for a correctness sanity check).
# ----------------------------------------------------------------------------
def _reference(x_nchw, params, height, width):
    eps = 1e-5
    y = jax.lax.conv_general_dilated(
        x_nchw, params['w_conv'], (1, 1), ((1, 1), (1, 1)),
        dimension_numbers=('NCHW', 'OIHW', 'NCHW'))
    y = y + params['b_conv'][None, :, None, None]
    scale = params['gamma'] / jnp.sqrt(params['rvar'] + eps)
    y = scale[None, :, None, None] * (y - params['rmean'][None, :, None, None]) \
        + params['beta'][None, :, None, None]
    y = jnp.maximum(y, 0.0)
    y = jax.lax.conv_general_dilated(
        y, params['w_cls'], (1, 1), 'VALID',
        dimension_numbers=('NCHW', 'OIHW', 'NCHW'))
    y = y + params['b_cls'][None, :, None, None]
    rh = _interp_matrix(height, y.shape[2])
    rw = _interp_matrix(width, y.shape[3])
    y = jnp.einsum('Ii,nciw->ncIw', rh, y)
    y = jnp.einsum('Jw,ncIw->ncIJ', rw, y)
    return y


# ----------------------------------------------------------------------------
# Main: deterministic small-shape example (channels scaled down from 4096/512).
# ----------------------------------------------------------------------------
if __name__ == "__main__":
    # Small stand-ins for the module's hard-coded sizes (in=4096, mid=512).
    N, C_in, H, W = 2, 256, 10, 10
    C_mid, n_classes = 64, 7
    height, width = 24, 20           # F.interpolate target size

    key = jax.random.PRNGKey(0)
    ks = jax.random.split(key, 8)
    params = {
        'w_conv': 0.05 * jax.random.normal(ks[0], (C_mid, C_in, 3, 3), jnp.float32),
        'b_conv': 0.05 * jax.random.normal(ks[1], (C_mid,), jnp.float32),
        'gamma':  1.0 + 0.1 * jax.random.normal(ks[2], (C_mid,), jnp.float32),
        'beta':   0.1 * jax.random.normal(ks[3], (C_mid,), jnp.float32),
        'rmean':  0.1 * jax.random.normal(ks[4], (C_mid,), jnp.float32),
        'rvar':   1.0 + 0.1 * jax.nn.softplus(jax.random.normal(ks[5], (C_mid,), jnp.float32)),
        'w_cls':  0.05 * jax.random.normal(ks[6], (n_classes, C_mid, 1, 1), jnp.float32),
        'b_cls':  0.05 * jax.random.normal(ks[7], (n_classes,), jnp.float32),
    }
    x = jax.random.normal(jax.random.PRNGKey(1), (N, C_in, H, W), jnp.float32)

    # tk=128 -> 2 channel tiles (K-reduction path); row_block=8 -> 3 epilogue
    # row blocks (exercises the row-tiled upsample loop).
    out = decoder_psp_feature(x, params, height, width, tk=128, row_block=8)
    out = jax.block_until_ready(out)

    ref = jax.block_until_ready(_reference(x, params, height, width))
    assert out.shape == (N, n_classes, height, width), out.shape
    err = jnp.max(jnp.abs(out - ref))
    assert jnp.allclose(out, ref, rtol=2e-3, atol=2e-3), f"max abs err = {err}"

    print("KERNEL_OK")
</pallas_src>

<mosaic_0001>
module attributes {stable_mosaic.version = 11 : i64} {
  func.func @_decoder_psp_kernel(%arg0: i32, %arg1: i32, %arg2: memref<1x12x24x128xf32, #tpu.memory_space<vmem>>, %arg3: memref<3x3x128x64xf32, #tpu.memory_space<vmem>>, %arg4: memref<2x64xf32, #tpu.memory_space<vmem>>, %arg5: memref<64x7xf32, #tpu.memory_space<vmem>>, %arg6: memref<1x7xf32, #tpu.memory_space<vmem>>, %arg7: memref<24x10xf32, #tpu.memory_space<vmem>>, %arg8: memref<20x16xf32, #tpu.memory_space<vmem>>, %arg9: memref<1x7x24x20xf32, #tpu.memory_space<vmem>>, %arg10: memref<10x16x64xf32, #tpu.memory_space<vmem>>) attributes {dimension_semantics = [#tpu.dimension_semantics<parallel>, #tpu.dimension_semantics<arbitrary>], iteration_bounds = array<i64: 2, 2>, scalar_prefetch = 0 : i64, scratch_operands = 1 : i64, tpu.core_type = #tpu.core_type<tc>, window_params = [{transform_indices = @transform_0, window_bounds = array<i64: 1, 12, 24, 128>}, {transform_indices = @transform_1, window_bounds = array<i64: 3, 3, 128, 64>}, {pipeline_mode = #tpu.pipeline_mode<synchronous>, transform_indices = @transform_2, window_bounds = array<i64: 2, 64>}, {pipeline_mode = #tpu.pipeline_mode<synchronous>, transform_indices = @transform_3, window_bounds = array<i64: 64, 7>}, {pipeline_mode = #tpu.pipeline_mode<synchronous>, transform_indices = @transform_4, window_bounds = array<i64: 1, 7>}, {pipeline_mode = #tpu.pipeline_mode<synchronous>, transform_indices = @transform_5, window_bounds = array<i64: 24, 10>}, {pipeline_mode = #tpu.pipeline_mode<synchronous>, transform_indices = @transform_6, window_bounds = array<i64: 20, 16>}, {transform_indices = @transform_7, window_bounds = array<i64: 1, 7, 24, 20>}]} {
    %c0_i32 = arith.constant 0 : i32
    %0 = arith.cmpi eq, %arg1, %c0_i32 : i32
    %1 = arith.extui %0 : i1 to i32
    %c0_i32_0 = arith.constant 0 : i32
    %2 = arith.cmpi ne, %1, %c0_i32_0 : i32
    scf.if %2 {
      %cst_133 = arith.constant 0.000000e+00 : f32
      %78 = vector.broadcast %cst_133 : f32 to vector<10x16x64xf32>
      %c0_134 = arith.constant 0 : index
      %c0_135 = arith.constant 0 : index
      %c0_136 = arith.constant 0 : index
      %79 = vector.load %arg10[%c0_134, %c0_135, %c0_136] : memref<10x16x64xf32, #tpu.memory_space<vmem>>, vector<10x16x64xf32>
      tpu.vector_store %arg10[%c0_134, %c0_135, %c0_136], %78 {strides = array<i32>} : memref<10x16x64xf32, #tpu.memory_space<vmem>>, vector<10x16x64xf32>,
    } else {
    }
    %c0 = arith.constant 0 : index
    %c0_1 = arith.constant 0 : index
    %c0_2 = arith.constant 0 : index
    %c0_3 = arith.constant 0 : index
    %3 = vector.load %arg2[%c0, %c0_1, %c0_2, %c0_3] : memref<1x12x24x128xf32, #tpu.memory_space<vmem>>, vector<1x10x16x128xf32>
    %4 = vector.shape_cast %3 : vector<1x10x16x128xf32> to vector<10x16x128xf32>
    %c0_4 = arith.constant 0 : index
    %c0_5 = arith.constant 0 : index
    %c0_6 = arith.constant 0 : index
    %5 = vector.load %arg10[%c0_4, %c0_5, %c0_6] : memref<10x16x64xf32, #tpu.memory_space<vmem>>, vector<10x16x64xf32>
    %c0_7 = arith.constant 0 : index
    %c0_8 = arith.constant 0 : index
    %c0_9 = arith.constant 0 : index
    %c0_10 = arith.constant 0 : index
    %6 = vector.load %arg3[%c0_7, %c0_8, %c0_9, %c0_10] : memref<3x3x128x64xf32, #tpu.memory_space<vmem>>, vector<1x1x128x64xf32>
    %7 = vector.shape_cast %6 : vector<1x1x128x64xf32> to vector<128x64xf32>
    "tpu.trace_start"() <{level = 10 : i32, message = "hwk,ko->hwo"}> : () -> ()
    %cst = arith.constant dense<0.000000e+00> : vector<10x16x64xf32>
    %8 = tpu.matmul %4, %7, %cst {dimension_numbers = #tpu.dot_dimension_numbers<[2], [0], [0, 1], [1], [0, 0, 0, 1, 1, 1], [], []>} : vector<10x16x128xf32>, vector<128x64xf32>, vector<10x16x64xf32> -> vector<10x16x64xf32>
    "tpu.trace_stop"() : () -> ()
    %9 = arith.addf %5, %8 : vector<10x16x64xf32>
    %c0_11 = arith.constant 0 : index
    %c0_12 = arith.constant 0 : index
    %c0_13 = arith.constant 0 : index
    %10 = vector.load %arg10[%c0_11, %c0_12, %c0_13] : memref<10x16x64xf32, #tpu.memory_space<vmem>>, vector<10x16x64xf32>
    tpu.vector_store %arg10[%c0_11, %c0_12, %c0_13], %9 {strides = array<i32>} : memref<10x16x64xf32, #tpu.memory_space<vmem>>, vector<10x16x64xf32>,
    %c0_14 = arith.constant 0 : index
    %c0_15 = arith.constant 0 : index
    %c1 = arith.constant 1 : index
    %c0_16 = arith.constant 0 : index
    %11 = vector.load %arg2[%c0_14, %c0_15, %c1, %c0_16] : memref<1x12x24x128xf32, #tpu.memory_space<vmem>>, vector<1x10x16x128xf32>
    %12 = vector.shape_cast %11 : vector<1x10x16x128xf32> to vector<10x16x128xf32>
    %c0_17 = arith.constant 0 : index
    %c0_18 = arith.constant 0 : index
    %c0_19 = arith.constant 0 : index
    %13 = vector.load %arg10[%c0_17, %c0_18, %c0_19] : memref<10x16x64xf32, #tpu.memory_space<vmem>>, vector<10x16x64xf32>
    %c0_20 = arith.constant 0 : index
    %c1_21 = arith.constant 1 : index
    %c0_22 = arith.constant 0 : index
    %c0_23 = arith.constant 0 : index
    %14 = vector.load %arg3[%c0_20, %c1_21, %c0_22, %c0_23] : memref<3x3x128x64xf32, #tpu.memory_space<vmem>>, vector<1x1x128x64xf32>
    %15 = vector.shape_cast %14 : vector<1x1x128x64xf32> to vector<128x64xf32>
    "tpu.trace_start"() <{level = 10 : i32, message = "hwk,ko->hwo"}> : () -> ()
    %cst_24 = arith.constant dense<0.000000e+00> : vector<10x16x64xf32>
    %16 = tpu.matmul %12, %15, %cst_24 {dimension_numbers = #tpu.dot_dimension_numbers<[2], [0], [0, 1], [1], [0, 0, 0, 1, 1, 1], [], []>} : vector<10x16x128xf32>, vector<128x64xf32>, vector<10x16x64xf32> -> vector<10x16x64xf32>
    "tpu.trace_stop"() : () -> ()
    %17 = arith.addf %13, %16 : vector<10x16x64xf32>
    %c0_25 = arith.constant 0 : index
    %c0_26 = arith.constant 0 : index
    %c0_27 = arith.constant 0 : index
    %18 = vector.load %arg10[%c0_25, %c0_26, %c0_27] : memref<10x16x64xf32, #tpu.memory_space<vmem>>, vector<10x16x64xf32>
    tpu.vector_store %arg10[%c0_25, %c0_26, %c0_27], %17 {strides = array<i32>} : memref<10x16x64xf32, #tpu.memory_space<vmem>>, vector<10x16x64xf32>,
    %c0_28 = arith.constant 0 : index
    %c0_29 = arith.constant 0 : index
    %c2 = arith.constant 2 : index
    %c0_30 = arith.constant 0 : index
    %19 = vector.load %arg2[%c0_28, %c0_29, %c2, %c0_30] : memref<1x12x24x128xf32, #tpu.memory_space<vmem>>, vector<1x10x16x128xf32>
    %20 = vector.shape_cast %19 : vector<1x10x16x128xf32> to vector<10x16x128xf32>
    %c0_31 = arith.constant 0 : index
    %c0_32 = arith.constant 0 : index
    %c0_33 = arith.constant 0 : index
    %21 = vector.load %arg10[%c0_31, %c0_32, %c0_33] : memref<10x16x64xf32, #tpu.memory_space<vmem>>, vector<10x16x64xf32>
    %c0_34 = arith.constant 0 : index
    %c2_35 = arith.constant 2 : index
    %c0_36 = arith.constant 0 : index
    %c0_37 = arith.constant 0 : index
    %22 = vector.load %arg3[%c0_34, %c2_35, %c0_36, %c0_37] : memref<3x3x128x64xf32, #tpu.memory_space<vmem>>, vector<1x1x128x64xf32>
    %23 = vector.shape_cast %22 : vector<1x1x128x64xf32> to vector<128x64xf32>
    "tpu.trace_start"() <{level = 10 : i32, message = "hwk,ko->hwo"}> : () -> ()
    %cst_38 = arith.constant dense<0.000000e+00> : vector<10x16x64xf32>
    %24 = tpu.matmul %20, %23, %cst_38 {dimension_numbers = #tpu.dot_dimension_numbers<[2], [0], [0, 1], [1], [0, 0, 0, 1, 1, 1], [], []>} : vector<10x16x128xf32>, vector<128x64xf32>, vector<10x16x64xf32> -> vector<10x16x64xf32>
    "tpu.trace_stop"() : () -> ()
    %25 = arith.addf %21, %24 : vector<10x16x64xf32>
    %c0_39 = arith.constant 0 : index
    %c0_40 = arith.constant 0 : index
    %c0_41 = arith.constant 0 : index
    %26 = vector.load %arg10[%c0_39, %c0_40, %c0_41] : memref<10x16x64xf32, #tpu.memory_space<vmem>>, vector<10x16x64xf32>
    tpu.vector_store %arg10[%c0_39, %c0_40, %c0_41], %25 {strides = array<i32>} : memref<10x16x64xf32, #tpu.memory_space<vmem>>, vector<10x16x64xf32>,
    %c0_42 = arith.constant 0 : index
    %c1_43 = arith.constant 1 : index
    %c0_44 = arith.constant 0 : index
    %c0_45 = arith.constant 0 : index
    %27 = vector.load %arg2[%c0_42, %c1_43, %c0_44, %c0_45] : memref<1x12x24x128xf32, #tpu.memory_space<vmem>>, vector<1x10x16x128xf32>
    %28 = vector.shape_cast %27 : vector<1x10x16x128xf32> to vector<10x16x128xf32>
    %c0_46 = arith.constant 0 : index
    %c0_47 = arith.constant 0 : index
    %c0_48 = arith.constant 0 : index
    %29 = vector.load %arg10[%c0_46, %c0_47, %c0_48] : memref<10x16x64xf32, #tpu.memory_space<vmem>>, vector<10x16x64xf32>
    %c1_49 = arith.constant 1 : index
    %c0_50 = arith.constant 0 : index
    %c0_51 = arith.constant 0 : index
    %c0_52 = arith.constant 0 : index
    %30 = vector.load %arg3[%c1_49, %c0_50, %c0_51, %c0_52] : memref<3x3x128x64xf32, #tpu.memory_space<vmem>>, vector<1x1x128x64xf32>
    %31 = vector.shape_cast %30 : vector<1x1x128x64xf32> to vector<128x64xf32>
    "tpu.trace_start"() <{level = 10 : i32, message = "hwk,ko->hwo"}> : () -> ()
    %cst_53 = arith.constant dense<0.000000e+00> : vector<10x16x64xf32>
    %32 = tpu.matmul %28, %31, %cst_53 {dimension_numbers = #tpu.dot_dimension_numbers<[2], [0], [0, 1], [1], [0, 0, 0, 1, 1, 1], [], []>} : vector<10x16x128xf32>, vector<128x64xf32>, vector<10x16x64xf32> -> vector<10x16x64xf32>
    "tpu.trace_stop"() : () -> ()
    %33 = arith.addf %29, %32 : vector<10x16x64xf32>
    %c0_54 = arith.constant 0 : index
    %c0_55 = arith.constant 0 : index
    %c0_56 = arith.constant 0 : index
    %34 = vector.load %arg10[%c0_54, %c0_55, %c0_56] : memref<10x16x64xf32, #tpu.memory_space<vmem>>, vector<10x16x64xf32>
    tpu.vector_store %arg10[%c0_54, %c0_55, %c0_56], %33 {strides = array<i32>} : memref<10x16x64xf32, #tpu.memory_space<vmem>>, vector<10x16x64xf32>,
    %c0_57 = arith.constant 0 : index
    %c1_58 = arith.constant 1 : index
    %c1_59 = arith.constant 1 : index
    %c0_60 = arith.constant 0 : index
    %35 = vector.load %arg2[%c0_57, %c1_58, %c1_59, %c0_60] : memref<1x12x24x128xf32, #tpu.memory_space<vmem>>, vector<1x10x16x128xf32>
    %36 = vector.shape_cast %35 : vector<1x10x16x128xf32> to vector<10x16x128xf32>
    %c0_61 = arith.constant 0 : index
    %c0_62 = arith.constant 0 : index
    %c0_63 = arith.constant 0 : index
    %37 = vector.load %arg10[%c0_61, %c0_62, %c0_63] : memref<10x16x64xf32, #tpu.memory_space<vmem>>, vector<10x16x64xf32>
    %c1_64 = arith.constant 1 : index
    %c1_65 = arith.constant 1 : index
    %c0_66 = arith.constant 0 : index
    %c0_67 = arith.constant 0 : index
    %38 = vector.load %arg3[%c1_64, %c1_65, %c0_66, %c0_67] : memref<3x3x128x64xf32, #tpu.memory_space<vmem>>, vector<1x1x128x64xf32>
    %39 = vector.shape_cast %38 : vector<1x1x128x64xf32> to vector<128x64xf32>
    "tpu.trace_start"() <{level = 10 : i32, message = "hwk,ko->hwo"}> : () -> ()
    %cst_68 = arith.constant dense<0.000000e+00> : vector<10x16x64xf32>
    %40 = tpu.matmul %36, %39, %cst_68 {dimension_numbers = #tpu.dot_dimension_numbers<[2], [0], [0, 1], [1], [0, 0, 0, 1, 1, 1], [], []>} : vector<10x16x128xf32>, vector<128x64xf32>, vector<10x16x64xf32> -> vector<10x16x64xf32>
    "tpu.trace_stop"() : () -> ()
    %41 = arith.addf %37, %40 : vector<10x16x64xf32>
    %c0_69 = arith.constant 0 : index
    %c0_70 = arith.constant 0 : index
    %c0_71 = arith.constant 0 : index
    %42 = vector.load %arg10[%c0_69, %c0_70, %c0_71] : memref<10x16x64xf32, #tpu.memory_space<vmem>>, vector<10x16x64xf32>
    tpu.vector_store %arg10[%c0_69, %c0_70, %c0_71], %41 {strides = array<i32>} : memref<10x16x64xf32, #tpu.memory_space<vmem>>, vector<10x16x64xf32>,
    %c0_72 = arith.constant 0 : index
    %c1_73 = arith.constant 1 : index
    %c2_74 = arith.constant 2 : index
    %c0_75 = arith.constant 0 : index
    %43 = vector.load %arg2[%c0_72, %c1_73, %c2_74, %c0_75] : memref<1x12x24x128xf32, #tpu.memory_space<vmem>>, vector<1x10x16x128xf32>
    %44 = vector.shape_cast %43 : vector<1x10x16x128xf32> to vector<10x16x128xf32>
    %c0_76 = arith.constant 0 : index
    %c0_77 = arith.constant 0 : index
    %c0_78 = arith.constant 0 : index
    %45 = vector.load %arg10[%c0_76, %c0_77, %c0_78] : memref<10x16x64xf32, #tpu.memory_space<vmem>>, vector<10x16x64xf32>
    %c1_79 = arith.constant 1 : index
    %c2_80 = arith.constant 2 : index
    %c0_81 = arith.constant 0 : index
    %c0_82 = arith.constant 0 : index
    %46 = vector.load %arg3[%c1_79, %c2_80, %c0_81, %c0_82] : memref<3x3x128x64xf32, #tpu.memory_space<vmem>>, vector<1x1x128x64xf32>
    %47 = vector.shape_cast %46 : vector<1x1x128x64xf32> to vector<128x64xf32>
    "tpu.trace_start"() <{level = 10 : i32, message = "hwk,ko->hwo"}> : () -> ()
    %cst_83 = arith.constant dense<0.000000e+00> : vector<10x16x64xf32>
    %48 = tpu.matmul %44, %47, %cst_83 {dimension_numbers = #tpu.dot_dimension_numbers<[2], [0], [0, 1], [1], [0, 0, 0, 1, 1, 1], [], []>} : vector<10x16x128xf32>, vector<128x64xf32>, vector<10x16x64xf32> -> vector<10x16x64xf32>
    "tpu.trace_stop"() : () -> ()
    %49 = arith.addf %45, %48 : vector<10x16x64xf32>
    %c0_84 = arith.constant 0 : index
    %c0_85 = arith.constant 0 : index
    %c0_86 = arith.constant 0 : index
    %50 = vector.load %arg10[%c0_84, %c0_85, %c0_86] : memref<10x16x64xf32, #tpu.memory_space<vmem>>, vector<10x16x64xf32>
    tpu.vector_store %arg10[%c0_84, %c0_85, %c0_86], %49 {strides = array<i32>} : memref<10x16x64xf32, #tpu.memory_space<vmem>>, vector<10x16x64xf32>,
    %c0_87 = arith.constant 0 : index
    %c2_88 = arith.constant 2 : index
    %c0_89 = arith.constant 0 : index
    %c0_90 = arith.constant 0 : index
    %51 = vector.load %arg2[%c0_87, %c2_88, %c0_89, %c0_90] : memref<1x12x24x128xf32, #tpu.memory_space<vmem>>, vector<1x10x16x128xf32>
    %52 = vector.shape_cast %51 : vector<1x10x16x128xf32> to vector<10x16x128xf32>
    %c0_91 = arith.constant 0 : index
    %c0_92 = arith.constant 0 : index
    %c0_93 = arith.constant 0 : index
    %53 = vector.load %arg10[%c0_91, %c0_92, %c0_93] : memref<10x16x64xf32, #tpu.memory_space<vmem>>, vector<10x16x64xf32>
    %c2_94 = arith.constant 2 : index
    %c0_95 = arith.constant 0 : index
    %c0_96 = arith.constant 0 : index
    %c0_97 = arith.constant 0 : index
    %54 = vector.load %arg3[%c2_94, %c0_95, %c0_96, %c0_97] : memref<3x3x128x64xf32, #tpu.memory_space<vmem>>, vector<1x1x128x64xf32>
    %55 = vector.shape_cast %54 : vector<1x1x128x64xf32> to vector<128x64xf32>
    "tpu.trace_start"() <{level = 10 : i32, message = "hwk,ko->hwo"}> : () -> ()
    %cst_98 = arith.constant dense<0.000000e+00> : vector<10x16x64xf32>
    %56 = tpu.matmul %52, %55, %cst_98 {dimension_numbers = #tpu.dot_dimension_numbers<[2], [0], [0, 1], [1], [0, 0, 0, 1, 1, 1], [], []>} : vector<10x16x128xf32>, vector<128x64xf32>, vector<10x16x64xf32> -> vector<10x16x64xf32>
    "tpu.trace_stop"() : () -> ()
    %57 = arith.addf %53, %56 : vector<10x16x64xf32>
    %c0_99 = arith.constant 0 : index
    %c0_100 = arith.constant 0 : index
    %c0_101 = arith.constant 0 : index
    %58 = vector.load %arg10[%c0_99, %c0_100, %c0_101] : memref<10x16x64xf32, #tpu.memory_space<vmem>>, vector<10x16x64xf32>
    tpu.vector_store %arg10[%c0_99, %c0_100, %c0_101], %57 {strides = array<i32>} : memref<10x16x64xf32, #tpu.memory_space<vmem>>, vector<10x16x64xf32>,
    %c0_102 = arith.constant 0 : index
    %c2_103 = arith.constant 2 : index
    %c1_104 = arith.constant 1 : index
    %c0_105 = arith.constant 0 : index
    %59 = vector.load %arg2[%c0_102, %c2_103, %c1_104, %c0_105] : memref<1x12x24x128xf32, #tpu.memory_space<vmem>>, vector<1x10x16x128xf32>
    %60 = vector.shape_cast %59 : vector<1x10x16x128xf32> to vector<10x16x128xf32>
    %c0_106 = arith.constant 0 : index
    %c0_107 = arith.constant 0 : index
    %c0_108 = arith.constant 0 : index
    %61 = vector.load %arg10[%c0_106, %c0_107, %c0_108] : memref<10x16x64xf32, #tpu.memory_space<vmem>>, vector<10x16x64xf32>
    %c2_109 = arith.constant 2 : index
    %c1_110 = arith.constant 1 : index
    %c0_111 = arith.constant 0 : index
    %c0_112 = arith.constant 0 : index
    %62 = vector.load %arg3[%c2_109, %c1_110, %c0_111, %c0_112] : memref<3x3x128x64xf32, #tpu.memory_space<vmem>>, vector<1x1x128x64xf32>
    %63 = vector.shape_cast %62 : vector<1x1x128x64xf32> to vector<128x64xf32>
    "tpu.trace_start"() <{level = 10 : i32, message = "hwk,ko->hwo"}> : () -> ()
    %cst_113 = arith.constant dense<0.000000e+00> : vector<10x16x64xf32>
    %64 = tpu.matmul %60, %63, %cst_113 {dimension_numbers = #tpu.dot_dimension_numbers<[2], [0], [0, 1], [1], [0, 0, 0, 1, 1, 1], [], []>} : vector<10x16x128xf32>, vector<128x64xf32>, vector<10x16x64xf32> -> vector<10x16x64xf32>
    "tpu.trace_stop"() : () -> ()
    %65 = arith.addf %61, %64 : vector<10x16x64xf32>
    %c0_114 = arith.constant 0 : index
    %c0_115 = arith.constant 0 : index
    %c0_116 = arith.constant 0 : index
    %66 = vector.load %arg10[%c0_114, %c0_115, %c0_116] : memref<10x16x64xf32, #tpu.memory_space<vmem>>, vector<10x16x64xf32>
    tpu.vector_store %arg10[%c0_114, %c0_115, %c0_116], %65 {strides = array<i32>} : memref<10x16x64xf32, #tpu.memory_space<vmem>>, vector<10x16x64xf32>,
    %c0_117 = arith.constant 0 : index
    %c2_118 = arith.constant 2 : index
    %c2_119 = arith.constant 2 : index
    %c0_120 = arith.constant 0 : index
    %67 = vector.load %arg2[%c0_117, %c2_118, %c2_119, %c0_120] : memref<1x12x24x128xf32, #tpu.memory_space<vmem>>, vector<1x10x16x128xf32>
    %68 = vector.shape_cast %67 : vector<1x10x16x128xf32> to vector<10x16x128xf32>
    %c0_121 = arith.constant 0 : index
    %c0_122 = arith.constant 0 : index
    %c0_123 = arith.constant 0 : index
    %69 = vector.load %arg10[%c0_121, %c0_122, %c0_123] : memref<10x16x64xf32, #tpu.memory_space<vmem>>, vector<10x16x64xf32>
    %c2_124 = arith.constant 2 : index
    %c2_125 = arith.constant 2 : index
    %c0_126 = arith.constant 0 : index
    %c0_127 = arith.constant 0 : index
    %70 = vector.load %arg3[%c2_124, %c2_125, %c0_126, %c0_127] : memref<3x3x128x64xf32, #tpu.memory_space<vmem>>, vector<1x1x128x64xf32>
    %71 = vector.shape_cast %70 : vector<1x1x128x64xf32> to vector<128x64xf32>
    "tpu.trace_start"() <{level = 10 : i32, message = "hwk,ko->hwo"}> : () -> ()
    %cst_128 = arith.constant dense<0.000000e+00> : vector<10x16x64xf32>
    %72 = tpu.matmul %68, %71, %cst_128 {dimension_numbers = #tpu.dot_dimension_numbers<[2], [0], [0, 1], [1], [0, 0, 0, 1, 1, 1], [], []>} : vector<10x16x128xf32>, vector<128x64xf32>, vector<10x16x64xf32> -> vector<10x16x64xf32>
    "tpu.trace_stop"() : () -> ()
    %73 = arith.addf %69, %72 : vector<10x16x64xf32>
    %c0_129 = arith.constant 0 : index
    %c0_130 = arith.constant 0 : index
    %c0_131 = arith.constant 0 : index
    %74 = vector.load %arg10[%c0_129, %c0_130, %c0_131] : memref<10x16x64xf32, #tpu.memory_space<vmem>>, vector<10x16x64xf32>
    tpu.vector_store %arg10[%c0_129, %c0_130, %c0_131], %73 {strides = array<i32>} : memref<10x16x64xf32, #tpu.memory_space<vmem>>, vector<10x16x64xf32>,
    %c1_i32 = arith.constant 1 : i32
    %75 = arith.cmpi eq, %arg1, %c1_i32 : i32
    %76 = arith.extui %75 : i1 to i32
    %c0_i32_132 = arith.constant 0 : i32
    %77 = arith.cmpi ne, %76, %c0_i32_132 : i32
    scf.if %77 {
      %c0_133 = arith.constant 0 : index
      %c0_134 = arith.constant 0 : index
      %78 = vector.load %arg4[%c0_133, %c0_134] : memref<2x64xf32, #tpu.memory_space<vmem>>, vector<2x64xf32>
      %79 = vector.extract_strided_slice %78 {offsets = [0, 0], sizes = [1, 64], strides = [1, 1]} : vector<2x64xf32> to vector<1x64xf32>
      %80 = vector.shape_cast %79 : vector<1x64xf32> to vector<1x1x64xf32>
      %81 = vector.extract_strided_slice %78 {offsets = [1, 0], sizes = [1, 64], strides = [1, 1]} : vector<2x64xf32> to vector<1x64xf32>
      %82 = vector.shape_cast %81 : vector<1x64xf32> to vector<1x1x64xf32>
      %c0_135 = arith.constant 0 : index
      %c0_136 = arith.constant 0 : index
      %c0_137 = arith.constant 0 : index
      %83 = vector.load %arg10[%c0_135, %c0_136, %c0_137] : memref<10x16x64xf32, #tpu.memory_space<vmem>>, vector<10x16x64xf32>
      %84 = vector.broadcast %80 : vector<1x1x64xf32> to vector<10x16x64xf32>
      %85 = arith.mulf %83, %84 : vector<10x16x64xf32>
      %86 = vector.broadcast %82 : vector<1x1x64xf32> to vector<10x16x64xf32>
      %87 = arith.addf %85, %86 : vector<10x16x64xf32>
      %cst_138 = arith.constant 0.000000e+00 : f32
      %88 = vector.broadcast %cst_138 : f32 to vector<10x16x64xf32>
      %89 = arith.maximumf %87, %88 : vector<10x16x64xf32>
      %c0_139 = arith.constant 0 : index
      %c0_140 = arith.constant 0 : index
      %c0_141 = arith.constant 0 : index
      %90 = vector.load %arg10[%c0_139, %c0_140, %c0_141] : memref<10x16x64xf32, #tpu.memory_space<vmem>>, vector<10x16x64xf32>
      tpu.vector_store %arg10[%c0_139, %c0_140, %c0_141], %89 {strides = array<i32>} : memref<10x16x64xf32, #tpu.memory_space<vmem>>, vector<10x16x64xf32>,
      %c0_142 = arith.constant 0 : index
      %c0_143 = arith.constant 0 : index
      %c0_144 = arith.constant 0 : index
      %91 = vector.load %arg10[%c0_142, %c0_143, %c0_144] : memref<10x16x64xf32, #tpu.memory_space<vmem>>, vector<10x16x64xf32>
      %c0_145 = arith.constant 0 : index
      %c0_146 = arith.constant 0 : index
      %92 = vector.load %arg5[%c0_145, %c0_146] : memref<64x7xf32, #tpu.memory_space<vmem>>, vector<64x7xf32>
      "tpu.trace_start"() <{level = 10 : i32, message = "hwm,mc->hwc"}> : () -> ()
      %cst_147 = arith.constant dense<0.000000e+00> : vector<10x16x7xf32>
      %93 = tpu.matmul %91, %92, %cst_147 {dimension_numbers = #tpu.dot_dimension_numbers<[2], [0], [0, 1], [1], [0, 0, 0, 1, 1, 1], [], []>} : vector<10x16x64xf32>, vector<64x7xf32>, vector<10x16x7xf32> -> vector<10x16x7xf32>
      "tpu.trace_stop"() : () -> ()
      %c0_148 = arith.constant 0 : index
      %c0_149 = arith.constant 0 : index
      %94 = vector.load %arg6[%c0_148, %c0_149] : memref<1x7xf32, #tpu.memory_space<vmem>>, vector<1x7xf32>
      %95 = vector.shape_cast %94 : vector<1x7xf32> to vector<1x1x7xf32>
      %96 = vector.broadcast %95 : vector<1x1x7xf32> to vector<10x16x7xf32>
      %97 = arith.addf %93, %96 : vector<10x16x7xf32>
      %98 = tpu.transpose %97, [2, 0, 1] : vector<10x16x7xf32> -> vector<7x10x16xf32>
      %c0_150 = arith.constant 0 : index
      %c0_151 = arith.constant 0 : index
      %99 = vector.load %arg8[%c0_150, %c0_151] : memref<20x16xf32, #tpu.memory_space<vmem>>, vector<20x16xf32>
      %c0_i32_152 = arith.constant 0 : i32
      %c3_i32 = arith.constant 3 : i32
      %100 = arith.addi %c0_i32_152, %c3_i32 : i32
      %c1_i32_153 = arith.constant 1 : i32
      scf.for %arg11 = %c0_i32_152 to %100 step %c1_i32_153  : i32 {
        %c8_i32 = arith.constant 8 : i32
        %101 = arith.muli %arg11, %c8_i32 : i32
        %102 = tpu.assume_multiple %101, 8 : i32
        %103 = arith.index_cast %102 : i32 to index
        %c0_155 = arith.constant 0 : index
        %104 = vector.load %arg7[%103, %c0_155] : memref<24x10xf32, #tpu.memory_space<vmem>>, vector<8x10xf32>
        "tpu.trace_start"() <{level = 10 : i32, message = "Ih,chw->cIw"}> : () -> ()
        %cst_156 = arith.constant dense<0.000000e+00> : vector<7x16x8xf32>
        %105 = tpu.matmul %98, %104, %cst_156 {dimension_numbers = #tpu.dot_dimension_numbers<[1], [1], [0, 2], [0], [0, 0, 0, 2, 1, 0], [], []>} : vector<7x10x16xf32>, vector<8x10xf32>, vector<7x16x8xf32> -> vector<7x16x8xf32>
        %106 = tpu.transpose %105, [0, 2, 1] : vector<7x16x8xf32> -> vector<7x8x16xf32>
        "tpu.trace_stop"() : () -> ()
        "tpu.trace_start"() <{level = 10 : i32, message = "cIw,Jw->cIJ"}> : () -> ()
        %cst_157 = arith.constant dense<0.000000e+00> : vector<7x8x20xf32>
        %107 = tpu.matmul %106, %99, %cst_157 {dimension_numbers = #tpu.dot_dimension_numbers<[2], [1], [0, 1], [0], [0, 0, 0, 1, 1, 0], [], []>} : vector<7x8x16xf32>, vector<20x16xf32>, vector<7x8x20xf32> -> vector<7x8x20xf32>
        "tpu.trace_stop"() : () -> ()
        %c0_158 = arith.constant 0 : index
        %c0_159 = arith.constant 0 : index
        %108 = arith.index_cast %102 : i32 to index
        %c0_160 = arith.constant 0 : index
        %109 = vector.load %arg9[%c0_158, %c0_159, %108, %c0_160] : memref<1x7x24x20xf32, #tpu.memory_space<vmem>>, vector<1x7x8x20xf32>
        %110 = vector.shape_cast %109 : vector<1x7x8x20xf32> to vector<7x8x20xf32>
        %111 = vector.shape_cast %107 : vector<7x8x20xf32> to vector<1x7x8x20xf32>
        tpu.vector_store %arg9[%c0_158, %c0_159, %108, %c0_160], %111 {strides = array<i32>} : memref<1x7x24x20xf32, #tpu.memory_space<vmem>>, vector<1x7x8x20xf32>,
      }
      %c3_i32_154 = arith.constant 3 : i32
    } else {
    }
    return
  }
  func.func @transform_0(%arg0: i32, %arg1: i32) -> (i32, i32, i32, i32) {
    %c0_i32 = arith.constant 0 : i32
    %c0_i32_0 = arith.constant 0 : i32
    %c0_i32_1 = arith.constant 0 : i32
    return %arg0, %c0_i32, %c0_i32_0, %arg1 : i32, i32, i32, i32
  }
  func.func @transform_1(%arg0: i32, %arg1: i32) -> (i32, i32, i32, i32) {
    %c0_i32 = arith.constant 0 : i32
    %c0_i32_0 = arith.constant 0 : i32
    %c0_i32_1 = arith.constant 0 : i32
    %c0_i32_2 = arith.constant 0 : i32
    return %c0_i32, %c0_i32_0, %arg1, %c0_i32_1 : i32, i32, i32, i32
  }
  func.func @transform_2(%arg0: i32, %arg1: i32) -> (i32, i32) {
    %c0_i32 = arith.constant 0 : i32
    %c0_i32_0 = arith.constant 0 : i32
    %c0_i32_1 = arith.constant 0 : i32
    return %c0_i32, %c0_i32_0 : i32, i32
  }
  func.func @transform_3(%arg0: i32, %arg1: i32) -> (i32, i32) {
    %c0_i32 = arith.constant 0 : i32
    %c0_i32_0 = arith.constant 0 : i32
    %c0_i32_1 = arith.constant 0 : i32
    return %c0_i32, %c0_i32_0 : i32, i32
  }
  func.func @transform_4(%arg0: i32, %arg1: i32) -> (i32, i32) {
    %c0_i32 = arith.constant 0 : i32
    %c0_i32_0 = arith.constant 0 : i32
    %c0_i32_1 = arith.constant 0 : i32
    return %c0_i32, %c0_i32_0 : i32, i32
  }
  func.func @transform_5(%arg0: i32, %arg1: i32) -> (i32, i32) {
    %c0_i32 = arith.constant 0 : i32
    %c0_i32_0 = arith.constant 0 : i32
    %c0_i32_1 = arith.constant 0 : i32
    return %c0_i32, %c0_i32_0 : i32, i32
  }
  func.func @transform_6(%arg0: i32, %arg1: i32) -> (i32, i32) {
    %c0_i32 = arith.constant 0 : i32
    %c0_i32_0 = arith.constant 0 : i32
    %c0_i32_1 = arith.constant 0 : i32
    return %c0_i32, %c0_i32_0 : i32, i32
  }
  func.func @transform_7(%arg0: i32, %arg1: i32) -> (i32, i32, i32, i32) {
    %c0_i32 = arith.constant 0 : i32
    %c0_i32_0 = arith.constant 0 : i32
    %c0_i32_1 = arith.constant 0 : i32
    %c0_i32_2 = arith.constant 0 : i32
    return %arg0, %c0_i32, %c0_i32_0, %c0_i32_1 : i32, i32, i32, i32
  }
}

</mosaic_0001>

<bundles_post_ra>
// kernel: tpu_custom_call.1
= control target key start
LH: loop header
LB: loop body
LE: loop exit
PB: predicated region body
PF: predicated region fallthrough
CT: control target
= control target key end

     0   :  { %s7151_s24 = smov 0   ;;  %s7153_s25 = smov 0   ;;  %s8645_s0 = inlined_call_operand.vmem [shape: f32[2,12,24,256], index: 0, kind: input, shape index: {}]   ;;  %s8646_s1 = inlined_call_operand.vmem [shape: f32[3,3,256,64], index: 1, kind: input, shape index: {}]   ;;  %s8647_s2 = inlined_call_operand.vmem [shape: f32[2,64], index: 2, kind: input, shape index: {}]   ;;  %s8648_s3 = inlined_call_operand.vmem [shape: f32[64,7], index: 3, kind: input, shape index: {}]   ;;  %s8649_s4 = inlined_call_operand.vmem [shape: f32[1,7], index: 4, kind: input, shape index: {}]   ;;  %s8650_s5 = inlined_call_operand.vmem [shape: f32[24,10], index: 5, kind: input, shape index: {}]   ;;  %s8651_s6 = inlined_call_operand.vmem [shape: f32[20,16], index: 6, kind: input, shape index: {}]   ;;  %s8652_s7 = inlined_call_operand.vmem [shape: f32[2,7,24,20], index: 7, kind: output, shape index: {}]  }
   0x1   :  { %s7155_s26 = smov 0   ;;  %s7157_s27 = smov 0  }
   0x2   :  { %s7159_s28 = smov 0   ;;  %s7161_s29 = smov 0  }
   0x3   :  { %s7163_s30 = smov 0   ;;  %s7165_s8 = smov 0  }
   0x4   :  { %s7167_s9 = smov 0  }
   0x5 LB: > { %s26_s10 = sadd.s32 1, %s7091_s30  ;;  %s29_s11 = sadd.s32 1, %s7095_s8  ;;  %s7099_s9 = sphi %s7167_s9, %s17_s9   ;;  %s7095_s8 = sphi %s7165_s8, %s8674_s8   ;;  %s7091_s30 = sphi %s7163_s30, %s8673_s30   ;;  %s7087_s29 = sphi %s7161_s29, %s8672_s29   ;;  %s7083_s28 = sphi %s7159_s28, %s8671_s28   ;;  %s7079_s27 = sphi %s7157_s27, %s8670_s27   ;;  %s7075_s26 = sphi %s7155_s26, %s8669_s26   ;;  %s7071_s25 = sphi %s7153_s25, %s8668_s25   ;;  %s7067_s24 = sphi %s7151_s24, %s8667_s24  }
   0x6   : > { %p27_p0 = scmp.ge.s32.totalorder %s26_s10, 2  ;;  %p45_p1 = scmp.ne.s32.totalorder %s7079_s27, %s7075_s26 }
   0x7   : > { %p46_p2 = scmp.eq.s32.totalorder %s7099_s9, 0  ;;  %s64_s14 = sadd.s32 1, %s7071_s25 }
   0x8   : > { %s8676_s10 = smov (%p27_p0, %s26_s10), 0  ;;  %s8678_s11 = smov (!%p27_p0, %s29_s11), %s7095_s8 }
   0x9   : > { %8657 = sst [smem:[#allocation5_spill]] %s8676_s10  ;;  %s34_s12 = ssub.s32 %s7091_s30, %s8676_s10 }
   0xa   : > { %p7206_p3 = por %p46_p2, %p45_p1  ;;  %p31_p4 = scmp.ge.s32.totalorder %s8678_s11, 2 }
   0xb   : > { %p62_p5 = scmp.eq.s32.totalorder %s34_s12, 0  ;;  %p71_p6 = scmp.ne.s32.totalorder %s7071_s25, %s7067_s24 }
   0xc   : > { %s8680_s11 = smov (%p31_p4, %s8678_s11), 0  ;;  %s38_s19 = sadd.s32 1, %s7079_s27 }
   0xd   : > { %8659 = sst [smem:[#allocation6_spill]] %s8680_s11  ;;  %s33_s16 = ssub.s32 %s7095_s8, %s8680_s11 }
   0xe   : > { %s7216_s15 = scalar_select %p62_p5, %s7071_s25, %s64_s14  }
   0xf   : > { %p7220_p7 = por %p71_p6, %p46_p2  ;;  %s35_s18 = sor.u32 %s34_s12, %s33_s16 }
  0x10   : > { %p36_p8 = scmp.eq.s32.totalorder %s35_s18, 0  ;;  %p5260_p9 = scmp.ge.s32.totalorder %s7099_s9, 4 }
  0x12   : > { %s7226_s20 = scalar_select %p36_p8, %s7079_s27, %s38_s19  }
  0x13   : > { %243 = sbr.rel (%p5260_p9) target bundleno = 128 (0x80), region = 36 }
  0x1a   : > { %246 = sbr.rel (!%p7206_p3) target bundleno = 51 (0x33), region = 40  ;;  %s248_s21 = sand.u32 (%p7206_p3), 1, %s7079_s27  }
  0x1b   : > { %s6934_s22 = smul.u32 (%p7206_p3), 72, %s7095_s8 }
  0x1c   : > { %s6933_s23 = smul.u32 (%p7206_p3), 288, %s248_s21 }
  0x1d   : > { %s252_s14 = sadd.s32 (%p7206_p3), %s7091_s30, %s6934_s22 }
  0x1e   : > { %s5261_s11 = sshll.u32 (%p7206_p3), %s252_s14, 3  ;;  %s7242_s13 = scalar_lea.vmem (%p7206_p3), [#allocation3], %s6933_s23 }
  0x1f   : > { %s7237_s16 = scalar_lea.vmem (%p7206_p3), %s8645_s0, %s5261_s11 }
  0x20   : > { %v352_v0 = vld [vmem:[%s7237_s16] sm:$0xff] (%p7206_p3)  ;;  %v354_v1 = vld [vmem:[%s7237_s16 + $0x10] sm:$0xff] (%p7206_p3) }
  0x21   : > { %v356_v2 = vld [vmem:[%s7237_s16 + $0x20] sm:$0xff]  ;;  %353 = vst [vmem:[%s7242_s13] sm:$0xff] %v352_v0  ;;  %355 = vst [vmem:[%s7242_s13 + $0x8] sm:$0xff] %v354_v1  ;;  %v358_v3 = vld [vmem:[%s7237_s16 + $0x30] sm:$0xff] }
  0x22   : > { %357 = vst [vmem:[%s7242_s13 + $0x10] sm:$0xff] %v356_v2  ;;  %v360_v4 = vld [vmem:[%s7237_s16 + $0x40] sm:$0xff]  ;;  %v362_v5 = vld [vmem:[%s7237_s16 + $0x50] sm:$0xff]  ;;  %359 = vst [vmem:[%s7242_s13 + $0x18] sm:$0xff] %v358_v3 }
  0x23   : > { %361 = vst [vmem:[%s7242_s13 + $0x20] sm:$0xff] %v360_v4  ;;  %363 = vst [vmem:[%s7242_s13 + $0x28] sm:$0xff] %v362_v5  ;;  %v364_v6 = vld [vmem:[%s7237_s16 + $0x60] sm:$0xff]  ;;  %v366_v7 = vld [vmem:[%s7237_s16 + $0x70] sm:$0xff] }
  0x24   : > { %v368_v8 = vld [vmem:[%s7237_s16 + $0x80] sm:$0xff]  ;;  %365 = vst [vmem:[%s7242_s13 + $0x30] sm:$0xff] %v364_v6  ;;  %367 = vst [vmem:[%s7242_s13 + $0x38] sm:$0xff] %v366_v7  ;;  %v370_v9 = vld [vmem:[%s7237_s16 + $0x90] sm:$0xff] }
  0x25   : > { %369 = vst [vmem:[%s7242_s13 + $0x40] sm:$0xff] %v368_v8  ;;  %v372_v10 = vld [vmem:[%s7237_s16 + $0xa0] sm:$0xff]  ;;  %v374_v11 = vld [vmem:[%s7237_s16 + $0xb0] sm:$0xff]  ;;  %371 = vst [vmem:[%s7242_s13 + $0x48] sm:$0xff] %v370_v9 }
  0x26   : > { %373 = vst [vmem:[%s7242_s13 + $0x50] sm:$0xff] %v372_v10  ;;  %375 = vst [vmem:[%s7242_s13 + $0x58] sm:$0xff] %v374_v11  ;;  %v376_v12 = vld [vmem:[%s7237_s16 + $0xc0] sm:$0xff]  ;;  %v378_v13 = vld [vmem:[%s7237_s16 + $0xd0] sm:$0xff] }
  0x27   : > { %v380_v14 = vld [vmem:[%s7237_s16 + $0xe0] sm:$0xff]  ;;  %377 = vst [vmem:[%s7242_s13 + $0x60] sm:$0xff] %v376_v12  ;;  %379 = vst [vmem:[%s7242_s13 + $0x68] sm:$0xff] %v378_v13  ;;  %v382_v15 = vld [vmem:[%s7237_s16 + $0xf0] sm:$0xff] }
  0x28   : > { %381 = vst [vmem:[%s7242_s13 + $0x70] sm:$0xff] %v380_v14  ;;  %v384_v16 = vld [vmem:[%s7237_s16 + $0x100] sm:$0xff]  ;;  %v386_v17 = vld [vmem:[%s7237_s16 + $0x110] sm:$0xff]  ;;  %383 = vst [vmem:[%s7242_s13 + $0x78] sm:$0xff] %v382_v15 }
  0x29   : > { %385 = vst [vmem:[%s7242_s13 + $0x80] sm:$0xff] %v384_v16  ;;  %387 = vst [vmem:[%s7242_s13 + $0x88] sm:$0xff] %v386_v17  ;;  %v388_v18 = vld [vmem:[%s7237_s16 + $0x120] sm:$0xff]  ;;  %v390_v19 = vld [vmem:[%s7237_s16 + $0x130] sm:$0xff] }
  0x2a   : > { %v392_v20 = vld [vmem:[%s7237_s16 + $0x140] sm:$0xff]  ;;  %389 = vst [vmem:[%s7242_s13 + $0x90] sm:$0xff] %v388_v18  ;;  %391 = vst [vmem:[%s7242_s13 + $0x98] sm:$0xff] %v390_v19  ;;  %v394_v21 = vld [vmem:[%s7237_s16 + $0x150] sm:$0xff] }
  0x2b   : > { %393 = vst [vmem:[%s7242_s13 + $0xa0] sm:$0xff] %v392_v20  ;;  %v396_v22 = vld [vmem:[%s7237_s16 + $0x160] sm:$0xff]  ;;  %v398_v23 = vld [vmem:[%s7237_s16 + $0x170] sm:$0xff]  ;;  %395 = vst [vmem:[%s7242_s13 + $0xa8] sm:$0xff] %v394_v21 }
  0x2c   : > { %397 = vst [vmem:[%s7242_s13 + $0xb0] sm:$0xff] %v396_v22  ;;  %399 = vst [vmem:[%s7242_s13 + $0xb8] sm:$0xff] %v398_v23  ;;  %v400_v24 = vld [vmem:[%s7237_s16 + $0x180] sm:$0xff]  ;;  %v402_v25 = vld [vmem:[%s7237_s16 + $0x190] sm:$0xff] }
  0x2d   : > { %v404_v26 = vld [vmem:[%s7237_s16 + $0x1a0] sm:$0xff]  ;;  %401 = vst [vmem:[%s7242_s13 + $0xc0] sm:$0xff] %v400_v24  ;;  %403 = vst [vmem:[%s7242_s13 + $0xc8] sm:$0xff] %v402_v25  ;;  %v406_v27 = vld [vmem:[%s7237_s16 + $0x1b0] sm:$0xff] }
  0x2e   : > { %405 = vst [vmem:[%s7242_s13 + $0xd0] sm:$0xff] %v404_v26  ;;  %v408_v28 = vld [vmem:[%s7237_s16 + $0x1c0] sm:$0xff]  ;;  %v410_v29 = vld [vmem:[%s7237_s16 + $0x1d0] sm:$0xff]  ;;  %407 = vst [vmem:[%s7242_s13 + $0xd8] sm:$0xff] %v406_v27 }
  0x2f   : > { %409 = vst [vmem:[%s7242_s13 + $0xe0] sm:$0xff] %v408_v28  ;;  %411 = vst [vmem:[%s7242_s13 + $0xe8] sm:$0xff] %v410_v29  ;;  %v412_v30 = vld [vmem:[%s7237_s16 + $0x1e0] sm:$0xff]  ;;  %v414_v31 = vld [vmem:[%s7237_s16 + $0x1f0] sm:$0xff] }
  0x30   : > { %v416_v32 = vld [vmem:[%s7237_s16 + $0x200] sm:$0xff]  ;;  %413 = vst [vmem:[%s7242_s13 + $0xf0] sm:$0xff] %v412_v30  ;;  %415 = vst [vmem:[%s7242_s13 + $0xf8] sm:$0xff] %v414_v31  ;;  %v418_v33 = vld [vmem:[%s7237_s16 + $0x210] sm:$0xff] }
  0x31   : > { %417 = vst [vmem:[%s7242_s13 + $0x100] sm:$0xff] %v416_v32  ;;  %v420_v34 = vld [vmem:[%s7237_s16 + $0x220] sm:$0xff]  ;;  %v422_v35 = vld [vmem:[%s7237_s16 + $0x230] sm:$0xff]  ;;  %419 = vst [vmem:[%s7242_s13 + $0x108] sm:$0xff] %v418_v33 }
  0x32   : > { %421 = vst [vmem:[%s7242_s13 + $0x110] sm:$0xff] %v420_v34  ;;  %423 = vst [vmem:[%s7242_s13 + $0x118] sm:$0xff] %v422_v35 }
  0x33 PF: > { %429 = sbr.rel (!%p7220_p7) target bundleno = 128 (0x80), region = 78  ;;  %s431_s10 = sand.u32 (%p7220_p7), 1, %s7071_s25  }
  0x34   : > { %s5565_s11 = sshll.u32 (%p7220_p7), %s7091_s30, 7  ;;  %s6935_s18 = smul.u32 (%p7220_p7), 1152, %s431_s10 }
  0x35   : > { %s7320_s22 = scalar_lea.vmem (%p7220_p7), %s8646_s1, %s5565_s11 }
  0x36   : > { %v750_v36 = vld [vmem:[%s7320_s22] sm:$0xff] (%p7220_p7)  ;;  %v752_v37 = vld [vmem:[%s7320_s22 + $0x8] sm:$0xff] (%p7220_p7)  ;;  %v754_v38 = vld [vmem:[%s7320_s22 + $0x10] sm:$0xff] (%p7220_p7)  ;;  %s7328_s17 = scalar_lea.vmem (%p7220_p7), [#allocation4], %s6935_s18 }
  0x37   : > { %v756_v39 = vld [vmem:[%s7320_s22 + $0x18] sm:$0xff] (%p7220_p7)  ;;  %v758_v40 = vld [vmem:[%s7320_s22 + $0x20] sm:$0xff] (%p7220_p7)  ;;  %v760_v41 = vld [vmem:[%s7320_s22 + $0x28] sm:$0xff] (%p7220_p7)  ;;  %751 = vst [vmem:[%s7328_s17] sm:$0xff] (%p7220_p7), %v750_v36 }
  0x38   : > { %753 = vst [vmem:[%s7328_s17 + $0x8] sm:$0xff] (%p7220_p7), %v752_v37  ;;  %755 = vst [vmem:[%s7328_s17 + $0x10] sm:$0xff] (%p7220_p7), %v754_v38  ;;  %v762_v42 = vld [vmem:[%s7320_s22 + $0x30] sm:$0xff] (%p7220_p7)  ;;  %v764_v43 = vld [vmem:[%s7320_s22 + $0x38] sm:$0xff] (%p7220_p7) }
  0x39   : > { %757 = vst [vmem:[%s7328_s17 + $0x18] sm:$0xff] (%p7220_p7), %v756_v39  ;;  %759 = vst [vmem:[%s7328_s17 + $0x20] sm:$0xff] (%p7220_p7), %v758_v40  ;;  %v766_v44 = vld [vmem:[%s7320_s22 + $0x40] sm:$0xff] (%p7220_p7)  ;;  %v768_v45 = vld [vmem:[%s7320_s22 + $0x48] sm:$0xff] (%p7220_p7) }
  0x3a   : > { %761 = vst [vmem:[%s7328_s17 + $0x28] sm:$0xff] %v760_v41  ;;  %763 = vst [vmem:[%s7328_s17 + $0x30] sm:$0xff] %v762_v42  ;;  %v770_v46 = vld [vmem:[%s7320_s22 + $0x50] sm:$0xff]  ;;  %v772_v47 = vld [vmem:[%s7320_s22 + $0x58] sm:$0xff] }
  0x3b   : > { %765 = vst [vmem:[%s7328_s17 + $0x38] sm:$0xff] %v764_v43  ;;  %767 = vst [vmem:[%s7328_s17 + $0x40] sm:$0xff] %v766_v44  ;;  %v774_v48 = vld [vmem:[%s7320_s22 + $0x60] sm:$0xff]  ;;  %v776_v49 = vld [vmem:[%s7320_s22 + $0x68] sm:$0xff] }
  0x3c   : > { %769 = vst [vmem:[%s7328_s17 + $0x48] sm:$0xff] %v768_v45  ;;  %771 = vst [vmem:[%s7328_s17 + $0x50] sm:$0xff] %v770_v46  ;;  %v778_v50 = vld [vmem:[%s7320_s22 + $0x70] sm:$0xff]  ;;  %v780_v51 = vld [vmem:[%s7320_s22 + $0x78] sm:$0xff] }
  0x3d   : > { %773 = vst [vmem:[%s7328_s17 + $0x58] sm:$0xff] %v772_v47  ;;  %775 = vst [vmem:[%s7328_s17 + $0x60] sm:$0xff] %v774_v48  ;;  %v782_v52 = vld [vmem:[%s7320_s22 + $0x100] sm:$0xff]  ;;  %v784_v53 = vld [vmem:[%s7320_s22 + $0x108] sm:$0xff] }
  0x3e   : > { %777 = vst [vmem:[%s7328_s17 + $0x68] sm:$0xff] %v776_v49  ;;  %779 = vst [vmem:[%s7328_s17 + $0x70] sm:$0xff] %v778_v50  ;;  %v786_v54 = vld [vmem:[%s7320_s22 + $0x110] sm:$0xff]  ;;  %v788_v55 = vld [vmem:[%s7320_s22 + $0x118] sm:$0xff] }
  0x3f   : > { %781 = vst [vmem:[%s7328_s17 + $0x78] sm:$0xff] %v780_v51  ;;  %783 = vst [vmem:[%s7328_s17 + $0x80] sm:$0xff] %v782_v52  ;;  %v790_v56 = vld [vmem:[%s7320_s22 + $0x120] sm:$0xff]  ;;  %v792_v57 = vld [vmem:[%s7320_s22 + $0x128] sm:$0xff] }
  0x40   : > { %785 = vst [vmem:[%s7328_s17 + $0x88] sm:$0xff] %v784_v53  ;;  %787 = vst [vmem:[%s7328_s17 + $0x90] sm:$0xff] %v786_v54  ;;  %v794_v58 = vld [vmem:[%s7320_s22 + $0x130] sm:$0xff]  ;;  %v796_v59 = vld [vmem:[%s7320_s22 + $0x138] sm:$0xff] }
  0x41   : > { %789 = vst [vmem:[%s7328_s17 + $0x98] sm:$0xff] %v788_v55  ;;  %791 = vst [vmem:[%s7328_s17 + $0xa0] sm:$0xff] %v790_v56  ;;  %v798_v60 = vld [vmem:[%s7320_s22 + $0x140] sm:$0xff]  ;;  %v800_v61 = vld [vmem:[%s7320_s22 + $0x148] sm:$0xff] }
  0x42   : > { %793 = vst [vmem:[%s7328_s17 + $0xa8] sm:$0xff] %v792_v57  ;;  %795 = vst [vmem:[%s7328_s17 + $0xb0] sm:$0xff] %v794_v58  ;;  %v802_v62 = vld [vmem:[%s7320_s22 + $0x150] sm:$0xff]  ;;  %v804_v63 = vld [vmem:[%s7320_s22 + $0x158] sm:$0xff] }
  0x43   : > { %797 = vst [vmem:[%s7328_s17 + $0xb8] sm:$0xff] %v796_v59  ;;  %799 = vst [vmem:[%s7328_s17 + $0xc0] sm:$0xff] %v798_v60  ;;  %v806_v0 = vld [vmem:[%s7320_s22 + $0x160] sm:$0xff]  ;;  %v808_v1 = vld [vmem:[%s7320_s22 + $0x168] sm:$0xff] }
  0x44   : > { %801 = vst [vmem:[%s7328_s17 + $0xc8] sm:$0xff] %v800_v61  ;;  %803 = vst [vmem:[%s7328_s17 + $0xd0] sm:$0xff] %v802_v62  ;;  %v810_v2 = vld [vmem:[%s7320_s22 + $0x170] sm:$0xff]  ;;  %v812_v3 = vld [vmem:[%s7320_s22 + $0x178] sm:$0xff] }
  0x45   : > { %805 = vst [vmem:[%s7328_s17 + $0xd8] sm:$0xff] %v804_v63  ;;  %807 = vst [vmem:[%s7328_s17 + $0xe0] sm:$0xff] %v806_v0  ;;  %v814_v4 = vld [vmem:[%s7320_s22 + $0x200] sm:$0xff]  ;;  %v816_v5 = vld [vmem:[%s7320_s22 + $0x208] sm:$0xff] }
  0x46   : > { %809 = vst [vmem:[%s7328_s17 + $0xe8] sm:$0xff] %v808_v1  ;;  %811 = vst [vmem:[%s7328_s17 + $0xf0] sm:$0xff] %v810_v2  ;;  %v818_v6 = vld [vmem:[%s7320_s22 + $0x210] sm:$0xff]  ;;  %v820_v7 = vld [vmem:[%s7320_s22 + $0x218] sm:$0xff] }
  0x47   : > { %813 = vst [vmem:[%s7328_s17 + $0xf8] sm:$0xff] %v812_v3  ;;  %815 = vst [vmem:[%s7328_s17 + $0x100] sm:$0xff] %v814_v4  ;;  %v822_v8 = vld [vmem:[%s7320_s22 + $0x220] sm:$0xff]  ;;  %v824_v9 = vld [vmem:[%s7320_s22 + $0x228] sm:$0xff] }
  0x48   : > { %817 = vst [vmem:[%s7328_s17 + $0x108] sm:$0xff] %v816_v5  ;;  %819 = vst [vmem:[%s7328_s17 + $0x110] sm:$0xff] %v818_v6  ;;  %v826_v10 = vld [vmem:[%s7320_s22 + $0x230] sm:$0xff]  ;;  %v828_v11 = vld [vmem:[%s7320_s22 + $0x238] sm:$0xff] }
  0x49   : > { %821 = vst [vmem:[%s7328_s17 + $0x118] sm:$0xff] %v820_v7  ;;  %823 = vst [vmem:[%s7328_s17 + $0x120] sm:$0xff] %v822_v8  ;;  %v830_v12 = vld [vmem:[%s7320_s22 + $0x240] sm:$0xff]  ;;  %v832_v13 = vld [vmem:[%s7320_s22 + $0x248] sm:$0xff] }
  0x4a   : > { %825 = vst [vmem:[%s7328_s17 + $0x128] sm:$0xff] %v824_v9  ;;  %827 = vst [vmem:[%s7328_s17 + $0x130] sm:$0xff] %v826_v10  ;;  %v834_v14 = vld [vmem:[%s7320_s22 + $0x250] sm:$0xff]  ;;  %v836_v15 = vld [vmem:[%s7320_s22 + $0x258] sm:$0xff] }
  0x4b   : > { %829 = vst [vmem:[%s7328_s17 + $0x138] sm:$0xff] %v828_v11  ;;  %831 = vst [vmem:[%s7328_s17 + $0x140] sm:$0xff] %v830_v12  ;;  %v838_v16 = vld [vmem:[%s7320_s22 + $0x260] sm:$0xff]  ;;  %v840_v17 = vld [vmem:[%s7320_s22 + $0x268] sm:$0xff] }
  0x4c   : > { %833 = vst [vmem:[%s7328_s17 + $0x148] sm:$0xff] %v832_v13  ;;  %835 = vst [vmem:[%s7328_s17 + $0x150] sm:$0xff] %v834_v14  ;;  %v842_v18 = vld [vmem:[%s7320_s22 + $0x270] sm:$0xff]  ;;  %v844_v19 = vld [vmem:[%s7320_s22 + $0x278] sm:$0xff] }
  0x4d   : > { %837 = vst [vmem:[%s7328_s17 + $0x158] sm:$0xff] %v836_v15  ;;  %839 = vst [vmem:[%s7328_s17 + $0x160] sm:$0xff] %v838_v16  ;;  %v846_v20 = vld [vmem:[%s7320_s22 + $0x300] sm:$0xff]  ;;  %v848_v21 = vld [vmem:[%s7320_s22 + $0x308] sm:$0xff] }
  0x4e   : > { %841 = vst [vmem:[%s7328_s17 + $0x168] sm:$0xff] %v840_v17  ;;  %843 = vst [vmem:[%s7328_s17 + $0x170] sm:$0xff] %v842_v18  ;;  %v850_v22 = vld [vmem:[%s7320_s22 + $0x310] sm:$0xff]  ;;  %v852_v23 = vld [vmem:[%s7320_s22 + $0x318] sm:$0xff] }
  0x4f   : > { %845 = vst [vmem:[%s7328_s17 + $0x178] sm:$0xff] %v844_v19  ;;  %847 = vst [vmem:[%s7328_s17 + $0x180] sm:$0xff] %v846_v20  ;;  %v854_v24 = vld [vmem:[%s7320_s22 + $0x320] sm:$0xff]  ;;  %v856_v25 = vld [vmem:[%s7320_s22 + $0x328] sm:$0xff] }
  0x50   : > { %849 = vst [vmem:[%s7328_s17 + $0x188] sm:$0xff] %v848_v21  ;;  %851 = vst [vmem:[%s7328_s17 + $0x190] sm:$0xff] %v850_v22  ;;  %v858_v26 = vld [vmem:[%s7320_s22 + $0x330] sm:$0xff]  ;;  %v860_v27 = vld [vmem:[%s7320_s22 + $0x338] sm:$0xff] }
  0x51   : > { %853 = vst [vmem:[%s7328_s17 + $0x198] sm:$0xff] %v852_v23  ;;  %855 = vst [vmem:[%s7328_s17 + $0x1a0] sm:$0xff] %v854_v24  ;;  %v862_v28 = vld [vmem:[%s7320_s22 + $0x340] sm:$0xff]  ;;  %v864_v29 = vld [vmem:[%s7320_s22 + $0x348] sm:$0xff] }
  0x52   : > { %857 = vst [vmem:[%s7328_s17 + $0x1a8] sm:$0xff] %v856_v25  ;;  %859 = vst [vmem:[%s7328_s17 + $0x1b0] sm:$0xff] %v858_v26  ;;  %v866_v30 = vld [vmem:[%s7320_s22 + $0x350] sm:$0xff]  ;;  %v868_v31 = vld [vmem:[%s7320_s22 + $0x358] sm:$0xff] }
  0x53   : > { %861 = vst [vmem:[%s7328_s17 + $0x1b8] sm:$0xff] %v860_v27  ;;  %863 = vst [vmem:[%s7328_s17 + $0x1c0] sm:$0xff] %v862_v28  ;;  %v870_v32 = vld [vmem:[%s7320_s22 + $0x360] sm:$0xff]  ;;  %v872_v33 = vld [vmem:[%s7320_s22 + $0x368] sm:$0xff] }
  0x54   : > { %865 = vst [vmem:[%s7328_s17 + $0x1c8] sm:$0xff] %v864_v29  ;;  %867 = vst [vmem:[%s7328_s17 + $0x1d0] sm:$0xff] %v866_v30  ;;  %v874_v34 = vld [vmem:[%s7320_s22 + $0x370] sm:$0xff]  ;;  %v876_v35 = vld [vmem:[%s7320_s22 + $0x378] sm:$0xff] }
  0x55   : > { %869 = vst [vmem:[%s7328_s17 + $0x1d8] sm:$0xff] %v868_v31  ;;  %871 = vst [vmem:[%s7328_s17 + $0x1e0] sm:$0xff] %v870_v32  ;;  %v878_v36 = vld [vmem:[%s7320_s22 + $0x400] sm:$0xff]  ;;  %v880_v37 = vld [vmem:[%s7320_s22 + $0x408] sm:$0xff] }
  0x56   : > { %873 = vst [vmem:[%s7328_s17 + $0x1e8] sm:$0xff] %v872_v33  ;;  %875 = vst [vmem:[%s7328_s17 + $0x1f0] sm:$0xff] %v874_v34  ;;  %v882_v38 = vld [vmem:[%s7320_s22 + $0x410] sm:$0xff]  ;;  %v884_v39 = vld [vmem:[%s7320_s22 + $0x418] sm:$0xff] }
  0x57   : > { %877 = vst [vmem:[%s7328_s17 + $0x1f8] sm:$0xff] %v876_v35  ;;  %879 = vst [vmem:[%s7328_s17 + $0x200] sm:$0xff] %v878_v36  ;;  %v886_v40 = vld [vmem:[%s7320_s22 + $0x420] sm:$0xff]  ;;  %v888_v41 = vld [vmem:[%s7320_s22 + $0x428] sm:$0xff] }
  0x58   : > { %881 = vst [vmem:[%s7328_s17 + $0x208] sm:$0xff] %v880_v37  ;;  %883 = vst [vmem:[%s7328_s17 + $0x210] sm:$0xff] %v882_v38  ;;  %v890_v42 = vld [vmem:[%s7320_s22 + $0x430] sm:$0xff]  ;;  %v892_v43 = vld [vmem:[%s7320_s22 + $0x438] sm:$0xff] }
  0x59   : > { %885 = vst [vmem:[%s7328_s17 + $0x218] sm:$0xff] %v884_v39  ;;  %887 = vst [vmem:[%s7328_s17 + $0x220] sm:$0xff] %v886_v40  ;;  %v894_v44 = vld [vmem:[%s7320_s22 + $0x440] sm:$0xff]  ;;  %v896_v45 = vld [vmem:[%s7320_s22 + $0x448] sm:$0xff] }
  0x5a   : > { %889 = vst [vmem:[%s7328_s17 + $0x228] sm:$0xff] %v888_v41  ;;  %891 = vst [vmem:[%s7328_s17 + $0x230] sm:$0xff] %v890_v42  ;;  %v898_v46 = vld [vmem:[%s7320_s22 + $0x450] sm:$0xff]  ;;  %v900_v47 = vld [vmem:[%s7320_s22 + $0x458] sm:$0xff] }
  0x5b   : > { %893 = vst [vmem:[%s7328_s17 + $0x238] sm:$0xff] %v892_v43  ;;  %895 = vst [vmem:[%s7328_s17 + $0x240] sm:$0xff] %v894_v44  ;;  %v902_v48 = vld [vmem:[%s7320_s22 + $0x460] sm:$0xff]  ;;  %v904_v49 = vld [vmem:[%s7320_s22 + $0x468] sm:$0xff] }
  0x5c   : > { %897 = vst [vmem:[%s7328_s17 + $0x248] sm:$0xff] %v896_v45  ;;  %899 = vst [vmem:[%s7328_s17 + $0x250] sm:$0xff] %v898_v46  ;;  %v906_v50 = vld [vmem:[%s7320_s22 + $0x470] sm:$0xff]  ;;  %v908_v51 = vld [vmem:[%s7320_s22 + $0x478] sm:$0xff] }
  0x5d   : > { %901 = vst [vmem:[%s7328_s17 + $0x258] sm:$0xff] %v900_v47  ;;  %903 = vst [vmem:[%s7328_s17 + $0x260] sm:$0xff] %v902_v48  ;;  %v910_v52 = vld [vmem:[%s7320_s22 + $0x500] sm:$0xff]  ;;  %v912_v53 = vld [vmem:[%s7320_s22 + $0x508] sm:$0xff] }
  0x5e   : > { %905 = vst [vmem:[%s7328_s17 + $0x268] sm:$0xff] %v904_v49  ;;  %907 = vst [vmem:[%s7328_s17 + $0x270] sm:$0xff] %v906_v50  ;;  %v914_v54 = vld [vmem:[%s7320_s22 + $0x510] sm:$0xff]  ;;  %v916_v55 = vld [vmem:[%s7320_s22 + $0x518] sm:$0xff] }
  0x5f   : > { %909 = vst [vmem:[%s7328_s17 + $0x278] sm:$0xff] %v908_v51  ;;  %911 = vst [vmem:[%s7328_s17 + $0x280] sm:$0xff] %v910_v52  ;;  %v918_v56 = vld [vmem:[%s7320_s22 + $0x520] sm:$0xff]  ;;  %v920_v57 = vld [vmem:[%s7320_s22 + $0x528] sm:$0xff] }
  0x60   : > { %913 = vst [vmem:[%s7328_s17 + $0x288] sm:$0xff] %v912_v53  ;;  %915 = vst [vmem:[%s7328_s17 + $0x290] sm:$0xff] %v914_v54  ;;  %v922_v58 = vld [vmem:[%s7320_s22 + $0x530] sm:$0xff]  ;;  %v924_v59 = vld [vmem:[%s7320_s22 + $0x538] sm:$0xff] }
  0x61   : > { %917 = vst [vmem:[%s7328_s17 + $0x298] sm:$0xff] %v916_v55  ;;  %919 = vst [vmem:[%s7328_s17 + $0x2a0] sm:$0xff] %v918_v56  ;;  %v926_v60 = vld [vmem:[%s7320_s22 + $0x540] sm:$0xff]  ;;  %v928_v61 = vld [vmem:[%s7320_s22 + $0x548] sm:$0xff] }
  0x62   : > { %921 = vst [vmem:[%s7328_s17 + $0x2a8] sm:$0xff] %v920_v57  ;;  %923 = vst [vmem:[%s7328_s17 + $0x2b0] sm:$0xff] %v922_v58  ;;  %v930_v62 = vld [vmem:[%s7320_s22 + $0x550] sm:$0xff]  ;;  %v932_v63 = vld [vmem:[%s7320_s22 + $0x558] sm:$0xff] }
  0x63   : > { %925 = vst [vmem:[%s7328_s17 + $0x2b8] sm:$0xff] %v924_v59  ;;  %927 = vst [vmem:[%s7328_s17 + $0x2c0] sm:$0xff] %v926_v60  ;;  %v934_v0 = vld [vmem:[%s7320_s22 + $0x560] sm:$0xff]  ;;  %v936_v1 = vld [vmem:[%s7320_s22 + $0x568] sm:$0xff] }
  0x64   : > { %929 = vst [vmem:[%s7328_s17 + $0x2c8] sm:$0xff] %v928_v61  ;;  %931 = vst [vmem:[%s7328_s17 + $0x2d0] sm:$0xff] %v930_v62  ;;  %v938_v2 = vld [vmem:[%s7320_s22 + $0x570] sm:$0xff]  ;;  %v940_v3 = vld [vmem:[%s7320_s22 + $0x578] sm:$0xff] }
  0x65   : > { %933 = vst [vmem:[%s7328_s17 + $0x2d8] sm:$0xff] %v932_v63  ;;  %935 = vst [vmem:[%s7328_s17 + $0x2e0] sm:$0xff] %v934_v0  ;;  %v942_v4 = vld [vmem:[%s7320_s22 + $0x600] sm:$0xff]  ;;  %v944_v5 = vld [vmem:[%s7320_s22 + $0x608] sm:$0xff] }
  0x66   : > { %937 = vst [vmem:[%s7328_s17 + $0x2e8] sm:$0xff] %v936_v1  ;;  %939 = vst [vmem:[%s7328_s17 + $0x2f0] sm:$0xff] %v938_v2  ;;  %v946_v6 = vld [vmem:[%s7320_s22 + $0x610] sm:$0xff]  ;;  %v948_v7 = vld [vmem:[%s7320_s22 + $0x618] sm:$0xff] }
  0x67   : > { %941 = vst [vmem:[%s7328_s17 + $0x2f8] sm:$0xff] %v940_v3  ;;  %943 = vst [vmem:[%s7328_s17 + $0x300] sm:$0xff] %v942_v4  ;;  %v950_v8 = vld [vmem:[%s7320_s22 + $0x620] sm:$0xff]  ;;  %v952_v9 = vld [vmem:[%s7320_s22 + $0x628] sm:$0xff] }
  0x68   : > { %945 = vst [vmem:[%s7328_s17 + $0x308] sm:$0xff] %v944_v5  ;;  %947 = vst [vmem:[%s7328_s17 + $0x310] sm:$0xff] %v946_v6  ;;  %v954_v10 = vld [vmem:[%s7320_s22 + $0x630] sm:$0xff]  ;;  %v956_v11 = vld [vmem:[%s7320_s22 + $0x638] sm:$0xff] }
  0x69   : > { %949 = vst [vmem:[%s7328_s17 + $0x318] sm:$0xff] %v948_v7  ;;  %951 = vst [vmem:[%s7328_s17 + $0x320] sm:$0xff] %v950_v8  ;;  %v958_v12 = vld [vmem:[%s7320_s22 + $0x640] sm:$0xff]  ;;  %v960_v13 = vld [vmem:[%s7320_s22 + $0x648] sm:$0xff] }
  0x6a   : > { %953 = vst [vmem:[%s7328_s17 + $0x328] sm:$0xff] %v952_v9  ;;  %955 = vst [vmem:[%s7328_s17 + $0x330] sm:$0xff] %v954_v10  ;;  %v962_v14 = vld [vmem:[%s7320_s22 + $0x650] sm:$0xff]  ;;  %v964_v15 = vld [vmem:[%s7320_s22 + $0x658] sm:$0xff] }
  0x6b   : > { %957 = vst [vmem:[%s7328_s17 + $0x338] sm:$0xff] %v956_v11  ;;  %959 = vst [vmem:[%s7328_s17 + $0x340] sm:$0xff] %v958_v12  ;;  %v966_v16 = vld [vmem:[%s7320_s22 + $0x660] sm:$0xff]  ;;  %v968_v17 = vld [vmem:[%s7320_s22 + $0x668] sm:$0xff] }
  0x6c   : > { %961 = vst [vmem:[%s7328_s17 + $0x348] sm:$0xff] %v960_v13  ;;  %963 = vst [vmem:[%s7328_s17 + $0x350] sm:$0xff] %v962_v14  ;;  %v970_v18 = vld [vmem:[%s7320_s22 + $0x670] sm:$0xff]  ;;  %v972_v19 = vld [vmem:[%s7320_s22 + $0x678] sm:$0xff] }
  0x6d   : > { %965 = vst [vmem:[%s7328_s17 + $0x358] sm:$0xff] %v964_v15  ;;  %967 = vst [vmem:[%s7328_s17 + $0x360] sm:$0xff] %v966_v16  ;;  %v974_v20 = vld [vmem:[%s7320_s22 + $0x700] sm:$0xff]  ;;  %v976_v21 = vld [vmem:[%s7320_s22 + $0x708] sm:$0xff] }
  0x6e   : > { %969 = vst [vmem:[%s7328_s17 + $0x368] sm:$0xff] %v968_v17  ;;  %971 = vst [vmem:[%s7328_s17 + $0x370] sm:$0xff] %v970_v18  ;;  %v978_v22 = vld [vmem:[%s7320_s22 + $0x710] sm:$0xff]  ;;  %v980_v23 = vld [vmem:[%s7320_s22 + $0x718] sm:$0xff] }
  0x6f   : > { %973 = vst [vmem:[%s7328_s17 + $0x378] sm:$0xff] %v972_v19  ;;  %975 = vst [vmem:[%s7328_s17 + $0x380] sm:$0xff] %v974_v20  ;;  %v982_v24 = vld [vmem:[%s7320_s22 + $0x720] sm:$0xff]  ;;  %v984_v25 = vld [vmem:[%s7320_s22 + $0x728] sm:$0xff] }
  0x70   : > { %977 = vst [vmem:[%s7328_s17 + $0x388] sm:$0xff] %v976_v21  ;;  %979 = vst [vmem:[%s7328_s17 + $0x390] sm:$0xff] %v978_v22  ;;  %v986_v26 = vld [vmem:[%s7320_s22 + $0x730] sm:$0xff]  ;;  %v988_v27 = vld [vmem:[%s7320_s22 + $0x738] sm:$0xff] }
  0x71   : > { %981 = vst [vmem:[%s7328_s17 + $0x398] sm:$0xff] %v980_v23  ;;  %983 = vst [vmem:[%s7328_s17 + $0x3a0] sm:$0xff] %v982_v24  ;;  %v990_v28 = vld [vmem:[%s7320_s22 + $0x740] sm:$0xff]  ;;  %v992_v29 = vld [vmem:[%s7320_s22 + $0x748] sm:$0xff] }
  0x72   : > { %985 = vst [vmem:[%s7328_s17 + $0x3a8] sm:$0xff] %v984_v25  ;;  %987 = vst [vmem:[%s7328_s17 + $0x3b0] sm:$0xff] %v986_v26  ;;  %v994_v30 = vld [vmem:[%s7320_s22 + $0x750] sm:$0xff]  ;;  %v996_v31 = vld [vmem:[%s7320_s22 + $0x758] sm:$0xff] }
  0x73   : > { %989 = vst [vmem:[%s7328_s17 + $0x3b8] sm:$0xff] %v988_v27  ;;  %991 = vst [vmem:[%s7328_s17 + $0x3c0] sm:$0xff] %v990_v28  ;;  %v998_v32 = vld [vmem:[%s7320_s22 + $0x760] sm:$0xff]  ;;  %v1000_v33 = vld [vmem:[%s7320_s22 + $0x768] sm:$0xff] }
  0x74   : > { %993 = vst [vmem:[%s7328_s17 + $0x3c8] sm:$0xff] %v992_v29  ;;  %995 = vst [vmem:[%s7328_s17 + $0x3d0] sm:$0xff] %v994_v30  ;;  %v1002_v34 = vld [vmem:[%s7320_s22 + $0x770] sm:$0xff]  ;;  %v1004_v35 = vld [vmem:[%s7320_s22 + $0x778] sm:$0xff] }
  0x75   : > { %997 = vst [vmem:[%s7328_s17 + $0x3d8] sm:$0xff] %v996_v31  ;;  %999 = vst [vmem:[%s7328_s17 + $0x3e0] sm:$0xff] %v998_v32  ;;  %v1006_v36 = vld [vmem:[%s7320_s22 + $0x800] sm:$0xff]  ;;  %v1008_v37 = vld [vmem:[%s7320_s22 + $0x808] sm:$0xff] }
  0x76   : > { %1001 = vst [vmem:[%s7328_s17 + $0x3e8] sm:$0xff] %v1000_v33  ;;  %1003 = vst [vmem:[%s7328_s17 + $0x3f0] sm:$0xff] %v1002_v34  ;;  %v1010_v38 = vld [vmem:[%s7320_s22 + $0x810] sm:$0xff]  ;;  %v1012_v39 = vld [vmem:[%s7320_s22 + $0x818] sm:$0xff] }
  0x77   : > { %1005 = vst [vmem:[%s7328_s17 + $0x3f8] sm:$0xff] %v1004_v35  ;;  %1007 = vst [vmem:[%s7328_s17 + $0x400] sm:$0xff] %v1006_v36  ;;  %v1014_v40 = vld [vmem:[%s7320_s22 + $0x820] sm:$0xff]  ;;  %v1016_v41 = vld [vmem:[%s7320_s22 + $0x828] sm:$0xff] }
  0x78   : > { %1009 = vst [vmem:[%s7328_s17 + $0x408] sm:$0xff] %v1008_v37  ;;  %1011 = vst [vmem:[%s7328_s17 + $0x410] sm:$0xff] %v1010_v38  ;;  %v1018_v42 = vld [vmem:[%s7320_s22 + $0x830] sm:$0xff]  ;;  %v1020_v43 = vld [vmem:[%s7320_s22 + $0x838] sm:$0xff] }
  0x79   : > { %1013 = vst [vmem:[%s7328_s17 + $0x418] sm:$0xff] %v1012_v39  ;;  %1015 = vst [vmem:[%s7328_s17 + $0x420] sm:$0xff] %v1014_v40  ;;  %v1022_v44 = vld [vmem:[%s7320_s22 + $0x840] sm:$0xff]  ;;  %v1024_v45 = vld [vmem:[%s7320_s22 + $0x848] sm:$0xff] }
  0x7a   : > { %1017 = vst [vmem:[%s7328_s17 + $0x428] sm:$0xff] %v1016_v41  ;;  %1019 = vst [vmem:[%s7328_s17 + $0x430] sm:$0xff] %v1018_v42  ;;  %v1026_v46 = vld [vmem:[%s7320_s22 + $0x850] sm:$0xff]  ;;  %v1028_v47 = vld [vmem:[%s7320_s22 + $0x858] sm:$0xff] }
  0x7b   : > { %1021 = vst [vmem:[%s7328_s17 + $0x438] sm:$0xff] %v1020_v43  ;;  %1023 = vst [vmem:[%s7328_s17 + $0x440] sm:$0xff] %v1022_v44  ;;  %v1030_v48 = vld [vmem:[%s7320_s22 + $0x860] sm:$0xff]  ;;  %v1032_v49 = vld [vmem:[%s7320_s22 + $0x868] sm:$0xff] }
  0x7c   : > { %1025 = vst [vmem:[%s7328_s17 + $0x448] sm:$0xff] %v1024_v45  ;;  %1027 = vst [vmem:[%s7328_s17 + $0x450] sm:$0xff] %v1026_v46  ;;  %v1034_v50 = vld [vmem:[%s7320_s22 + $0x870] sm:$0xff]  ;;  %v1036_v51 = vld [vmem:[%s7320_s22 + $0x878] sm:$0xff] }
  0x7d   : > { %1029 = vst [vmem:[%s7328_s17 + $0x458] sm:$0xff] %v1028_v47  ;;  %1031 = vst [vmem:[%s7328_s17 + $0x460] sm:$0xff] %v1030_v48 }
  0x7e   : > { %1033 = vst [vmem:[%s7328_s17 + $0x468] sm:$0xff] %v1032_v49  ;;  %1035 = vst [vmem:[%s7328_s17 + $0x470] sm:$0xff] %v1034_v50 }
  0x7f   : > { %1037 = vst [vmem:[%s7328_s17 + $0x478] sm:$0xff] %v1036_v51 }
  0x80 PF: > { %p5264_p10 = scmp.ge.s32.totalorder %s7099_s9, 1  ;;  %p1042_p11 = scmp.lt.s32.totalorder %s7099_s9, 5 }
  0x82   : > { %p1043_p12 = pnand %p5264_p10, %p1042_p11 }
  0x84   : > { %1046 = sbr.rel (%p1043_p12) target bundleno = 1698 (0x6a2), region = 116 }
  0x8b   : > { %s1049_s23 = sand.u32 1, %s7075_s26   ;;  %s1056_s14 = sand.u32 1, %s7067_s24  }
  0x8c   : > { %s6936_s12 = smul.u32 288, %s1049_s23  ;;  %p1092_p13 = scmp.lt.s32.totalorder %s7087_s29, 1 }
  0x8d   : > { %s6937_s16 = smul.u32 1152, %s1056_s14  ;;  %p5266_p0 = scmp.ne.s32.totalorder %s7083_s28, 0 }
  0x8e   : > { %s8682_s29 = smov (!%p1092_p13, %s7087_s29), 1  ;;  %s7623_s19 = scalar_lea.vmem [#allocation3], %s6936_s12  ;;  %vm1101_vm0 = vcmask (!%p5266_p0), 523264   ;;  %v7105_v52 = vmov (!%p5266_p0), 0.0  }
  0x8f   : > { %s6938_s13 = smul.u32 168, %s8682_s29  ;;  %s7625_s21 = scalar_lea.vmem [#allocation4], %s6937_s16  ;;  %1102 = vst.msk [vmem:[#allocation2] sm:$0xff] (!%p5266_p0), %vm1101_vm0, %v7105_v52  ;;  %1103 = vst.msk [vmem:[#allocation2 + $0x8] sm:$0xff] (!%p5266_p0), %vm1101_vm0, %v7105_v52 }
  0x90   : > { %1100 = sbr.rel (%p5266_p0) target bundleno = 153 (0x99), region = 128  ;;  %1104 = vst.msk [vmem:[#allocation2 + $0x10] sm:$0xff] (!%p5266_p0), %vm1101_vm0, %v7105_v52  ;;  %1105 = vst.msk [vmem:[#allocation2 + $0x18] sm:$0xff] (!%p5266_p0), %vm1101_vm0, %v7105_v52 }
  0x91   : > { %s7621_s18 = scalar_lea.vmem %s8652_s7, %s6938_s13  ;;  %1106 = vst.msk [vmem:[#allocation2 + $0x20] sm:$0xff] (!%p5266_p0), %vm1101_vm0, %v7105_v52  ;;  %1107 = vst.msk [vmem:[#allocation2 + $0x28] sm:$0xff] (!%p5266_p0), %vm1101_vm0, %v7105_v52 }
  0x92   : > { %1108 = vst.msk [vmem:[#allocation2 + $0x30] sm:$0xff] (!%p5266_p0), %vm1101_vm0, %v7105_v52  ;;  %1109 = vst.msk [vmem:[#allocation2 + $0x38] sm:$0xff] (!%p5266_p0), %vm1101_vm0, %v7105_v52 }
  0x93   : > { %1110 = vst.msk [vmem:[#allocation2 + $0x40] sm:$0xff] (!%p5266_p0), %vm1101_vm0, %v7105_v52  ;;  %1111 = vst.msk [vmem:[#allocation2 + $0x48] sm:$0xff] (!%p5266_p0), %vm1101_vm0, %v7105_v52 }
  0x94   : > { %1112 = vst.msk [vmem:[#allocation2 + $0x50] sm:$0xff] (!%p5266_p0), %vm1101_vm0, %v7105_v52  ;;  %1113 = vst.msk [vmem:[#allocation2 + $0x58] sm:$0xff] (!%p5266_p0), %vm1101_vm0, %v7105_v52 }
  0x95   : > { %1114 = vst.msk [vmem:[#allocation2 + $0x60] sm:$0xff] (!%p5266_p0), %vm1101_vm0, %v7105_v52  ;;  %1115 = vst.msk [vmem:[#allocation2 + $0x68] sm:$0xff] (!%p5266_p0), %vm1101_vm0, %v7105_v52 }
  0x96   : > { %1116 = vst.msk [vmem:[#allocation2 + $0x70] sm:$0xff] (!%p5266_p0), %vm1101_vm0, %v7105_v52  ;;  %1117 = vst.msk [vmem:[#allocation2 + $0x78] sm:$0xff] (!%p5266_p0), %vm1101_vm0, %v7105_v52 }
  0x97   : > { %1118 = vst.msk [vmem:[#allocation2 + $0x80] sm:$0xff] %vm1101_vm0, %v7105_v52  ;;  %1119 = vst.msk [vmem:[#allocation2 + $0x88] sm:$0xff] %vm1101_vm0, %v7105_v52 }
  0x98   : > { %1120 = vst.msk [vmem:[#allocation2 + $0x90] sm:$0xff] %vm1101_vm0, %v7105_v52  ;;  %1121 = vst.msk [vmem:[#allocation2 + $0x98] sm:$0xff] %vm1101_vm0, %v7105_v52 }
  0x99 PF: > { %v1162_v53 = vld [vmem:[%s7625_s21] sm:$0xff]  ;;  %v1163_v54 = vld [vmem:[%s7625_s21 + $0x8] sm:$0xff]  ;;  %v1164_v58 = vld [vmem:[%s7625_s21 + $0x10] sm:$0xff]  ;;  %vm1363_vm1 = vcmask 523264   ;;  %p5515_p1 = scmp.ne.s32.totalorder %s7083_s28, 1 }
  0x9a   : > { %v5267_v55 = vld [vmem:[%s7625_s21 + $0x80] sm:$0xff]  ;;  %v6597_v56 = vpack.c.bf16 %v1163_v54, %v1162_v53  ;;  %v5268_v57 = vld [vmem:[%s7625_s21 + $0x88] sm:$0xff]  ;;  %v1165_v59 = vld [vmem:[%s7625_s21 + $0x18] sm:$0xff]  ;;  %s8506_s10 = smov (!%p5515_p1), 0  }
  0x9b   : > { %v6629_v60 = vpack.c.bf16 %v5268_v57, %v5267_v55  ;;  %v6601_v61 = vpack.c.bf16 %v1165_v59, %v1164_v58  ;;  %v5269_v62 = vld [vmem:[%s7625_s21 + $0x90] sm:$0xff]  ;;  %v5270_v63 = vld [vmem:[%s7625_s21 + $0x98] sm:$0xff]  ;;  %v1166_v0 = vld [vmem:[%s7625_s21 + $0x20] sm:$0xff] }
  0x9c   : > { %6598 = vmatprep.subr.bf16.mxu0 %v6597_v56  ;;  %v6633_v1 = vpack.c.bf16 %v5270_v63, %v5269_v62  ;;  %v1167_v2 = vld [vmem:[%s7625_s21 + $0x28] sm:$0xff]  ;;  %v5271_v3 = vld [vmem:[%s7625_s21 + $0xa0] sm:$0xff]  ;;  %v1168_v7 = vld [vmem:[%s7625_s21 + $0x30] sm:$0xff] }
  0x9d   : > { %v5272_v4 = vld [vmem:[%s7625_s21 + $0xa8] sm:$0xff]  ;;  %6630 = vmatprep.subr.bf16.mxu1 %v6629_v60  ;;  %6600 = vmatpush3.bf16.msra.mxu0 %v6597_v56  ;;  %v6605_v5 = vpack.c.bf16 %v1167_v2, %v1166_v0  ;;  %v1169_v8 = vld [vmem:[%s7625_s21 + $0x38] sm:$0xff]  ;;  %v5273_v9 = vld [vmem:[%s7625_s21 + $0xb0] sm:$0xff] }
  0x9e   : > { %6632 = vmatpush3.bf16.msra.mxu1 %v6629_v60  ;;  %6602 = vmatprep.subr.bf16.mxu0 %v6601_v61  ;;  %v6637_v6 = vpack.c.bf16 %v5272_v4, %v5271_v3  ;;  %v5274_v10 = vld [vmem:[%s7625_s21 + $0xb8] sm:$0xff]  ;;  %v6609_v11 = vpack.c.bf16 %v1169_v8, %v1168_v7  ;;  %v1170_v13 = vld [vmem:[%s7625_s21 + $0x40] sm:$0xff]  ;;  %v1171_v14 = vld [vmem:[%s7625_s21 + $0x48] sm:$0xff] }
  0x9f   : > { %6634 = vmatprep.subr.bf16.mxu1 %v6633_v1  ;;  %v6641_v12 = vpack.c.bf16 %v5274_v10, %v5273_v9  ;;  %v1122_v15 = vld [vmem:[%s7623_s19] sm:$0xff]  ;;  %v5276_v17 = vld [vmem:[%s7625_s21 + $0xc8] sm:$0xff]  ;;  %v6613_v19 = vpack.c.bf16 %v1171_v14, %v1170_v13  ;;  %v1172_v21 = vld [vmem:[%s7625_s21 + $0x50] sm:$0xff] }
  0xa0   : > { %v5275_v16 = vld [vmem:[%s7625_s21 + $0xc0] sm:$0xff]  ;;  %5975 = vmatprep.mubr.f32.mxu0 %v1122_v15  ;;  %v1173_v22 = vld [vmem:[%s7625_s21 + $0x58] sm:$0xff]  ;;  %v5277_v23 = vld [vmem:[%s7625_s21 + $0xd0] sm:$0xff] }
  0xa1   : > { %6604 = vmatpush3.bf16.msra.mxu0 %v6601_v61  ;;  %v1384_v18 = vld [vmem:[%s7623_s19 + $0x1] sm:$0xff]  ;;  %v6645_v20 = vpack.c.bf16 %v5276_v17, %v5275_v16  ;;  %v5278_v24 = vld [vmem:[%s7625_s21 + $0xd8] sm:$0xff]  ;;  %v6617_v25 = vpack.c.bf16 %v1173_v22, %v1172_v21  ;;  %v1176_v33 = vld [vmem:[%s7625_s21 + $0x70] sm:$0xff] }
  0xa2   : > { %6636 = vmatpush3.bf16.msra.mxu1 %v6633_v1  ;;  %6606 = vmatprep.subr.bf16.mxu0 %v6605_v5  ;;  %v6649_v26 = vpack.c.bf16 %v5278_v24, %v5277_v23  ;;  %v1174_v27 = vld [vmem:[%s7625_s21 + $0x60] sm:$0xff]  ;;  %v1175_v28 = vld [vmem:[%s7625_s21 + $0x68] sm:$0xff]  ;;  %v1177_v34 = vld [vmem:[%s7625_s21 + $0x78] sm:$0xff] }
  0xa3   : > { %6638 = vmatprep.subr.bf16.mxu1 %v6637_v6  ;;  %6037 = vmatprep.mubr.f32.mxu1 %v1384_v18  ;;  %v5279_v29 = vld [vmem:[%s7625_s21 + $0xe0] sm:$0xff]  ;;  %v5280_v30 = vld [vmem:[%s7625_s21 + $0xe8] sm:$0xff]  ;;  %v6621_v31 = vpack.c.bf16 %v1175_v28, %v1174_v27  ;;  %v5281_v35 = vld [vmem:[%s7625_s21 + $0xf0] sm:$0xff]  ;;  %v6625_v37 = vpack.c.bf16 %v1177_v34, %v1176_v33 }
  0xa4   : > { %v6653_v32 = vpack.c.bf16 %v5280_v30, %v5279_v29  ;;  %v5282_v36 = vld [vmem:[%s7625_s21 + $0xf8] sm:$0xff]  ;;  %v5283_v39 = vld [vmem:[%s7625_s21 + $0x100] sm:$0xff]  ;;  %v5284_v40 = vld [vmem:[%s7625_s21 + $0x108] sm:$0xff] }
  0xa5   : > { %6608 = vmatpush3.bf16.msra.mxu0 %v6605_v5  ;;  %v6657_v38 = vpack.c.bf16 %v5282_v36, %v5281_v35  ;;  %v5319_v41 = vld [vmem:[%s7625_s21 + $0x180] sm:$0xff]  ;;  %v5320_v42 = vld [vmem:[%s7625_s21 + $0x188] sm:$0xff]  ;;  %v6661_v43 = vpack.c.bf16 %v5284_v40, %v5283_v39  ;;  %v5285_v45 = vld [vmem:[%s7625_s21 + $0x110] sm:$0xff] }
  0xa6   : > { %6640 = vmatpush3.bf16.msra.mxu1 %v6637_v6  ;;  %6610 = vmatprep.subr.bf16.mxu0 %v6609_v11  ;;  %v6693_v44 = vpack.c.bf16 %v5320_v42, %v5319_v41  ;;  %v5286_v46 = vld [vmem:[%s7625_s21 + $0x118] sm:$0xff]  ;;  %v1123_v47 = vld [vmem:[%s7623_s19 + $0x8] sm:$0xff]  ;;  %v5321_v48 = vld [vmem:[%s7625_s21 + $0x190] sm:$0xff] }
  0xa7   : > { %6642 = vmatprep.subr.bf16.mxu1 %v6641_v12  ;;  %v5322_v49 = vld [vmem:[%s7625_s21 + $0x198] sm:$0xff]  ;;  %v1385_v50 = vld [vmem:[%s7623_s19 + $0x9] sm:$0xff]  ;;  %v6665_v52 = vpack.c.bf16 %v5286_v46, %v5285_v45  ;;  %v5287_v55 = vld [vmem:[%s7625_s21 + $0x120] sm:$0xff] }
  0xa8   : > { %v7693_v51 = vld [vmem:[%s7623_s19 + $0x18] sm:$0xff]  ;;  %v6697_v54 = vpack.c.bf16 %v5322_v49, %v5321_v48  ;;  %v5288_v56 = vld [vmem:[%s7625_s21 + $0x128] sm:$0xff]  ;;  %v7701_v57 = vld [vmem:[%s7623_s19 + $0x20] sm:$0xff] }
  0xa9   : > { %6612 = vmatpush3.bf16.msra.mxu0 %v6609_v11  ;;  %v7696_v53 = vld [vmem:[%s7623_s19 + $0x19] sm:$0xff]  ;;  %v5324_v59 = vld [vmem:[%s7625_s21 + $0x1a8] sm:$0xff]  ;;  %v7711_v61 = vld [vmem:[%s7623_s19 + $0x30] sm:$0xff]  ;;  %v6669_v62 = vpack.c.bf16 %v5288_v56, %v5287_v55 }
  0xaa   : > { %6644 = vmatpush3.bf16.msra.mxu1 %v6641_v12  ;;  %6614 = vmatprep.subr.bf16.mxu0 %v6613_v19  ;;  %v5323_v58 = vld [vmem:[%s7625_s21 + $0x1a0] sm:$0xff]  ;;  %v7715_v63 = vld [vmem:[%s7623_s19 + $0x31] sm:$0xff]  ;;  %v7730_v7 = vld [vmem:[%s7623_s19 + $0x48] sm:$0xff] }
  0xab   : > { %6646 = vmatprep.subr.bf16.mxu1 %v6645_v20  ;;  %v7707_v60 = vld [vmem:[%s7623_s19 + $0x21] sm:$0xff]  ;;  %v6701_v0 = vpack.c.bf16 %v5324_v59, %v5323_v58  ;;  %v5289_v1 = vld [vmem:[%s7625_s21 + $0x130] sm:$0xff]  ;;  %v5290_v2 = vld [vmem:[%s7625_s21 + $0x138] sm:$0xff] }
  0xac   : > { %v7721_v3 = vld [vmem:[%s7623_s19 + $0x38] sm:$0xff]  ;;  %v5325_v4 = vld [vmem:[%s7625_s21 + $0x1b0] sm:$0xff]  ;;  %v6673_v9 = vpack.c.bf16 %v5290_v2, %v5289_v1  ;;  %v5291_v11 = vld [vmem:[%s7625_s21 + $0x140] sm:$0xff] }
  0xad   : > { %6616 = vmatpush3.bf16.msra.mxu0 %v6613_v19  ;;  %v5326_v5 = vld [vmem:[%s7625_s21 + $0x1b8] sm:$0xff]  ;;  %v7734_v8 = vld [vmem:[%s7623_s19 + $0x49] sm:$0xff]  ;;  %v5327_v14 = vld [vmem:[%s7625_s21 + $0x1c0] sm:$0xff] }
  0xae   : > { %6648 = vmatpush3.bf16.msra.mxu1 %v6645_v20  ;;  %6618 = vmatprep.subr.bf16.mxu0 %v6617_v25  ;;  %v7727_v6 = vld [vmem:[%s7623_s19 + $0x39] sm:$0xff]  ;;  %v6705_v10 = vpack.c.bf16 %v5326_v5, %v5325_v4  ;;  %v5292_v12 = vld [vmem:[%s7625_s21 + $0x148] sm:$0xff]  ;;  %v7742_v13 = vld [vmem:[%s7623_s19 + $0x50] sm:$0xff] }
  0xaf   : > { %6650 = vmatprep.subr.bf16.mxu1 %v6649_v26  ;;  %v5328_v15 = vld [vmem:[%s7625_s21 + $0x1c8] sm:$0xff]  ;;  %v7748_v16 = vld [vmem:[%s7623_s19 + $0x51] sm:$0xff]  ;;  %v7751_v17 = vld [vmem:[%s7623_s19 + $0x60] sm:$0xff]  ;;  %v6677_v19 = vpack.c.bf16 %v5292_v12, %v5291_v11 }
  0xb0   : > { %v7754_v18 = vld [vmem:[%s7623_s19 + $0x61] sm:$0xff]  ;;  %v6709_v20 = vpack.c.bf16 %v5328_v15, %v5327_v14  ;;  %v5293_v21 = vld [vmem:[%s7625_s21 + $0x150] sm:$0xff]  ;;  %v5294_v22 = vld [vmem:[%s7625_s21 + $0x158] sm:$0xff] }
  0xb1   : > { %6620 = vmatpush3.bf16.msra.mxu0 %v6617_v25  ;;  %v7762_v23 = vld [vmem:[%s7623_s19 + $0x68] sm:$0xff]  ;;  %v5329_v24 = vld [vmem:[%s7625_s21 + $0x1d0] sm:$0xff]  ;;  %v5330_v25 = vld [vmem:[%s7625_s21 + $0x1d8] sm:$0xff]  ;;  %v6681_v29 = vpack.c.bf16 %v5294_v22, %v5293_v21 }
  0xb2   : > { %6652 = vmatpush3.bf16.msra.mxu1 %v6649_v26  ;;  %6622 = vmatprep.subr.bf16.mxu0 %v6621_v31  ;;  %v7768_v26 = vld [vmem:[%s7623_s19 + $0x69] sm:$0xff]  ;;  %v7771_v27 = vld [vmem:[%s7623_s19 + $0x78] sm:$0xff]  ;;  %v6713_v30 = vpack.c.bf16 %v5330_v25, %v5329_v24  ;;  %v7782_v33 = vld [vmem:[%s7623_s19 + $0x80] sm:$0xff] }
  0xb3   : > { %6654 = vmatprep.subr.bf16.mxu1 %v6653_v32  ;;  %v7774_v28 = vld [vmem:[%s7623_s19 + $0x79] sm:$0xff]  ;;  %v5332_v35 = vld [vmem:[%s7625_s21 + $0x1e8] sm:$0xff]  ;;  %v5297_v41 = vld [vmem:[%s7625_s21 + $0x170] sm:$0xff] }
  0xb4   : > { %v5331_v34 = vld [vmem:[%s7625_s21 + $0x1e0] sm:$0xff]  ;;  %v5298_v42 = vld [vmem:[%s7625_s21 + $0x178] sm:$0xff]  ;;  %v7814_v48 = vld [vmem:[%s7623_s19 + $0xa9] sm:$0xff] }
  0xb5   : > { %6624 = vmatpush3.bf16.msra.mxu0 %v6621_v31  ;;  %v5295_v31 = vld [vmem:[%s7625_s21 + $0x160] sm:$0xff]  ;;  %v6717_v40 = vpack.c.bf16 %v5332_v35, %v5331_v34  ;;  %v5334_v45 = vld [vmem:[%s7625_s21 + $0x1f8] sm:$0xff]  ;;  %v6689_v49 = vpack.c.bf16 %v5298_v42, %v5297_v41  ;;  %v7822_v55 = vld [vmem:[%s7623_s19 + $0xb0] sm:$0xff] }
  0xb6   : > { %6656 = vmatpush3.bf16.msra.mxu1 %v6653_v32  ;;  %6626 = vmatprep.subr.bf16.mxu0 %v6625_v37  ;;  %v5296_v32 = vld [vmem:[%s7625_s21 + $0x168] sm:$0xff]  ;;  %v7808_v46 = vld [vmem:[%s7623_s19 + $0x99] sm:$0xff]  ;;  %v7828_v59 = vld [vmem:[%s7623_s19 + $0xb1] sm:$0xff] }
  0xb7   : > { %6658 = vmatprep.subr.bf16.mxu1 %v6657_v38  ;;  %v7788_v36 = vld [vmem:[%s7623_s19 + $0x81] sm:$0xff]  ;;  %v6685_v39 = vpack.c.bf16 %v5296_v32, %v5295_v31  ;;  %v7844_v5 = vld [vmem:[%s7623_s19 + $0xc9] sm:$0xff]  ;;  %v5394_v22 = vld [vmem:[%s7625_s21 + $0x298] sm:$0xff] }
  0xb8   : > { %v5391_v56 = vld [vmem:[%s7625_s21 + $0x280] sm:$0xff]  ;;  %v5392_v58 = vld [vmem:[%s7625_s21 + $0x288] sm:$0xff]  ;;  %v5357_v15 = vld [vmem:[%s7625_s21 + $0x210] sm:$0xff] }
  0xb9   : > { %6628 = vmatpush3.bf16.msra.mxu0 %v6625_v37  ;;  %v7791_v37 = vld [vmem:[%s7623_s19 + $0x90] sm:$0xff]  ;;  %v6757_v2 = vpack.c.bf16 %v5392_v58, %v5391_v56  ;;  %v7840_v4 = vld [vmem:[%s7623_s19 + $0xc8] sm:$0xff]  ;;  %v7856_v11 = vld [vmem:[%s7623_s19 + $0xe0] sm:$0xff] }
  0xba   : > { %6660 = vmatpush3.bf16.msra.mxu1 %v6657_v38  ;;  %6662 = vmatprep.subr.bf16.mxu0 %v6661_v43  ;;  %v7794_v38 = vld [vmem:[%s7623_s19 + $0x91] sm:$0xff]  ;;  %v7860_v12 = vld [vmem:[%s7623_s19 + $0xe1] sm:$0xff] }
  0xbb   : > { %6694 = vmatprep.subr.bf16.mxu1 %v6693_v44  ;;  %v1646_v14 = vld [vmem:[%s7623_s19 + $0x2] sm:$0xff]  ;;  %v5393_v21 = vld [vmem:[%s7625_s21 + $0x290] sm:$0xff]  ;;  %v7872_v24 = vld [vmem:[%s7623_s19 + $0x1a] sm:$0xff] }
  0xbc   : > { %5976 = vmatmul.mubr.f32.vlgmr.msra.gmra.mrb[0].mxu0 %v1123_v47  ;;  %v7811_v47 = vld [vmem:[%s7623_s19 + $0xa8] sm:$0xff]  ;;  %v5395_v34 = vld [vmem:[%s7625_s21 + $0x2a0] sm:$0xff]  ;;  %v5362_v41 = vld [vmem:[%s7625_s21 + $0x238] sm:$0xff] }
  0xbd   : > { %6038 = vmatmul.mubr.f32.vlgmr.msra.gmra.mrb[0].mxu1 %v1385_v50  ;;  %6664 = vmatpush3.bf16.msra.mxu0 %v6661_v43  ;;  %v7802_v43 = vld [vmem:[%s7623_s19 + $0x98] sm:$0xff]  ;;  %v5360_v31 = vld [vmem:[%s7625_s21 + $0x228] sm:$0xff] }
  0xbe   : > { %6696 = vmatpush3.bf16.msra.mxu1 %v6693_v44  ;;  %5978 = vmatprep.mubr.f32.mxu0 %v7693_v51  ;;  %v5333_v44 = vld [vmem:[%s7625_s21 + $0x1f0] sm:$0xff]  ;;  %v7878_v32 = vld [vmem:[%s7623_s19 + $0x22] sm:$0xff]  ;;  %v7892_v42 = vld [vmem:[%s7623_s19 + $0x3a] sm:$0xff] }
  0xbf   : > { %6040 = vmatprep.mubr.f32.mxu1 %v7696_v53  ;;  %6666 = vmatprep.subr.bf16.mxu0 %v6665_v52  ;;  %v6721_v50 = vpack.c.bf16 %v5334_v45, %v5333_v44  ;;  %v5396_v35 = vld [vmem:[%s7625_s21 + $0x2a8] sm:$0xff]  ;;  %v5397_v44 = vld [vmem:[%s7625_s21 + $0x2b0] sm:$0xff]  ;;  %v5398_v45 = vld [vmem:[%s7625_s21 + $0x2b8] sm:$0xff] }
  0xc0   : > { %5979 = vmatmul.mubr.f32.gmra.mrb[2].mxu0 %v7701_v57  ;;  %6698 = vmatprep.subr.bf16.mxu1 %v6697_v54  ;;  %v5364_v56 = vld [vmem:[%s7625_s21 + $0x248] sm:$0xff]  ;;  %v7907_v58 = vld [vmem:[%s7623_s19 + $0x52] sm:$0xff] }
  0xc1   : > { %6041 = vmatmul.mubr.f32.gmra.mrb[2].mxu1 %v7707_v60  ;;  %6668 = vmatpush3.bf16.msra.mxu0 %v6665_v52  ;;  %v5355_v52 = vld [vmem:[%s7625_s21 + $0x200] sm:$0xff] }
  0xc2   : > { %6700 = vmatpush3.bf16.msra.mxu1 %v6697_v54  ;;  %5981 = vmatprep.mubr.f32.mxu0 %v7711_v61  ;;  %v5356_v54 = vld [vmem:[%s7625_s21 + $0x208] sm:$0xff] }
  0xc3   : > { %6043 = vmatprep.mubr.f32.mxu1 %v7715_v63  ;;  %6670 = vmatprep.subr.bf16.mxu0 %v6669_v62  ;;  %v6725_v1 = vpack.c.bf16 %v5356_v54, %v5355_v52  ;;  %v6769_v52 = vpack.c.bf16 %v5398_v45, %v5397_v44  ;;  %v5363_v54 = vld [vmem:[%s7625_s21 + $0x240] sm:$0xff]  ;;  %v7941_v44 = vld [vmem:[%s7623_s19 + $0x92] sm:$0xff] }
  0xc4   : > { %5982 = vmatmul.mubr.f32.gmra.mrb[4].mxu0 %v7721_v3  ;;  %6702 = vmatprep.subr.bf16.mxu1 %v6701_v0 }
  0xc5   : > { %6044 = vmatmul.mubr.f32.gmra.mrb[4].mxu1 %v7727_v6  ;;  %5984 = vmatprep.mubr.f32.mxu0 %v7730_v7 }
  0xc6   : > { %6046 = vmatprep.mubr.f32.mxu1 %v7734_v8  ;;  %6672 = vmatpush3.bf16.msra.mxu0 %v6669_v62  ;;  %v7831_v62 = vld [vmem:[%s7623_s19 + $0xc0] sm:$0xff] }
  0xc7   : > { %6704 = vmatpush3.bf16.msra.mxu1 %v6701_v0  ;;  %6674 = vmatprep.subr.bf16.mxu0 %v6673_v9  ;;  %v7834_v0 = vld [vmem:[%s7623_s19 + $0xc1] sm:$0xff] }
  0xc8   : > { %5985 = vmatmul.mubr.f32.gmra.mrb[6].mxu0 %v7742_v13  ;;  %6706 = vmatprep.subr.bf16.mxu1 %v6705_v10 }
  0xc9   : > { %6047 = vmatmul.mubr.f32.gmra.mrb[6].mxu1 %v7748_v16  ;;  %5987 = vmatprep.mubr.f32.mxu0 %v7751_v17 }
  0xca   : > { %6049 = vmatprep.mubr.f32.mxu1 %v7754_v18  ;;  %6676 = vmatpush3.bf16.msra.mxu0 %v6673_v9  ;;  %v7847_v9 = vld [vmem:[%s7623_s19 + $0xd8] sm:$0xff] }
  0xcb   : > { %6708 = vmatpush3.bf16.msra.mxu1 %v6705_v10  ;;  %6678 = vmatprep.subr.bf16.mxu0 %v6677_v19  ;;  %v7850_v10 = vld [vmem:[%s7623_s19 + $0xd9] sm:$0xff] }
  0xcc   : > { %5988 = vmatmul.mubr.f32.gmra.mrb[8].mxu0 %v7762_v23  ;;  %6710 = vmatprep.subr.bf16.mxu1 %v6709_v20 }
  0xcd   : > { %6050 = vmatmul.mubr.f32.gmra.mrb[8].mxu1 %v7768_v26  ;;  %5990 = vmatprep.mubr.f32.mxu0 %v7771_v27 }
  0xce   : > { %6052 = vmatprep.mubr.f32.mxu1 %v7774_v28  ;;  %6680 = vmatpush3.bf16.msra.mxu0 %v6677_v19  ;;  %v5358_v19 = vld [vmem:[%s7625_s21 + $0x218] sm:$0xff] }
  0xcf   : > { %6712 = vmatpush3.bf16.msra.mxu1 %v6709_v20  ;;  %6682 = vmatprep.subr.bf16.mxu0 %v6681_v29  ;;  %v1647_v20 = vld [vmem:[%s7623_s19 + $0xa] sm:$0xff]  ;;  %v6729_v25 = vpack.c.bf16 %v5358_v19, %v5357_v15  ;;  %v6741_v15 = vpack.c.bf16 %v5364_v56, %v5363_v54  ;;  %v5370_v54 = vld [vmem:[%s7625_s21 + $0x278] sm:$0xff] }
  0xd0   : > { %5991 = vmatmul.mubr.f32.gmra.mrb[10].mxu0 %v7782_v33  ;;  %6714 = vmatprep.subr.bf16.mxu1 %v6713_v30  ;;  %v7949_v56 = vld [vmem:[%s7623_s19 + $0x9a] sm:$0xff] }
  0xd1   : > { %6053 = vmatmul.mubr.f32.gmra.mrb[10].mxu1 %v7788_v36  ;;  %5993 = vmatprep.mubr.f32.mxu0 %v7791_v37 }
  0xd2   : > { %6055 = vmatprep.mubr.f32.mxu1 %v7794_v38  ;;  %6684 = vmatpush3.bf16.msra.mxu0 %v6681_v29  ;;  %v6761_v29 = vpack.c.bf16 %v5394_v22, %v5393_v21  ;;  %v5366_v21 = vld [vmem:[%s7625_s21 + $0x258] sm:$0xff]  ;;  %v7921_v22 = vld [vmem:[%s7623_s19 + $0x6a] sm:$0xff] }
  0xd3   : > { %6716 = vmatpush3.bf16.msra.mxu1 %v6713_v30  ;;  %6686 = vmatprep.subr.bf16.mxu0 %v6685_v39  ;;  %v5359_v30 = vld [vmem:[%s7625_s21 + $0x220] sm:$0xff] }
  0xd4   : > { %5994 = vmatmul.mubr.f32.gmra.mrb[12].mxu0 %v7802_v43  ;;  %6718 = vmatprep.subr.bf16.mxu1 %v6717_v40 }
  0xd5   : > { %6056 = vmatmul.mubr.f32.gmra.mrb[12].mxu1 %v7808_v46  ;;  %5996 = vmatprep.mubr.f32.mxu0 %v7811_v47 }
  0xd6   : > { %6058 = vmatprep.mubr.f32.mxu1 %v7814_v48  ;;  %6688 = vmatpush3.bf16.msra.mxu0 %v6685_v39  ;;  %v6733_v39 = vpack.c.bf16 %v5360_v31, %v5359_v30  ;;  %v7927_v30 = vld [vmem:[%s7623_s19 + $0x7a] sm:$0xff] }
  0xd7   : > { %6720 = vmatpush3.bf16.msra.mxu1 %v6717_v40  ;;  %6690 = vmatprep.subr.bf16.mxu0 %v6689_v49  ;;  %v5361_v40 = vld [vmem:[%s7625_s21 + $0x230] sm:$0xff] }
  0xd8   : > { %5997 = vmatmul.mubr.f32.gmra.mrb[14].mxu0 %v7822_v55  ;;  %6722 = vmatprep.subr.bf16.mxu1 %v6721_v50 }
  0xd9   : > { %6059 = vmatmul.mubr.f32.gmra.mrb[14].mxu1 %v7828_v59  ;;  %5999 = vmatprep.mubr.f32.mxu0 %v7831_v62 }
  0xda   : > { %6061 = vmatprep.mubr.f32.mxu1 %v7834_v0  ;;  %6692 = vmatpush3.bf16.msra.mxu0 %v6689_v49  ;;  %v7898_v49 = vld [vmem:[%s7623_s19 + $0x4a] sm:$0xff] }
  0xdb   : > { %6724 = vmatpush3.bf16.msra.mxu1 %v6721_v50  ;;  %6726 = vmatprep.subr.bf16.mxu0 %v6725_v1  ;;  %v6737_v50 = vpack.c.bf16 %v5362_v41, %v5361_v40  ;;  %v5403_v40 = vld [vmem:[%s7625_s21 + $0x2e0] sm:$0xff]  ;;  %v5404_v41 = vld [vmem:[%s7625_s21 + $0x2e8] sm:$0xff] }
  0xdc   : > { %6000 = vmatmul.mubr.f32.gmra.mrb[16].mxu0 %v7840_v4  ;;  %6758 = vmatprep.subr.bf16.mxu1 %v6757_v2 }
  0xdd   : > { %6062 = vmatmul.mubr.f32.gmra.mrb[16].mxu1 %v7844_v5  ;;  %6002 = vmatprep.mubr.f32.mxu0 %v7847_v9 }
  0xde   : > { %6064 = vmatprep.mubr.f32.mxu1 %v7850_v10 }
  0xe0   : > { %6003 = vmatmul.mubr.f32.gmra.mrb[18].mxu0 %v7856_v11 }
  0xe1   : > { %6065 = vmatmul.mubr.f32.gmra.mrb[18].mxu1 %v7860_v12  ;;  %6099 = vmatprep.mubr.f32.mxu0 %v1646_v14  ;;  %v7913_v14 = vld [vmem:[%s7623_s19 + $0x62] sm:$0xff] }
  0xe2   : > { %6161 = vmatprep.mubr.f32.mxu1 %v7693_v51  ;;  %v7885_v51 = vld [vmem:[%s7623_s19 + $0x32] sm:$0xff] }
  0xe4   : > { %6100 = vmatmul.mubr.f32.vlgmr.msra.gmra.mrb[20].mxu0 %v1647_v20  ;;  %v5365_v20 = vld [vmem:[%s7625_s21 + $0x250] sm:$0xff] }
  0xe5   : > { %6162 = vmatmul.mubr.f32.vlgmr.msra.gmra.mrb[20].mxu1 %v7701_v57  ;;  %6728 = vmatpush3.bf16.msra.mxu0 %v6725_v1  ;;  %v6765_v57 = vpack.c.bf16 %v5396_v35, %v5395_v34  ;;  %v5399_v1 = vld [vmem:[%s7625_s21 + $0x2c0] sm:$0xff]  ;;  %v6745_v31 = vpack.c.bf16 %v5366_v21, %v5365_v20 }
  0xe6   : > { %6760 = vmatpush3.bf16.msra.mxu1 %v6757_v2  ;;  %6102 = vmatprep.mubr.f32.mxu0 %v7872_v24  ;;  %v5400_v2 = vld [vmem:[%s7625_s21 + $0x2c8] sm:$0xff]  ;;  %v5367_v35 = vld [vmem:[%s7625_s21 + $0x260] sm:$0xff] }
  0xe7   : > { %6164 = vmatprep.mubr.f32.mxu1 %v7711_v61  ;;  %6730 = vmatprep.subr.bf16.mxu0 %v6729_v25  ;;  %v6773_v19 = vpack.c.bf16 %v5400_v2, %v5399_v1  ;;  %v5405_v1 = vld [vmem:[%s7625_s21 + $0x2f0] sm:$0xff]  ;;  %v5406_v2 = vld [vmem:[%s7625_s21 + $0x2f8] sm:$0xff]  ;;  %v5427_v21 = vld [vmem:[%s7625_s21 + $0x300] sm:$0xff] }
  0xe8   : > { %6103 = vmatmul.mubr.f32.gmra.mrb[22].mxu0 %v7878_v32  ;;  %6762 = vmatprep.subr.bf16.mxu1 %v6761_v29  ;;  %v6785_v20 = vpack.c.bf16 %v5406_v2, %v5405_v1  ;;  %v5429_v1 = vld [vmem:[%s7625_s21 + $0x310] sm:$0xff]  ;;  %v5430_v2 = vld [vmem:[%s7625_s21 + $0x318] sm:$0xff] }
  0xe9   : > { %6165 = vmatmul.mubr.f32.gmra.mrb[22].mxu1 %v7721_v3  ;;  %6732 = vmatpush3.bf16.msra.mxu0 %v6729_v25  ;;  %v5401_v25 = vld [vmem:[%s7625_s21 + $0x2d0] sm:$0xff] }
  0xea   : > { %6764 = vmatpush3.bf16.msra.mxu1 %v6761_v29  ;;  %6105 = vmatprep.mubr.f32.mxu0 %v7885_v51  ;;  %v5402_v29 = vld [vmem:[%s7625_s21 + $0x2d8] sm:$0xff] }
  0xeb   : > { %6167 = vmatprep.mubr.f32.mxu1 %v7730_v7  ;;  %6734 = vmatprep.subr.bf16.mxu0 %v6733_v39  ;;  %v6777_v34 = vpack.c.bf16 %v5402_v29, %v5401_v25  ;;  %v5428_v25 = vld [vmem:[%s7625_s21 + $0x308] sm:$0xff]  ;;  %v7963_v29 = vld [vmem:[%s7623_s19 + $0xb2] sm:$0xff] }
  0xec   : > { %6106 = vmatmul.mubr.f32.gmra.mrb[24].mxu0 %v7892_v42  ;;  %6766 = vmatprep.subr.bf16.mxu1 %v6765_v57 }
  0xed   : > { %6168 = vmatmul.mubr.f32.gmra.mrb[24].mxu1 %v7742_v13  ;;  %6108 = vmatprep.mubr.f32.mxu0 %v7898_v49 }
  0xee   : > { %6170 = vmatprep.mubr.f32.mxu1 %v7751_v17  ;;  %6736 = vmatpush3.bf16.msra.mxu0 %v6733_v39  ;;  %v5368_v39 = vld [vmem:[%s7625_s21 + $0x268] sm:$0xff] }
  0xef   : > { %6768 = vmatpush3.bf16.msra.mxu1 %v6765_v57  ;;  %6738 = vmatprep.subr.bf16.mxu0 %v6737_v50  ;;  %v7935_v57 = vld [vmem:[%s7623_s19 + $0x82] sm:$0xff]  ;;  %v6749_v45 = vpack.c.bf16 %v5368_v39, %v5367_v35  ;;  %v6789_v39 = vpack.c.bf16 %v5428_v25, %v5427_v21  ;;  %v6793_v21 = vpack.c.bf16 %v5430_v2, %v5429_v1 }
  0xf0   : > { %6109 = vmatmul.mubr.f32.gmra.mrb[26].mxu0 %v7907_v58  ;;  %6770 = vmatprep.subr.bf16.mxu1 %v6769_v52  ;;  %v5464_v35 = vld [vmem:[%s7625_s21 + $0x388] sm:$0xff] }
  0xf1   : > { %6171 = vmatmul.mubr.f32.gmra.mrb[26].mxu1 %v7762_v23  ;;  %6111 = vmatprep.mubr.f32.mxu0 %v7913_v14  ;;  %v5436_v2 = vld [vmem:[%s7625_s21 + $0x348] sm:$0xff] }
  0xf2   : > { %6173 = vmatprep.mubr.f32.mxu1 %v7771_v27  ;;  %6740 = vmatpush3.bf16.msra.mxu0 %v6737_v50  ;;  %v6781_v50 = vpack.c.bf16 %v5404_v41, %v5403_v40  ;;  %v7975_v41 = vld [vmem:[%s7623_s19 + $0xca] sm:$0xff] }
  0xf3   : > { %6772 = vmatpush3.bf16.msra.mxu1 %v6769_v52  ;;  %6742 = vmatprep.subr.bf16.mxu0 %v6741_v15  ;;  %v5369_v52 = vld [vmem:[%s7625_s21 + $0x270] sm:$0xff] }
  0xf4   : > { %6112 = vmatmul.mubr.f32.gmra.mrb[28].mxu0 %v7921_v22  ;;  %6774 = vmatprep.subr.bf16.mxu1 %v6773_v19 }
  0xf5   : > { %6174 = vmatmul.mubr.f32.gmra.mrb[28].mxu1 %v7782_v33  ;;  %6114 = vmatprep.mubr.f32.mxu0 %v7927_v30 }
  0xf6   : > { %6176 = vmatprep.mubr.f32.mxu1 %v7791_v37  ;;  %6744 = vmatpush3.bf16.msra.mxu0 %v6741_v15  ;;  %v7955_v15 = vld [vmem:[%s7623_s19 + $0xaa] sm:$0xff] }
  0xf7   : > { %6776 = vmatpush3.bf16.msra.mxu1 %v6773_v19  ;;  %6746 = vmatprep.subr.bf16.mxu0 %v6745_v31  ;;  %v6753_v19 = vpack.c.bf16 %v5370_v54, %v5369_v52  ;;  %v7988_v52 = vld [vmem:[%s7623_s19 + $0xe2] sm:$0xff]  ;;  %v7992_v54 = vld [vmem:[%s7623_s19 + $0xf8] sm:$0xff] }
  0xf8   : > { %6115 = vmatmul.mubr.f32.gmra.mrb[30].mxu0 %v7935_v57  ;;  %6778 = vmatprep.subr.bf16.mxu1 %v6777_v34  ;;  %8662 = vst [vmem:[#allocation8_spill] sm:$0xff] %v7992_v54 }
  0xf9   : > { %6177 = vmatmul.mubr.f32.gmra.mrb[30].mxu1 %v7802_v43  ;;  %6117 = vmatprep.mubr.f32.mxu0 %v7941_v44 }
  0xfa   : > { %6179 = vmatprep.mubr.f32.mxu1 %v7811_v47  ;;  %6748 = vmatpush3.bf16.msra.mxu0 %v6745_v31  ;;  %v5463_v31 = vld [vmem:[%s7625_s21 + $0x380] sm:$0xff] }
  0xfb   : > { %6780 = vmatpush3.bf16.msra.mxu1 %v6777_v34  ;;  %6750 = vmatprep.subr.bf16.mxu0 %v6749_v45  ;;  %v7969_v34 = vld [vmem:[%s7623_s19 + $0xc2] sm:$0xff]  ;;  %v6821_v40 = vpack.c.bf16 %v5464_v35, %v5463_v31 }
  0xfc   : > { %6118 = vmatmul.mubr.f32.gmra.mrb[32].mxu0 %v7949_v56  ;;  %6782 = vmatprep.subr.bf16.mxu1 %v6781_v50  ;;  %v5431_v31 = vld [vmem:[%s7625_s21 + $0x320] sm:$0xff]  ;;  %v5432_v35 = vld [vmem:[%s7625_s21 + $0x328] sm:$0xff] }
  0xfd   : > { %6180 = vmatmul.mubr.f32.gmra.mrb[32].mxu1 %v7822_v55  ;;  %6120 = vmatprep.mubr.f32.mxu0 %v7955_v15 }
  0xfe   : > { %6182 = vmatprep.mubr.f32.mxu1 %v7831_v62  ;;  %6752 = vmatpush3.bf16.msra.mxu0 %v6749_v45  ;;  %v7979_v45 = vld [vmem:[%s7623_s19 + $0xda] sm:$0xff] }
  0xff   : > { %6784 = vmatpush3.bf16.msra.mxu1 %v6781_v50  ;;  %6754 = vmatprep.subr.bf16.mxu0 %v6753_v19  ;;  %v7982_v50 = vld [vmem:[%s7623_s19 + $0xf0] sm:$0xff] }
 0x100   : > { %6121 = vmatmul.mubr.f32.gmra.mrb[34].mxu0 %v7963_v29  ;;  %6786 = vmatprep.subr.bf16.mxu1 %v6785_v20  ;;  %8661 = vst [vmem:[#allocation7_spill] sm:$0xff] %v7982_v50 }
 0x101   : > { %6183 = vmatmul.mubr.f32.gmra.mrb[34].mxu1 %v7840_v4  ;;  %6123 = vmatprep.mubr.f32.mxu0 %v7969_v34 }
 0x102   : > { %6185 = vmatprep.mubr.f32.mxu1 %v7847_v9  ;;  %6756 = vmatpush3.bf16.msra.mxu0 %v6753_v19  ;;  %v5465_v19 = vld [vmem:[%s7625_s21 + $0x390] sm:$0xff] }
 0x103   : > { %6788 = vmatpush3.bf16.msra.mxu1 %v6785_v20  ;;  %6790 = vmatprep.subr.bf16.mxu0 %v6789_v39  ;;  %v5466_v20 = vld [vmem:[%s7625_s21 + $0x398] sm:$0xff] }
 0x104   : > { %6124 = vmatmul.mubr.f32.gmra.mrb[36].mxu0 %v7975_v41  ;;  %6822 = vmatprep.subr.bf16.mxu1 %v6821_v40  ;;  %v6825_v25 = vpack.c.bf16 %v5466_v20, %v5465_v19  ;;  %v5471_v19 = vld [vmem:[%s7625_s21 + $0x3c0] sm:$0xff]  ;;  %v5472_v20 = vld [vmem:[%s7625_s21 + $0x3c8] sm:$0xff] }
 0x105   : > { %6186 = vmatmul.mubr.f32.gmra.mrb[36].mxu1 %v7856_v11  ;;  %6126 = vmatprep.mubr.f32.mxu0 %v7979_v45 }
 0x106   : > { %6188 = vmatprep.mubr.f32.mxu1 %v7982_v50  ;;  %v5468_v50 = vld [vmem:[%s7625_s21 + $0x3a8] sm:$0xff] }
 0x108   : > { %6127 = vmatmul.mubr.f32.gmra.mrb[38].mxu0 %v7988_v52 }
 0x109   : > { %6189 = vmatmul.mubr.f32.gmra.mrb[38].mxu1 %v7992_v54  ;;  %6223 = vmatprep.mubr.f32.mxu0 %v7696_v53  ;;  %v5467_v54 = vld [vmem:[%s7625_s21 + $0x3a0] sm:$0xff]  ;;  %v6797_v53 = vpack.c.bf16 %v5432_v35, %v5431_v31  ;;  %v5437_v31 = vld [vmem:[%s7625_s21 + $0x350] sm:$0xff]  ;;  %v5438_v35 = vld [vmem:[%s7625_s21 + $0x358] sm:$0xff] }
 0x10a   : > { %6285 = vmatprep.mubr.f32.mxu1 %v7872_v24  ;;  %v5433_v24 = vld [vmem:[%s7625_s21 + $0x330] sm:$0xff] }
 0x10c   : > { %6224 = vmatmul.mubr.f32.vlgmr.msra.gmra.mrb[40].mxu0 %v7707_v60  ;;  %v6829_v60 = vpack.c.bf16 %v5468_v50, %v5467_v54  ;;  %v5435_v54 = vld [vmem:[%s7625_s21 + $0x340] sm:$0xff] }
 0x10d   : > { %6286 = vmatmul.mubr.f32.vlgmr.msra.gmra.mrb[40].mxu1 %v7878_v32  ;;  %6792 = vmatpush3.bf16.msra.mxu0 %v6789_v39  ;;  %v5434_v32 = vld [vmem:[%s7625_s21 + $0x338] sm:$0xff]  ;;  %v5469_v39 = vld [vmem:[%s7625_s21 + $0x3b0] sm:$0xff] }
 0x10e   : > { %6824 = vmatpush3.bf16.msra.mxu1 %v6821_v40  ;;  %6226 = vmatprep.mubr.f32.mxu0 %v7715_v63  ;;  %v5470_v40 = vld [vmem:[%s7625_s21 + $0x3b8] sm:$0xff]  ;;  %v6801_v1 = vpack.c.bf16 %v5434_v32, %v5433_v24  ;;  %v5473_v24 = vld [vmem:[%s7625_s21 + $0x3d0] sm:$0xff] }
 0x10f   : > { %6288 = vmatprep.mubr.f32.mxu1 %v7885_v51  ;;  %6794 = vmatprep.subr.bf16.mxu0 %v6793_v21  ;;  %v6833_v50 = vpack.c.bf16 %v5470_v40, %v5469_v39  ;;  %v5474_v32 = vld [vmem:[%s7625_s21 + $0x3d8] sm:$0xff]  ;;  %v5439_v39 = vld [vmem:[%s7625_s21 + $0x360] sm:$0xff]  ;;  %v5440_v40 = vld [vmem:[%s7625_s21 + $0x368] sm:$0xff] }
 0x110   : > { %6227 = vmatmul.mubr.f32.gmra.mrb[42].mxu0 %v7727_v6  ;;  %6826 = vmatprep.subr.bf16.mxu1 %v6825_v25 }
 0x111   : > { %6289 = vmatmul.mubr.f32.gmra.mrb[42].mxu1 %v7892_v42  ;;  %6796 = vmatpush3.bf16.msra.mxu0 %v6793_v21  ;;  %v6805_v21 = vpack.c.bf16 %v5436_v2, %v5435_v54  ;;  %v5475_v54 = vld [vmem:[%s7625_s21 + $0x3e0] sm:$0xff]  ;;  %v5476_v2 = vld [vmem:[%s7625_s21 + $0x3e8] sm:$0xff] }
 0x112   : > { %6828 = vmatpush3.bf16.msra.mxu1 %v6825_v25  ;;  %6229 = vmatprep.mubr.f32.mxu0 %v7734_v8  ;;  %v6837_v25 = vpack.c.bf16 %v5472_v20, %v5471_v19  ;;  %v5441_v19 = vld [vmem:[%s7625_s21 + $0x370] sm:$0xff]  ;;  %v5442_v20 = vld [vmem:[%s7625_s21 + $0x378] sm:$0xff] }
 0x113   : > { %6291 = vmatprep.mubr.f32.mxu1 %v7898_v49  ;;  %6798 = vmatprep.subr.bf16.mxu0 %v6797_v53 }
 0x114   : > { %6230 = vmatmul.mubr.f32.gmra.mrb[44].mxu0 %v7748_v16  ;;  %6830 = vmatprep.subr.bf16.mxu1 %v6829_v60 }
 0x115   : > { %6292 = vmatmul.mubr.f32.gmra.mrb[44].mxu1 %v7907_v58  ;;  %6232 = vmatprep.mubr.f32.mxu0 %v7754_v18 }
 0x116   : > { %6294 = vmatprep.mubr.f32.mxu1 %v7913_v14  ;;  %6800 = vmatpush3.bf16.msra.mxu0 %v6797_v53  ;;  %v6809_v53 = vpack.c.bf16 %v5438_v35, %v5437_v31  ;;  %v5477_v31 = vld [vmem:[%s7625_s21 + $0x3f0] sm:$0xff]  ;;  %v5478_v35 = vld [vmem:[%s7625_s21 + $0x3f8] sm:$0xff] }
 0x117   : > { %6832 = vmatpush3.bf16.msra.mxu1 %v6829_v60  ;;  %6802 = vmatprep.subr.bf16.mxu0 %v6801_v1  ;;  %v6841_v60 = vpack.c.bf16 %v5474_v32, %v5473_v24  ;;  %v5499_v24 = vld [vmem:[%s7625_s21 + $0x400] sm:$0xff]  ;;  %v5500_v32 = vld [vmem:[%s7625_s21 + $0x408] sm:$0xff] }
 0x118   : > { %6233 = vmatmul.mubr.f32.gmra.mrb[46].mxu0 %v7768_v26  ;;  %6834 = vmatprep.subr.bf16.mxu1 %v6833_v50 }
 0x119   : > { %6295 = vmatmul.mubr.f32.gmra.mrb[46].mxu1 %v7921_v22  ;;  %6235 = vmatprep.mubr.f32.mxu0 %v7774_v28 }
 0x11a   : > { %6297 = vmatprep.mubr.f32.mxu1 %v7927_v30  ;;  %6804 = vmatpush3.bf16.msra.mxu0 %v6801_v1  ;;  %v6813_v1 = vpack.c.bf16 %v5440_v40, %v5439_v39  ;;  %v8064_v39 = vld [vmem:[%s7623_s19 + $0xf2] sm:$0xff] }
 0x11b   : > { %6836 = vmatpush3.bf16.msra.mxu1 %v6833_v50  ;;  %6806 = vmatprep.subr.bf16.mxu0 %v6805_v21  ;;  %v6845_v50 = vpack.c.bf16 %v5476_v2, %v5475_v54  ;;  %v8070_v40 = vld [vmem:[%s7623_s19 + $0xf9] sm:$0xff]  ;;  %v5501_v2 = vld [vmem:[%s7625_s21 + $0x410] sm:$0xff] }
 0x11c   : > { %6236 = vmatmul.mubr.f32.gmra.mrb[48].mxu0 %v7788_v36  ;;  %6838 = vmatprep.subr.bf16.mxu1 %v6837_v25  ;;  %v8074_v54 = vld [vmem:[%s7623_s19 + $0xfa] sm:$0xff] }
 0x11d   : > { %6298 = vmatmul.mubr.f32.gmra.mrb[48].mxu1 %v7935_v57  ;;  %6238 = vmatprep.mubr.f32.mxu0 %v7794_v38 }
 0x11e   : > { %6300 = vmatprep.mubr.f32.mxu1 %v7941_v44  ;;  %6808 = vmatpush3.bf16.msra.mxu0 %v6805_v21  ;;  %v6817_v21 = vpack.c.bf16 %v5442_v20, %v5441_v19  ;;  %v5503_v19 = vld [vmem:[%s7625_s21 + $0x420] sm:$0xff]  ;;  %v5504_v20 = vld [vmem:[%s7625_s21 + $0x428] sm:$0xff] }
 0x11f   : > { %6840 = vmatpush3.bf16.msra.mxu1 %v6837_v25  ;;  %6810 = vmatprep.subr.bf16.mxu0 %v6809_v53  ;;  %v6849_v25 = vpack.c.bf16 %v5478_v35, %v5477_v31  ;;  %v5506_v31 = vld [vmem:[%s7625_s21 + $0x438] sm:$0xff] }
 0x120   : > { %6239 = vmatmul.mubr.f32.gmra.mrb[50].mxu0 %v7808_v46  ;;  %6842 = vmatprep.subr.bf16.mxu1 %v6841_v60  ;;  %v1149_v35 = vld [vmem:[#allocation2 + $0x38] sm:$0xff] }
 0x121   : > { %6301 = vmatmul.mubr.f32.gmra.mrb[50].mxu1 %v7949_v56  ;;  %6241 = vmatprep.mubr.f32.mxu0 %v7814_v48 }
 0x122   : > { %6303 = vmatprep.mubr.f32.mxu1 %v7955_v15  ;;  %6812 = vmatpush3.bf16.msra.mxu0 %v6809_v53  ;;  %v6853_v53 = vpack.c.bf16 %v5500_v32, %v5499_v24  ;;  %v1148_v24 = vld [vmem:[#allocation2 + $0x30] sm:$0xff] }
 0x123   : > { %6844 = vmatpush3.bf16.msra.mxu1 %v6841_v60  ;;  %6814 = vmatprep.subr.bf16.mxu0 %v6813_v1  ;;  %v8061_v60 = vld [vmem:[%s7623_s19 + $0xf1] sm:$0xff] }
 0x124   : > { %6242 = vmatmul.mubr.f32.gmra.mrb[52].mxu0 %v7828_v59  ;;  %6846 = vmatprep.subr.bf16.mxu1 %v6845_v50 }
 0x125   : > { %6304 = vmatmul.mubr.f32.gmra.mrb[52].mxu1 %v7963_v29  ;;  %6244 = vmatprep.mubr.f32.mxu0 %v7834_v0 }
 0x126   : > { %6306 = vmatprep.mubr.f32.mxu1 %v7969_v34  ;;  %6816 = vmatpush3.bf16.msra.mxu0 %v6813_v1  ;;  %v5502_v1 = vld [vmem:[%s7625_s21 + $0x418] sm:$0xff] }
 0x127   : > { %6848 = vmatpush3.bf16.msra.mxu1 %v6845_v50  ;;  %6818 = vmatprep.subr.bf16.mxu0 %v6817_v21  ;;  %v6857_v50 = vpack.c.bf16 %v5502_v1, %v5501_v2 }
 0x128   : > { %6245 = vmatmul.mubr.f32.gmra.mrb[54].mxu0 %v7844_v5  ;;  %6850 = vmatprep.subr.bf16.mxu1 %v6849_v25 }
 0x129   : > { %6307 = vmatmul.mubr.f32.gmra.mrb[54].mxu1 %v7975_v41  ;;  %6247 = vmatprep.mubr.f32.mxu0 %v7850_v10 }
 0x12a   : > { %6309 = vmatprep.mubr.f32.mxu1 %v7979_v45  ;;  %6820 = vmatpush3.bf16.msra.mxu0 %v6817_v21 }
 0x12b   : > { %6852 = vmatpush3.bf16.msra.mxu1 %v6849_v25  ;;  %6854 = vmatprep.subr.bf16.mxu0 %v6853_v53 }
 0x12c   : > { %6248 = vmatmul.mubr.f32.gmra.mrb[56].mxu0 %v7860_v12  ;;  %6905 = vmatprep.subr.bf16.mxu1 %v6853_v53 }
 0x12d   : > { %6310 = vmatmul.mubr.f32.gmra.mrb[56].mxu1 %v7988_v52  ;;  %6250 = vmatprep.mubr.f32.mxu0 %v8061_v60 }
 0x12e   : > { %6312 = vmatprep.mubr.f32.mxu1 %v8064_v39 }
 0x130   : > { %6251 = vmatmul.mubr.f32.gmra.mrb[58].mxu0 %v8070_v40 }
 0x131   : > { %6313 = vmatmul.mubr.f32.gmra.mrb[58].mxu1 %v8074_v54  ;;  %6347 = vmatprep.mubr.f32.mxu0 %v7711_v61  ;;  %v6861_v61 = vpack.c.bf16 %v5504_v20, %v5503_v19 }
 0x132   : > { %6409 = vmatprep.mubr.f32.mxu1 %v7715_v63  ;;  %v5505_v63 = vld [vmem:[%s7625_s21 + $0x430] sm:$0xff] }
 0x134   : > { %6348 = vmatmul.mubr.f32.vlgmr.msra.gmra.mrb[60].mxu0 %v7721_v3  ;;  %v6865_v3 = vpack.c.bf16 %v5506_v31, %v5505_v63 }
 0x135   : > { %6410 = vmatmul.mubr.f32.vlgmr.msra.gmra.mrb[60].mxu1 %v7727_v6  ;;  %6856 = vmatpush3.bf16.msra.mxu0 %v6853_v53  ;;  %v5507_v6 = vld [vmem:[%s7625_s21 + $0x440] sm:$0xff] }
 0x136   : > { %6913 = vmatpush3.bf16.msra.mxu1 %v6853_v53  ;;  %6350 = vmatprep.mubr.f32.mxu0 %v7730_v7  ;;  %v5508_v7 = vld [vmem:[%s7625_s21 + $0x448] sm:$0xff] }
 0x137   : > { %6412 = vmatprep.mubr.f32.mxu1 %v7734_v8  ;;  %6858 = vmatprep.subr.bf16.mxu0 %v6857_v50  ;;  %v6869_v8 = vpack.c.bf16 %v5508_v7, %v5507_v6 }
 0x138   : > { %6351 = vmatmul.mubr.f32.gmra.mrb[62].mxu0 %v7742_v13  ;;  %6906 = vmatprep.subr.bf16.mxu1 %v6857_v50  ;;  %v5509_v13 = vld [vmem:[%s7625_s21 + $0x450] sm:$0xff] }
 0x139   : > { %6413 = vmatmul.mubr.f32.gmra.mrb[62].mxu1 %v7748_v16  ;;  %6860 = vmatpush3.bf16.msra.mxu0 %v6857_v50  ;;  %v5510_v16 = vld [vmem:[%s7625_s21 + $0x458] sm:$0xff] }
 0x13a   : > { %6914 = vmatpush3.bf16.msra.mxu1 %v6857_v50  ;;  %6353 = vmatprep.mubr.f32.mxu0 %v7751_v17  ;;  %v6873_v17 = vpack.c.bf16 %v5510_v16, %v5509_v13  ;;  %v1151_v50 = vld [vmem:[#allocation2 + $0x48] sm:$0xff] }
 0x13b   : > { %6415 = vmatprep.mubr.f32.mxu1 %v7754_v18  ;;  %6862 = vmatprep.subr.bf16.mxu0 %v6861_v61  ;;  %v5511_v18 = vld [vmem:[%s7625_s21 + $0x460] sm:$0xff] }
 0x13c   : > { %6354 = vmatmul.mubr.f32.gmra.mrb[64].mxu0 %v7762_v23  ;;  %6907 = vmatprep.subr.bf16.mxu1 %v6861_v61  ;;  %v5512_v23 = vld [vmem:[%s7625_s21 + $0x468] sm:$0xff] }
 0x13d   : > { %6416 = vmatmul.mubr.f32.gmra.mrb[64].mxu1 %v7768_v26  ;;  %6356 = vmatprep.mubr.f32.mxu0 %v7771_v27  ;;  %v6877_v26 = vpack.c.bf16 %v5512_v23, %v5511_v18  ;;  %v5513_v27 = vld [vmem:[%s7625_s21 + $0x470] sm:$0xff] }
 0x13e   : > { %6418 = vmatprep.mubr.f32.mxu1 %v7774_v28  ;;  %6864 = vmatpush3.bf16.msra.mxu0 %v6861_v61  ;;  %v5514_v28 = vld [vmem:[%s7625_s21 + $0x478] sm:$0xff] }
 0x13f   : > { %6915 = vmatpush3.bf16.msra.mxu1 %v6861_v61  ;;  %6866 = vmatprep.subr.bf16.mxu0 %v6865_v3  ;;  %v1150_v61 = vld [vmem:[#allocation2 + $0x40] sm:$0xff] }
 0x140   : > { %6357 = vmatmul.mubr.f32.gmra.mrb[66].mxu0 %v7782_v33  ;;  %6908 = vmatprep.subr.bf16.mxu1 %v6865_v3  ;;  %v6881_v33 = vpack.c.bf16 %v5514_v28, %v5513_v27 }
 0x141   : > { %6419 = vmatmul.mubr.f32.gmra.mrb[66].mxu1 %v7788_v36  ;;  %6359 = vmatprep.mubr.f32.mxu0 %v7791_v37  ;;  %v8663_v36 = vld [vmem:[#allocation7_spill] sm:$0xff]  ;;  %v5425_v37 = vld [vmem:[%s7623_s19 + $0x108] sm:$0xff] }
 0x142   : > { %6421 = vmatprep.mubr.f32.mxu1 %v7794_v38  ;;  %6868 = vmatpush3.bf16.msra.mxu0 %v6865_v3  ;;  %v5461_v38 = vld [vmem:[%s7623_s19 + $0x109] sm:$0xff] }
 0x143   : > { %6916 = vmatpush3.bf16.msra.mxu1 %v6865_v3  ;;  %6870 = vmatprep.subr.bf16.mxu0 %v6869_v8 }
 0x144   : > { %6360 = vmatmul.mubr.f32.gmra.mrb[68].mxu0 %v7802_v43  ;;  %6909 = vmatprep.subr.bf16.mxu1 %v6869_v8  ;;  %v8664_v43 = vld [vmem:[#allocation8_spill] sm:$0xff] }
 0x145   : > { %6422 = vmatmul.mubr.f32.gmra.mrb[68].mxu1 %v7808_v46  ;;  %6362 = vmatprep.mubr.f32.mxu0 %v7811_v47  ;;  %v5426_v46 = vld [vmem:[%s7623_s19 + $0x110] sm:$0xff] }
 0x146   : > { %6424 = vmatprep.mubr.f32.mxu1 %v7814_v48  ;;  %6872 = vmatpush3.bf16.msra.mxu0 %v6869_v8  ;;  %v5462_v47 = vld [vmem:[%s7623_s19 + $0x111] sm:$0xff] }
 0x147   : > { %6917 = vmatpush3.bf16.msra.mxu1 %v6869_v8  ;;  %6874 = vmatprep.subr.bf16.mxu0 %v6873_v17  ;;  %v5497_v48 = vld [vmem:[%s7623_s19 + $0x10a] sm:$0xff] }
 0x148   : > { %6363 = vmatmul.mubr.f32.gmra.mrb[70].mxu0 %v7822_v55  ;;  %6910 = vmatprep.subr.bf16.mxu1 %v6873_v17  ;;  %v5498_v55 = vld [vmem:[%s7623_s19 + $0x112] sm:$0xff] }
 0x149   : > { %6425 = vmatmul.mubr.f32.gmra.mrb[70].mxu1 %v7828_v59  ;;  %6365 = vmatprep.mubr.f32.mxu0 %v7831_v62  ;;  %v1143_v59 = vld [vmem:[#allocation2 + $0x8] sm:$0xff]  ;;  %v1142_v62 = vld [vmem:[#allocation2] sm:$0xff] }
 0x14a   : > { %6427 = vmatprep.mubr.f32.mxu1 %v7834_v0  ;;  %6876 = vmatpush3.bf16.msra.mxu0 %v6873_v17 }
 0x14b   : > { %6918 = vmatpush3.bf16.msra.mxu1 %v6873_v17  ;;  %6878 = vmatprep.subr.bf16.mxu0 %v6877_v26  ;;  %v1153_v17 = vld [vmem:[#allocation2 + $0x58] sm:$0xff] }
 0x14c   : > { %6366 = vmatmul.mubr.f32.gmra.mrb[72].mxu0 %v7840_v4  ;;  %6911 = vmatprep.subr.bf16.mxu1 %v6877_v26 }
 0x14d   : > { %6428 = vmatmul.mubr.f32.gmra.mrb[72].mxu1 %v7844_v5  ;;  %6368 = vmatprep.mubr.f32.mxu0 %v7847_v9 }
 0x14e   : > { %6430 = vmatprep.mubr.f32.mxu1 %v7850_v10  ;;  %6880 = vmatpush3.bf16.msra.mxu0 %v6877_v26 }
 0x14f   : > { %6919 = vmatpush3.bf16.msra.mxu1 %v6877_v26  ;;  %6882 = vmatprep.subr.bf16.mxu0 %v6881_v33  ;;  %v1152_v26 = vld [vmem:[#allocation2 + $0x50] sm:$0xff] }
 0x150   : > { %6369 = vmatmul.mubr.f32.gmra.mrb[74].mxu0 %v7856_v11  ;;  %6912 = vmatprep.subr.bf16.mxu1 %v6881_v33 }
 0x151   : > { %6431 = vmatmul.mubr.f32.gmra.mrb[74].mxu1 %v7860_v12  ;;  %6371 = vmatprep.mubr.f32.mxu0 %v8663_v36  ;;  %v1145_v12 = vld [vmem:[#allocation2 + $0x18] sm:$0xff] }
 0x152   : > { %6433 = vmatprep.mubr.f32.mxu1 %v8061_v60  ;;  %6884 = vmatpush3.bf16.msra.mxu0 %v6881_v33 }
 0x153   : > { %6920 = vmatpush3.bf16.msra.mxu1 %v6881_v33 }
 0x154   : > { %6372 = vmatmul.mubr.f32.gmra.mrb[76].mxu0 %v8664_v43 }
 0x155   : > { %6434 = vmatmul.mubr.f32.gmra.mrb[76].mxu1 %v8070_v40  ;;  %6374 = vmatprep.mubr.f32.mxu0 %v5425_v37 }
 0x156   : > { %6436 = vmatprep.mubr.f32.mxu1 %v5461_v38 }
 0x158   : > { %6375 = vmatmul.mubr.f32.gmra.mrb[78].mxu0 %v5426_v46 }
 0x159   : > { %6437 = vmatmul.mubr.f32.gmra.mrb[78].mxu1 %v5462_v47  ;;  %6471 = vmatprep.mubr.f32.mxu0 %v7885_v51  ;;  %v1144_v51 = vld [vmem:[#allocation2 + $0x10] sm:$0xff]  ;;  %v1155_v47 = vld [vmem:[#allocation2 + $0x68] sm:$0xff] }
 0x15a   : > { %6486 = vmatprep.mubr.f32.mxu1 %v7955_v15 }
 0x15c   : > { %6472 = vmatmul.mubr.f32.vlgmr.msra.gmra.mrb[80].mxu0 %v7892_v42 }
 0x15d   : > { %6487 = vmatmul.mubr.f32.vlgmr.msra.gmra.mrb[80].mxu1 %v7963_v29  ;;  %6474 = vmatprep.mubr.f32.mxu0 %v7898_v49 }
 0x15e   : > { %6489 = vmatprep.mubr.f32.mxu1 %v7969_v34 }
 0x160   : > { %6475 = vmatmul.mubr.f32.gmra.mrb[82].mxu0 %v7907_v58 }
 0x161   : > { %6490 = vmatmul.mubr.f32.gmra.mrb[82].mxu1 %v7975_v41  ;;  %6477 = vmatprep.mubr.f32.mxu0 %v7913_v14 }
 0x162   : > { %6492 = vmatprep.mubr.f32.mxu1 %v7979_v45 }
 0x164   : > { %6478 = vmatmul.mubr.f32.gmra.mrb[84].mxu0 %v7921_v22 }
 0x165   : > { %6493 = vmatmul.mubr.f32.gmra.mrb[84].mxu1 %v7988_v52  ;;  %6480 = vmatprep.mubr.f32.mxu0 %v7927_v30 }
 0x166   : > { %6495 = vmatprep.mubr.f32.mxu1 %v8064_v39 }
 0x168   : > { %6481 = vmatmul.mubr.f32.gmra.mrb[86].mxu0 %v7935_v57  ;;  %v1147_v57 = vld [vmem:[#allocation2 + $0x28] sm:$0xff] }
 0x169   : > { %6496 = vmatmul.mubr.f32.gmra.mrb[86].mxu1 %v8074_v54  ;;  %6483 = vmatprep.mubr.f32.mxu0 %v7941_v44  ;;  %v1146_v44 = vld [vmem:[#allocation2 + $0x20] sm:$0xff] }
 0x16a   : > { %6498 = vmatprep.mubr.f32.mxu1 %v5497_v48 }
 0x16c   : > { %6484 = vmatmul.mubr.f32.gmra.mrb[88].mxu0 %v7949_v56 }
 0x16d   : > { %6499 = vmatmul.mubr.f32.gmra.mrb[88].mxu1 %v5498_v55 }
 0x18f   : > { %v5977_v0 = vpop.f32.mrb[0].mxu0 }
 0x190   : > { %v1344_v4 = vadd.f32 %v5977_v0, %v1143_v59  ;;  %v6039_v5 = vpop.f32.mrb[0].mxu1  ;;  %v1244_v9 = vpop.f32.mrb[1].mxu0  ;;  %v1154_v59 = vld [vmem:[#allocation2 + $0x60] sm:$0xff] }
 0x191   : > { %v1343_v10 = vadd.f32 %v1244_v9, %v1142_v62  ;;  %v1507_v11 = vpop.f32.mrb[1].mxu1 }
 0x192   : > { %1365 = vst.msk [vmem:[#allocation2 + $0x8] sm:$0xff] %vm1363_vm1, %v1344_v4 }
 0x193   : > { %1364 = vst.msk [vmem:[#allocation2] sm:$0xff] %vm1363_vm1, %v1343_v10  ;;  %v5980_v42 = vpop.f32.mrb[2].mxu0 }
 0x194   : > { %v1346_v49 = vadd.f32 %v5980_v42, %v1145_v12  ;;  %v6042_v58 = vpop.f32.mrb[2].mxu1  ;;  %v1254_v14 = vpop.f32.mrb[3].mxu0 }
 0x195   : > { %v1345_v22 = vadd.f32 %v1254_v14, %v1144_v51  ;;  %v1517_v30 = vpop.f32.mrb[3].mxu1  ;;  %v1157_v51 = vld [vmem:[#allocation2 + $0x78] sm:$0xff] }
 0x196   : > { %1367 = vst.msk [vmem:[#allocation2 + $0x18] sm:$0xff] %vm1363_vm1, %v1346_v49 }
 0x197   : > { %1366 = vst.msk [vmem:[#allocation2 + $0x10] sm:$0xff] %vm1363_vm1, %v1345_v22  ;;  %v5983_v56 = vpop.f32.mrb[4].mxu0 }
 0x198   : > { %v1348_v15 = vadd.f32 %v5983_v56, %v1147_v57  ;;  %v6045_v29 = vpop.f32.mrb[4].mxu1  ;;  %v1264_v34 = vpop.f32.mrb[5].mxu0 }
 0x199   : > { %v1405_v41 = vld [vmem:[#allocation2 + $0x8] sm:$0xff]  ;;  %v1347_v45 = vadd.f32 %v1264_v34, %v1146_v44  ;;  %v1527_v52 = vpop.f32.mrb[5].mxu1 }
 0x19a   : > { %v1607_v21 = vadd.f32 %v6039_v5, %v1405_v41  ;;  %v1404_v25 = vld [vmem:[#allocation2] sm:$0xff]  ;;  %1369 = vst.msk [vmem:[#allocation2 + $0x28] sm:$0xff] %vm1363_vm1, %v1348_v15  ;;  %v1159_v34 = vld [vmem:[#allocation2 + $0x88] sm:$0xff] }
 0x19b   : > { %v1606_v32 = vadd.f32 %v1507_v11, %v1404_v25  ;;  %1368 = vst.msk [vmem:[#allocation2 + $0x20] sm:$0xff] %vm1363_vm1, %v1347_v45  ;;  %v5986_v53 = vpop.f32.mrb[6].mxu0 }
 0x19c   : > { %1627 = vst.msk [vmem:[#allocation2 + $0x8] sm:$0xff] %vm1363_vm1, %v1607_v21  ;;  %v1350_v60 = vadd.f32 %v5986_v53, %v1149_v35  ;;  %v6048_v39 = vpop.f32.mrb[6].mxu1  ;;  %v1274_v40 = vpop.f32.mrb[7].mxu0 }
 0x19d   : > { %1626 = vst.msk [vmem:[#allocation2] sm:$0xff] %vm1363_vm1, %v1606_v32  ;;  %v1407_v54 = vld [vmem:[#allocation2 + $0x18] sm:$0xff]  ;;  %v1349_v2 = vadd.f32 %v1274_v40, %v1148_v24  ;;  %v1537_v1 = vpop.f32.mrb[7].mxu1 }
 0x19e   : > { %v1609_v19 = vadd.f32 %v6042_v58, %v1407_v54  ;;  %v1406_v20 = vld [vmem:[#allocation2 + $0x10] sm:$0xff]  ;;  %1371 = vst.msk [vmem:[#allocation2 + $0x38] sm:$0xff] %vm1363_vm1, %v1350_v60  ;;  %v1161_v40 = vld [vmem:[#allocation2 + $0x98] sm:$0xff] }
 0x19f   : > { %v1608_v63 = vadd.f32 %v1517_v30, %v1406_v20  ;;  %1370 = vst.msk [vmem:[#allocation2 + $0x30] sm:$0xff] %vm1363_vm1, %v1349_v2  ;;  %v5989_v31 = vpop.f32.mrb[8].mxu0  ;;  %v1156_v58 = vld [vmem:[#allocation2 + $0x70] sm:$0xff] }
 0x1a0   : > { %1629 = vst.msk [vmem:[#allocation2 + $0x18] sm:$0xff] %vm1363_vm1, %v1609_v19  ;;  %v1352_v3 = vadd.f32 %v5989_v31, %v1151_v50  ;;  %v6051_v6 = vpop.f32.mrb[8].mxu1  ;;  %v1284_v7 = vpop.f32.mrb[9].mxu0 }
 0x1a1   : > { %1628 = vst.msk [vmem:[#allocation2 + $0x10] sm:$0xff] %vm1363_vm1, %v1608_v63  ;;  %v1409_v8 = vld [vmem:[#allocation2 + $0x28] sm:$0xff]  ;;  %v1351_v13 = vadd.f32 %v1284_v7, %v1150_v61  ;;  %v1547_v16 = vpop.f32.mrb[9].mxu1 }
 0x1a2   : > { %v1611_v18 = vadd.f32 %v6045_v29, %v1409_v8  ;;  %v1408_v23 = vld [vmem:[#allocation2 + $0x20] sm:$0xff]  ;;  %1373 = vst.msk [vmem:[#allocation2 + $0x48] sm:$0xff] %vm1363_vm1, %v1352_v3 }
 0x1a3   : > { %v1610_v27 = vadd.f32 %v1527_v52, %v1408_v23  ;;  %1372 = vst.msk [vmem:[#allocation2 + $0x40] sm:$0xff] %vm1363_vm1, %v1351_v13  ;;  %v5992_v28 = vpop.f32.mrb[10].mxu0  ;;  %v1158_v52 = vld [vmem:[#allocation2 + $0x80] sm:$0xff] }
 0x1a4   : > { %1631 = vst.msk [vmem:[#allocation2 + $0x28] sm:$0xff] %vm1363_vm1, %v1611_v18  ;;  %v1354_v33 = vadd.f32 %v5992_v28, %v1153_v17  ;;  %v6054_v36 = vpop.f32.mrb[10].mxu1  ;;  %v1294_v37 = vpop.f32.mrb[11].mxu0 }
 0x1a5   : > { %1630 = vst.msk [vmem:[#allocation2 + $0x20] sm:$0xff] %vm1363_vm1, %v1610_v27  ;;  %v1411_v38 = vld [vmem:[#allocation2 + $0x38] sm:$0xff]  ;;  %v1353_v43 = vadd.f32 %v1294_v37, %v1152_v26  ;;  %v1557_v46 = vpop.f32.mrb[11].mxu1  ;;  %v1666_v26 = vld [vmem:[#allocation2] sm:$0xff] }
 0x1a6   : > { %v1613_v48 = vadd.f32 %v6048_v39, %v1411_v38  ;;  %v1410_v55 = vld [vmem:[#allocation2 + $0x30] sm:$0xff]  ;;  %1375 = vst.msk [vmem:[#allocation2 + $0x58] sm:$0xff] %vm1363_vm1, %v1354_v33 }
 0x1a7   : > { %v1612_v62 = vadd.f32 %v1537_v1, %v1410_v55  ;;  %1374 = vst.msk [vmem:[#allocation2 + $0x50] sm:$0xff] %vm1363_vm1, %v1353_v43  ;;  %v5995_v0 = vpop.f32.mrb[12].mxu0  ;;  %v1160_v1 = vld [vmem:[#allocation2 + $0x90] sm:$0xff] }
 0x1a8   : > { %1633 = vst.msk [vmem:[#allocation2 + $0x38] sm:$0xff] %vm1363_vm1, %v1613_v48  ;;  %v1356_v4 = vadd.f32 %v5995_v0, %v1155_v47  ;;  %v6057_v5 = vpop.f32.mrb[12].mxu1  ;;  %v1304_v9 = vpop.f32.mrb[13].mxu0 }
 0x1a9   : > { %1632 = vst.msk [vmem:[#allocation2 + $0x30] sm:$0xff] %vm1363_vm1, %v1612_v62  ;;  %v1413_v10 = vld [vmem:[#allocation2 + $0x48] sm:$0xff]  ;;  %v1355_v11 = vadd.f32 %v1304_v9, %v1154_v59  ;;  %v1567_v12 = vpop.f32.mrb[13].mxu1  ;;  %v1668_v59 = vld [vmem:[#allocation2 + $0x10] sm:$0xff] }
 0x1aa   : > { %v1615_v42 = vadd.f32 %v6051_v6, %v1413_v10  ;;  %v1412_v49 = vld [vmem:[#allocation2 + $0x40] sm:$0xff]  ;;  %1377 = vst.msk [vmem:[#allocation2 + $0x68] sm:$0xff] %vm1363_vm1, %v1356_v4 }
 0x1ab   : > { %v1614_v14 = vadd.f32 %v1547_v16, %v1412_v49  ;;  %1376 = vst.msk [vmem:[#allocation2 + $0x60] sm:$0xff] %vm1363_vm1, %v1355_v11  ;;  %v5998_v22 = vpop.f32.mrb[14].mxu0  ;;  %v1667_v16 = vld [vmem:[#allocation2 + $0x8] sm:$0xff] }
 0x1ac   : > { %1635 = vst.msk [vmem:[#allocation2 + $0x48] sm:$0xff] %vm1363_vm1, %v1615_v42  ;;  %v1358_v30 = vadd.f32 %v5998_v22, %v1157_v51  ;;  %v6060_v57 = vpop.f32.mrb[14].mxu1  ;;  %v1314_v44 = vpop.f32.mrb[15].mxu0 }
 0x1ad   : > { %1634 = vst.msk [vmem:[#allocation2 + $0x40] sm:$0xff] %vm1363_vm1, %v1614_v14  ;;  %v1415_v56 = vld [vmem:[#allocation2 + $0x58] sm:$0xff]  ;;  %v1357_v15 = vadd.f32 %v1314_v44, %v1156_v58  ;;  %v1577_v29 = vpop.f32.mrb[15].mxu1  ;;  %v1670_v58 = vld [vmem:[#allocation2 + $0x20] sm:$0xff] }
 0x1ae   : > { %v1617_v41 = vadd.f32 %v6054_v36, %v1415_v56  ;;  %v1414_v45 = vld [vmem:[#allocation2 + $0x50] sm:$0xff]  ;;  %1379 = vst.msk [vmem:[#allocation2 + $0x78] sm:$0xff] %vm1363_vm1, %v1358_v30 }
 0x1af   : > { %v1616_v35 = vadd.f32 %v1557_v46, %v1414_v45  ;;  %1378 = vst.msk [vmem:[#allocation2 + $0x70] sm:$0xff] %vm1363_vm1, %v1357_v15  ;;  %v6001_v21 = vpop.f32.mrb[16].mxu0  ;;  %v1669_v46 = vld [vmem:[#allocation2 + $0x18] sm:$0xff] }
 0x1b0   : > { %1637 = vst.msk [vmem:[#allocation2 + $0x58] sm:$0xff] %vm1363_vm1, %v1617_v41  ;;  %v1360_v25 = vadd.f32 %v6001_v21, %v1159_v34  ;;  %v6063_v24 = vpop.f32.mrb[16].mxu1  ;;  %v1324_v32 = vpop.f32.mrb[17].mxu0 }
 0x1b1   : > { %1636 = vst.msk [vmem:[#allocation2 + $0x50] sm:$0xff] %vm1363_vm1, %v1616_v35  ;;  %v1417_v53 = vld [vmem:[#allocation2 + $0x68] sm:$0xff]  ;;  %v1359_v60 = vadd.f32 %v1324_v32, %v1158_v52  ;;  %v1587_v39 = vpop.f32.mrb[17].mxu1  ;;  %v1672_v52 = vld [vmem:[#allocation2 + $0x30] sm:$0xff] }
 0x1b2   : > { %v1619_v54 = vadd.f32 %v6057_v5, %v1417_v53  ;;  %v1416_v2 = vld [vmem:[#allocation2 + $0x60] sm:$0xff]  ;;  %1381 = vst.msk [vmem:[#allocation2 + $0x88] sm:$0xff] %vm1363_vm1, %v1360_v25 }
 0x1b3   : > { %v1618_v50 = vadd.f32 %v1567_v12, %v1416_v2  ;;  %1380 = vst.msk [vmem:[#allocation2 + $0x80] sm:$0xff] %vm1363_vm1, %v1359_v60  ;;  %v6004_v19 = vpop.f32.mrb[18].mxu0  ;;  %v1671_v12 = vld [vmem:[#allocation2 + $0x28] sm:$0xff] }
 0x1b4   : > { %1639 = vst.msk [vmem:[#allocation2 + $0x68] sm:$0xff] %vm1363_vm1, %v1619_v54  ;;  %v1362_v20 = vadd.f32 %v6004_v19, %v1161_v40  ;;  %v6066_v61 = vpop.f32.mrb[18].mxu1  ;;  %v1334_v63 = vpop.f32.mrb[19].mxu0 }
 0x1b5   : > { %1638 = vst.msk [vmem:[#allocation2 + $0x60] sm:$0xff] %vm1363_vm1, %v1618_v50  ;;  %v1419_v31 = vld [vmem:[#allocation2 + $0x78] sm:$0xff]  ;;  %v1361_v3 = vadd.f32 %v1334_v63, %v1160_v1  ;;  %v1597_v6 = vpop.f32.mrb[19].mxu1  ;;  %v1674_v1 = vld [vmem:[#allocation2 + $0x40] sm:$0xff] }
 0x1b6   : > { %v1621_v7 = vadd.f32 %v6060_v57, %v1419_v31  ;;  %v1418_v8 = vld [vmem:[#allocation2 + $0x70] sm:$0xff]  ;;  %1383 = vst.msk [vmem:[#allocation2 + $0x98] sm:$0xff] %vm1363_vm1, %v1362_v20 }
 0x1b7   : > { %v1620_v13 = vadd.f32 %v1577_v29, %v1418_v8  ;;  %1382 = vst.msk [vmem:[#allocation2 + $0x90] sm:$0xff] %vm1363_vm1, %v1361_v3  ;;  %v6101_v17 = vpop.f32.mrb[20].mxu0  ;;  %v1673_v29 = vld [vmem:[#allocation2 + $0x38] sm:$0xff] }
 0x1b8   : > { %1641 = vst.msk [vmem:[#allocation2 + $0x78] sm:$0xff] %vm1363_vm1, %v1621_v7  ;;  %v1869_v18 = vadd.f32 %v6101_v17, %v1667_v16  ;;  %v6163_v23 = vpop.f32.mrb[20].mxu1  ;;  %v1769_v27 = vpop.f32.mrb[21].mxu0  ;;  %v1676_v16 = vld [vmem:[#allocation2 + $0x50] sm:$0xff] }
 0x1b9   : > { %1640 = vst.msk [vmem:[#allocation2 + $0x70] sm:$0xff] %vm1363_vm1, %v1620_v13  ;;  %v1421_v28 = vld [vmem:[#allocation2 + $0x88] sm:$0xff]  ;;  %v1868_v33 = vadd.f32 %v1769_v27, %v1666_v26  ;;  %v2032_v36 = vpop.f32.mrb[21].mxu1 }
 0x1ba   : > { %v1623_v37 = vadd.f32 %v6063_v24, %v1421_v28  ;;  %v1420_v38 = vld [vmem:[#allocation2 + $0x80] sm:$0xff]  ;;  %1889 = vst.msk [vmem:[#allocation2 + $0x8] sm:$0xff] %vm1363_vm1, %v1869_v18 }
 0x1bb   : > { %v1622_v43 = vadd.f32 %v1587_v39, %v1420_v38  ;;  %1888 = vst.msk [vmem:[#allocation2] sm:$0xff] %vm1363_vm1, %v1868_v33  ;;  %v6104_v47 = vpop.f32.mrb[22].mxu0  ;;  %v1675_v39 = vld [vmem:[#allocation2 + $0x48] sm:$0xff] }
 0x1bc   : > { %1643 = vst.msk [vmem:[#allocation2 + $0x88] sm:$0xff] %vm1363_vm1, %v1623_v37  ;;  %v1871_v48 = vadd.f32 %v6104_v47, %v1669_v46  ;;  %v6166_v55 = vpop.f32.mrb[22].mxu1  ;;  %v1779_v62 = vpop.f32.mrb[23].mxu0  ;;  %v1678_v46 = vld [vmem:[#allocation2 + $0x60] sm:$0xff] }
 0x1bd   : > { %1642 = vst.msk [vmem:[#allocation2 + $0x80] sm:$0xff] %vm1363_vm1, %v1622_v43  ;;  %v1423_v0 = vld [vmem:[#allocation2 + $0x98] sm:$0xff]  ;;  %v1870_v4 = vadd.f32 %v1779_v62, %v1668_v59  ;;  %v2042_v5 = vpop.f32.mrb[23].mxu1 }
 0x1be   : > { %v1625_v9 = vadd.f32 %v6066_v61, %v1423_v0  ;;  %v1422_v10 = vld [vmem:[#allocation2 + $0x90] sm:$0xff]  ;;  %1891 = vst.msk [vmem:[#allocation2 + $0x18] sm:$0xff] %vm1363_vm1, %v1871_v48 }
 0x1bf   : > { %v1624_v11 = vadd.f32 %v1597_v6, %v1422_v10  ;;  %1890 = vst.msk [vmem:[#allocation2 + $0x10] sm:$0xff] %vm1363_vm1, %v1870_v4  ;;  %v6107_v51 = vpop.f32.mrb[24].mxu0  ;;  %v1677_v6 = vld [vmem:[#allocation2 + $0x58] sm:$0xff] }
 0x1c0   : > { %1645 = vst.msk [vmem:[#allocation2 + $0x98] sm:$0xff] %vm1363_vm1, %v1625_v9  ;;  %v1873_v42 = vadd.f32 %v6107_v51, %v1671_v12  ;;  %v6169_v49 = vpop.f32.mrb[24].mxu1  ;;  %v1789_v14 = vpop.f32.mrb[25].mxu0  ;;  %v1680_v12 = vld [vmem:[#allocation2 + $0x70] sm:$0xff] }
 0x1c1   : > { %1644 = vst.msk [vmem:[#allocation2 + $0x90] sm:$0xff] %vm1363_vm1, %v1624_v11  ;;  %v1930_v22 = vld [vmem:[#allocation2 + $0x8] sm:$0xff]  ;;  %v1872_v30 = vadd.f32 %v1789_v14, %v1670_v58  ;;  %v2052_v57 = vpop.f32.mrb[25].mxu1 }
 0x1c2   : > { %v2132_v44 = vadd.f32 %v6163_v23, %v1930_v22  ;;  %v1929_v56 = vld [vmem:[#allocation2] sm:$0xff]  ;;  %1893 = vst.msk [vmem:[#allocation2 + $0x28] sm:$0xff] %vm1363_vm1, %v1873_v42 }
 0x1c3   : > { %v2131_v15 = vadd.f32 %v2032_v36, %v1929_v56  ;;  %1892 = vst.msk [vmem:[#allocation2 + $0x20] sm:$0xff] %vm1363_vm1, %v1872_v30  ;;  %v6110_v34 = vpop.f32.mrb[26].mxu0  ;;  %v1679_v36 = vld [vmem:[#allocation2 + $0x68] sm:$0xff] }
 0x1c4   : > { %2152 = vst.msk [vmem:[#allocation2 + $0x8] sm:$0xff] %vm1363_vm1, %v2132_v44  ;;  %v1875_v41 = vadd.f32 %v6110_v34, %v1673_v29  ;;  %v6172_v45 = vpop.f32.mrb[26].mxu1  ;;  %v1799_v35 = vpop.f32.mrb[27].mxu0  ;;  %v1682_v29 = vld [vmem:[#allocation2 + $0x80] sm:$0xff] }
 0x1c5   : > { %2151 = vst.msk [vmem:[#allocation2] sm:$0xff] %vm1363_vm1, %v2131_v15  ;;  %v1932_v21 = vld [vmem:[#allocation2 + $0x18] sm:$0xff]  ;;  %v1874_v25 = vadd.f32 %v1799_v35, %v1672_v52  ;;  %v2062_v24 = vpop.f32.mrb[27].mxu1 }
 0x1c6   : > { %v2134_v32 = vadd.f32 %v6166_v55, %v1932_v21  ;;  %v1931_v53 = vld [vmem:[#allocation2 + $0x10] sm:$0xff]  ;;  %1895 = vst.msk [vmem:[#allocation2 + $0x38] sm:$0xff] %vm1363_vm1, %v1875_v41 }
 0x1c7   : > { %v2133_v60 = vadd.f32 %v2042_v5, %v1931_v53  ;;  %1894 = vst.msk [vmem:[#allocation2 + $0x30] sm:$0xff] %vm1363_vm1, %v1874_v25  ;;  %v6113_v40 = vpop.f32.mrb[28].mxu0  ;;  %v1681_v5 = vld [vmem:[#allocation2 + $0x78] sm:$0xff] }
 0x1c8   : > { %2154 = vst.msk [vmem:[#allocation2 + $0x18] sm:$0xff] %vm1363_vm1, %v2134_v32  ;;  %v1877_v54 = vadd.f32 %v6113_v40, %v1675_v39  ;;  %v6175_v2 = vpop.f32.mrb[28].mxu1  ;;  %v1809_v50 = vpop.f32.mrb[29].mxu0  ;;  %v1684_v39 = vld [vmem:[#allocation2 + $0x90] sm:$0xff] }
 0x1c9   : > { %2153 = vst.msk [vmem:[#allocation2 + $0x10] sm:$0xff] %vm1363_vm1, %v2133_v60  ;;  %v1934_v19 = vld [vmem:[#allocation2 + $0x28] sm:$0xff]  ;;  %v1876_v20 = vadd.f32 %v1809_v50, %v1674_v1  ;;  %v2072_v61 = vpop.f32.mrb[29].mxu1 }
 0x1ca   : > { %v2136_v63 = vadd.f32 %v6169_v49, %v1934_v19  ;;  %v1933_v31 = vld [vmem:[#allocation2 + $0x20] sm:$0xff]  ;;  %1897 = vst.msk [vmem:[#allocation2 + $0x48] sm:$0xff] %vm1363_vm1, %v1877_v54 }
 0x1cb   : > { %v2135_v3 = vadd.f32 %v2052_v57, %v1933_v31  ;;  %1896 = vst.msk [vmem:[#allocation2 + $0x40] sm:$0xff] %vm1363_vm1, %v1876_v20  ;;  %v6116_v7 = vpop.f32.mrb[30].mxu0  ;;  %v1683_v57 = vld [vmem:[#allocation2 + $0x88] sm:$0xff] }
 0x1cc   : > { %2156 = vst.msk [vmem:[#allocation2 + $0x28] sm:$0xff] %vm1363_vm1, %v2136_v63  ;;  %v1879_v8 = vadd.f32 %v6116_v7, %v1677_v6  ;;  %v6178_v13 = vpop.f32.mrb[30].mxu1  ;;  %v1819_v17 = vpop.f32.mrb[31].mxu0  ;;  %v2191_v6 = vld [vmem:[#allocation2] sm:$0xff] }
 0x1cd   : > { %2155 = vst.msk [vmem:[#allocation2 + $0x20] sm:$0xff] %vm1363_vm1, %v2135_v3  ;;  %v1936_v18 = vld [vmem:[#allocation2 + $0x38] sm:$0xff]  ;;  %v1878_v23 = vadd.f32 %v1819_v17, %v1676_v16  ;;  %v2082_v26 = vpop.f32.mrb[31].mxu1 }
 0x1ce   : > { %v2138_v27 = vadd.f32 %v6172_v45, %v1936_v18  ;;  %v1935_v28 = vld [vmem:[#allocation2 + $0x30] sm:$0xff]  ;;  %1899 = vst.msk [vmem:[#allocation2 + $0x58] sm:$0xff] %vm1363_vm1, %v1879_v8 }
 0x1cf   : > { %v2137_v33 = vadd.f32 %v2062_v24, %v1935_v28  ;;  %1898 = vst.msk [vmem:[#allocation2 + $0x50] sm:$0xff] %vm1363_vm1, %v1878_v23  ;;  %v6119_v37 = vpop.f32.mrb[32].mxu0  ;;  %v1685_v24 = vld [vmem:[#allocation2 + $0x98] sm:$0xff] }
 0x1d0   : > { %2158 = vst.msk [vmem:[#allocation2 + $0x38] sm:$0xff] %vm1363_vm1, %v2138_v27  ;;  %v1881_v38 = vadd.f32 %v6119_v37, %v1679_v36  ;;  %v6181_v43 = vpop.f32.mrb[32].mxu1  ;;  %v1829_v47 = vpop.f32.mrb[33].mxu0  ;;  %v2193_v36 = vld [vmem:[#allocation2 + $0x10] sm:$0xff] }
 0x1d1   : > { %2157 = vst.msk [vmem:[#allocation2 + $0x30] sm:$0xff] %vm1363_vm1, %v2137_v33  ;;  %v1938_v48 = vld [vmem:[#allocation2 + $0x48] sm:$0xff]  ;;  %v1880_v55 = vadd.f32 %v1829_v47, %v1678_v46  ;;  %v2092_v59 = vpop.f32.mrb[33].mxu1 }
 0x1d2   : > { %v2140_v62 = vadd.f32 %v6175_v2, %v1938_v48  ;;  %v1937_v0 = vld [vmem:[#allocation2 + $0x40] sm:$0xff]  ;;  %1901 = vst.msk [vmem:[#allocation2 + $0x68] sm:$0xff] %vm1363_vm1, %v1881_v38 }
 0x1d3   : > { %v2139_v4 = vadd.f32 %v2072_v61, %v1937_v0  ;;  %1900 = vst.msk [vmem:[#allocation2 + $0x60] sm:$0xff] %vm1363_vm1, %v1880_v55  ;;  %v6122_v9 = vpop.f32.mrb[34].mxu0  ;;  %v2192_v61 = vld [vmem:[#allocation2 + $0x8] sm:$0xff] }
 0x1d4   : > { %2160 = vst.msk [vmem:[#allocation2 + $0x48] sm:$0xff] %vm1363_vm1, %v2140_v62  ;;  %v1883_v10 = vadd.f32 %v6122_v9, %v1681_v5  ;;  %v6184_v11 = vpop.f32.mrb[34].mxu1  ;;  %v1839_v51 = vpop.f32.mrb[35].mxu0  ;;  %v2195_v5 = vld [vmem:[#allocation2 + $0x20] sm:$0xff] }
 0x1d5   : > { %2159 = vst.msk [vmem:[#allocation2 + $0x40] sm:$0xff] %vm1363_vm1, %v2139_v4  ;;  %v1940_v42 = vld [vmem:[#allocation2 + $0x58] sm:$0xff]  ;;  %v1882_v49 = vadd.f32 %v1839_v51, %v1680_v12  ;;  %v2102_v58 = vpop.f32.mrb[35].mxu1 }
 0x1d6   : > { %v2142_v14 = vadd.f32 %v6178_v13, %v1940_v42  ;;  %v1939_v22 = vld [vmem:[#allocation2 + $0x50] sm:$0xff]  ;;  %1903 = vst.msk [vmem:[#allocation2 + $0x78] sm:$0xff] %vm1363_vm1, %v1883_v10 }
 0x1d7   : > { %v2141_v30 = vadd.f32 %v2082_v26, %v1939_v22  ;;  %1902 = vst.msk [vmem:[#allocation2 + $0x70] sm:$0xff] %vm1363_vm1, %v1882_v49  ;;  %v6125_v44 = vpop.f32.mrb[36].mxu0  ;;  %v2194_v26 = vld [vmem:[#allocation2 + $0x18] sm:$0xff] }
 0x1d8   : > { %2162 = vst.msk [vmem:[#allocation2 + $0x58] sm:$0xff] %vm1363_vm1, %v2142_v14  ;;  %v1885_v56 = vadd.f32 %v6125_v44, %v1683_v57  ;;  %v6187_v15 = vpop.f32.mrb[36].mxu1  ;;  %v1849_v34 = vpop.f32.mrb[37].mxu0  ;;  %v2197_v57 = vld [vmem:[#allocation2 + $0x30] sm:$0xff] }
 0x1d9   : > { %2161 = vst.msk [vmem:[#allocation2 + $0x50] sm:$0xff] %vm1363_vm1, %v2141_v30  ;;  %v1942_v41 = vld [vmem:[#allocation2 + $0x68] sm:$0xff]  ;;  %v1884_v45 = vadd.f32 %v1849_v34, %v1682_v29  ;;  %v2112_v52 = vpop.f32.mrb[37].mxu1 }
 0x1da   : > { %v2144_v35 = vadd.f32 %v6181_v43, %v1942_v41  ;;  %v1941_v21 = vld [vmem:[#allocation2 + $0x60] sm:$0xff]  ;;  %1905 = vst.msk [vmem:[#allocation2 + $0x88] sm:$0xff] %vm1363_vm1, %v1885_v56 }
 0x1db   : > { %v2143_v25 = vadd.f32 %v2092_v59, %v1941_v21  ;;  %1904 = vst.msk [vmem:[#allocation2 + $0x80] sm:$0xff] %vm1363_vm1, %v1884_v45  ;;  %v6128_v32 = vpop.f32.mrb[38].mxu0  ;;  %v2196_v59 = vld [vmem:[#allocation2 + $0x28] sm:$0xff] }
 0x1dc   : > { %2164 = vst.msk [vmem:[#allocation2 + $0x68] sm:$0xff] %vm1363_vm1, %v2144_v35  ;;  %v1887_v53 = vadd.f32 %v6128_v32, %v1685_v24  ;;  %v6190_v60 = vpop.f32.mrb[38].mxu1  ;;  %v1859_v40 = vpop.f32.mrb[39].mxu0  ;;  %v2199_v24 = vld [vmem:[#allocation2 + $0x40] sm:$0xff] }
 0x1dd   : > { %2163 = vst.msk [vmem:[#allocation2 + $0x60] sm:$0xff] %vm1363_vm1, %v2143_v25  ;;  %v1944_v54 = vld [vmem:[#allocation2 + $0x78] sm:$0xff]  ;;  %v1886_v2 = vadd.f32 %v1859_v40, %v1684_v39  ;;  %v2122_v1 = vpop.f32.mrb[39].mxu1 }
 0x1de   : > { %v2146_v50 = vadd.f32 %v6184_v11, %v1944_v54  ;;  %v1943_v19 = vld [vmem:[#allocation2 + $0x70] sm:$0xff]  ;;  %1907 = vst.msk [vmem:[#allocation2 + $0x98] sm:$0xff] %vm1363_vm1, %v1887_v53 }
 0x1df   : > { %v2145_v20 = vadd.f32 %v2102_v58, %v1943_v19  ;;  %1906 = vst.msk [vmem:[#allocation2 + $0x90] sm:$0xff] %vm1363_vm1, %v1886_v2  ;;  %v6225_v63 = vpop.f32.mrb[40].mxu0  ;;  %v2198_v58 = vld [vmem:[#allocation2 + $0x38] sm:$0xff] }
 0x1e0   : > { %2166 = vst.msk [vmem:[#allocation2 + $0x78] sm:$0xff] %vm1363_vm1, %v2146_v50  ;;  %v2394_v31 = vadd.f32 %v6225_v63, %v2192_v61  ;;  %v6287_v3 = vpop.f32.mrb[40].mxu1  ;;  %v2294_v7 = vpop.f32.mrb[41].mxu0  ;;  %v2201_v61 = vld [vmem:[#allocation2 + $0x50] sm:$0xff] }
 0x1e1   : > { %2165 = vst.msk [vmem:[#allocation2 + $0x70] sm:$0xff] %vm1363_vm1, %v2145_v20  ;;  %v1946_v8 = vld [vmem:[#allocation2 + $0x88] sm:$0xff]  ;;  %v2393_v13 = vadd.f32 %v2294_v7, %v2191_v6  ;;  %v2556_v16 = vpop.f32.mrb[41].mxu1 }
 0x1e2   : > { %v2148_v17 = vadd.f32 %v6187_v15, %v1946_v8  ;;  %v1945_v18 = vld [vmem:[#allocation2 + $0x80] sm:$0xff]  ;;  %2414 = vst.msk [vmem:[#allocation2 + $0x8] sm:$0xff] %vm1363_vm1, %v2394_v31 }
 0x1e3   : > { %v2147_v23 = vadd.f32 %v2112_v52, %v1945_v18  ;;  %2413 = vst.msk [vmem:[#allocation2] sm:$0xff] %vm1363_vm1, %v2393_v13  ;;  %v6228_v27 = vpop.f32.mrb[42].mxu0  ;;  %v2200_v52 = vld [vmem:[#allocation2 + $0x48] sm:$0xff] }
 0x1e4   : > { %2168 = vst.msk [vmem:[#allocation2 + $0x88] sm:$0xff] %vm1363_vm1, %v2148_v17  ;;  %v2396_v28 = vadd.f32 %v6228_v27, %v2194_v26  ;;  %v6290_v33 = vpop.f32.mrb[42].mxu1  ;;  %v2304_v37 = vpop.f32.mrb[43].mxu0  ;;  %v2203_v26 = vld [vmem:[#allocation2 + $0x60] sm:$0xff] }
 0x1e5   : > { %2167 = vst.msk [vmem:[#allocation2 + $0x80] sm:$0xff] %vm1363_vm1, %v2147_v23  ;;  %v1948_v38 = vld [vmem:[#allocation2 + $0x98] sm:$0xff]  ;;  %v2395_v43 = vadd.f32 %v2304_v37, %v2193_v36  ;;  %v2566_v46 = vpop.f32.mrb[43].mxu1 }
 0x1e6   : > { %v2150_v47 = vadd.f32 %v6190_v60, %v1948_v38  ;;  %v1947_v48 = vld [vmem:[#allocation2 + $0x90] sm:$0xff]  ;;  %2416 = vst.msk [vmem:[#allocation2 + $0x18] sm:$0xff] %vm1363_vm1, %v2396_v28 }
 0x1e7   : > { %v2149_v55 = vadd.f32 %v2122_v1, %v1947_v48  ;;  %2415 = vst.msk [vmem:[#allocation2 + $0x10] sm:$0xff] %vm1363_vm1, %v2395_v43  ;;  %v6231_v62 = vpop.f32.mrb[44].mxu0  ;;  %v2202_v1 = vld [vmem:[#allocation2 + $0x58] sm:$0xff] }
 0x1e8   : > { %2170 = vst.msk [vmem:[#allocation2 + $0x98] sm:$0xff] %vm1363_vm1, %v2150_v47  ;;  %v2398_v0 = vadd.f32 %v6231_v62, %v2196_v59  ;;  %v6293_v4 = vpop.f32.mrb[44].mxu1  ;;  %v2314_v9 = vpop.f32.mrb[45].mxu0  ;;  %v2205_v59 = vld [vmem:[#allocation2 + $0x70] sm:$0xff] }
 0x1e9   : > { %2169 = vst.msk [vmem:[#allocation2 + $0x90] sm:$0xff] %vm1363_vm1, %v2149_v55  ;;  %v2454_v10 = vld [vmem:[#allocation2 + $0x8] sm:$0xff]  ;;  %v2397_v11 = vadd.f32 %v2314_v9, %v2195_v5  ;;  %v2576_v12 = vpop.f32.mrb[45].mxu1 }
 0x1ea   : > { %v2656_v51 = vadd.f32 %v6287_v3, %v2454_v10  ;;  %v2453_v42 = vld [vmem:[#allocation2] sm:$0xff]  ;;  %2418 = vst.msk [vmem:[#allocation2 + $0x28] sm:$0xff] %vm1363_vm1, %v2398_v0 }
 0x1eb   : > { %v2655_v49 = vadd.f32 %v2556_v16, %v2453_v42  ;;  %2417 = vst.msk [vmem:[#allocation2 + $0x20] sm:$0xff] %vm1363_vm1, %v2397_v11  ;;  %v6234_v14 = vpop.f32.mrb[46].mxu0  ;;  %v2204_v16 = vld [vmem:[#allocation2 + $0x68] sm:$0xff] }
 0x1ec   : > { %2676 = vst.msk [vmem:[#allocation2 + $0x8] sm:$0xff] %vm1363_vm1, %v2656_v51  ;;  %v2400_v22 = vadd.f32 %v6234_v14, %v2198_v58  ;;  %v6296_v30 = vpop.f32.mrb[46].mxu1  ;;  %v2324_v44 = vpop.f32.mrb[47].mxu0  ;;  %v2207_v58 = vld [vmem:[#allocation2 + $0x80] sm:$0xff] }
 0x1ed   : > { %2675 = vst.msk [vmem:[#allocation2] sm:$0xff] %vm1363_vm1, %v2655_v49  ;;  %v2456_v56 = vld [vmem:[#allocation2 + $0x18] sm:$0xff]  ;;  %v2399_v15 = vadd.f32 %v2324_v44, %v2197_v57  ;;  %v2586_v29 = vpop.f32.mrb[47].mxu1 }
 0x1ee   : > { %v2658_v34 = vadd.f32 %v6290_v33, %v2456_v56  ;;  %v2455_v41 = vld [vmem:[#allocation2 + $0x10] sm:$0xff]  ;;  %2420 = vst.msk [vmem:[#allocation2 + $0x38] sm:$0xff] %vm1363_vm1, %v2400_v22 }
 0x1ef   : > { %v2657_v45 = vadd.f32 %v2566_v46, %v2455_v41  ;;  %2419 = vst.msk [vmem:[#allocation2 + $0x30] sm:$0xff] %vm1363_vm1, %v2399_v15  ;;  %v6237_v35 = vpop.f32.mrb[48].mxu0  ;;  %v2206_v46 = vld [vmem:[#allocation2 + $0x78] sm:$0xff] }
 0x1f0   : > { %2678 = vst.msk [vmem:[#allocation2 + $0x18] sm:$0xff] %vm1363_vm1, %v2658_v34  ;;  %v2402_v21 = vadd.f32 %v6237_v35, %v2200_v52  ;;  %v6299_v25 = vpop.f32.mrb[48].mxu1  ;;  %v2334_v32 = vpop.f32.mrb[49].mxu0  ;;  %v2209_v52 = vld [vmem:[#allocation2 + $0x90] sm:$0xff] }
 0x1f1   : > { %2677 = vst.msk [vmem:[#allocation2 + $0x10] sm:$0xff] %vm1363_vm1, %v2657_v45  ;;  %v2458_v53 = vld [vmem:[#allocation2 + $0x28] sm:$0xff]  ;;  %v2401_v60 = vadd.f32 %v2334_v32, %v2199_v24  ;;  %v2596_v39 = vpop.f32.mrb[49].mxu1 }
 0x1f2   : > { %v2660_v40 = vadd.f32 %v6293_v4, %v2458_v53  ;;  %v2457_v54 = vld [vmem:[#allocation2 + $0x20] sm:$0xff]  ;;  %2422 = vst.msk [vmem:[#allocation2 + $0x48] sm:$0xff] %vm1363_vm1, %v2402_v21 }
 0x1f3   : > { %v2659_v2 = vadd.f32 %v2576_v12, %v2457_v54  ;;  %2421 = vst.msk [vmem:[#allocation2 + $0x40] sm:$0xff] %vm1363_vm1, %v2401_v60  ;;  %v6240_v50 = vpop.f32.mrb[50].mxu0  ;;  %v2208_v12 = vld [vmem:[#allocation2 + $0x88] sm:$0xff] }
 0x1f4   : > { %2680 = vst.msk [vmem:[#allocation2 + $0x28] sm:$0xff] %vm1363_vm1, %v2660_v40  ;;  %v2404_v19 = vadd.f32 %v6240_v50, %v2202_v1  ;;  %v6302_v20 = vpop.f32.mrb[50].mxu1  ;;  %v2344_v63 = vpop.f32.mrb[51].mxu0  ;;  %v2716_v1 = vld [vmem:[#allocation2] sm:$0xff] }
 0x1f5   : > { %2679 = vst.msk [vmem:[#allocation2 + $0x20] sm:$0xff] %vm1363_vm1, %v2659_v2  ;;  %v2460_v31 = vld [vmem:[#allocation2 + $0x38] sm:$0xff]  ;;  %v2403_v3 = vadd.f32 %v2344_v63, %v2201_v61  ;;  %v2606_v6 = vpop.f32.mrb[51].mxu1 }
 0x1f6   : > { %v2662_v7 = vadd.f32 %v6296_v30, %v2460_v31  ;;  %v2459_v8 = vld [vmem:[#allocation2 + $0x30] sm:$0xff]  ;;  %2424 = vst.msk [vmem:[#allocation2 + $0x58] sm:$0xff] %vm1363_vm1, %v2404_v19 }
 0x1f7   : > { %v2661_v13 = vadd.f32 %v2586_v29, %v2459_v8  ;;  %2423 = vst.msk [vmem:[#allocation2 + $0x50] sm:$0xff] %vm1363_vm1, %v2403_v3  ;;  %v6243_v17 = vpop.f32.mrb[52].mxu0  ;;  %v2210_v29 = vld [vmem:[#allocation2 + $0x98] sm:$0xff] }
 0x1f8   : > { %2682 = vst.msk [vmem:[#allocation2 + $0x38] sm:$0xff] %vm1363_vm1, %v2662_v7  ;;  %v2406_v18 = vadd.f32 %v6243_v17, %v2204_v16  ;;  %v6305_v23 = vpop.f32.mrb[52].mxu1  ;;  %v2354_v27 = vpop.f32.mrb[53].mxu0  ;;  %v2718_v16 = vld [vmem:[#allocation2 + $0x10] sm:$0xff] }
 0x1f9   : > { %2681 = vst.msk [vmem:[#allocation2 + $0x30] sm:$0xff] %vm1363_vm1, %v2661_v13  ;;  %v2462_v28 = vld [vmem:[#allocation2 + $0x48] sm:$0xff]  ;;  %v2405_v33 = vadd.f32 %v2354_v27, %v2203_v26  ;;  %v2616_v36 = vpop.f32.mrb[53].mxu1 }
 0x1fa   : > { %v2664_v37 = vadd.f32 %v6299_v25, %v2462_v28  ;;  %v2461_v38 = vld [vmem:[#allocation2 + $0x40] sm:$0xff]  ;;  %2426 = vst.msk [vmem:[#allocation2 + $0x68] sm:$0xff] %vm1363_vm1, %v2406_v18 }
 0x1fb   : > { %v2663_v43 = vadd.f32 %v2596_v39, %v2461_v38  ;;  %2425 = vst.msk [vmem:[#allocation2 + $0x60] sm:$0xff] %vm1363_vm1, %v2405_v33  ;;  %v6246_v47 = vpop.f32.mrb[54].mxu0  ;;  %v2717_v39 = vld [vmem:[#allocation2 + $0x8] sm:$0xff] }
 0x1fc   : > { %2684 = vst.msk [vmem:[#allocation2 + $0x48] sm:$0xff] %vm1363_vm1, %v2664_v37  ;;  %v2408_v48 = vadd.f32 %v6246_v47, %v2206_v46  ;;  %v6308_v55 = vpop.f32.mrb[54].mxu1  ;;  %v2364_v62 = vpop.f32.mrb[55].mxu0  ;;  %v2720_v46 = vld [vmem:[#allocation2 + $0x20] sm:$0xff] }
 0x1fd   : > { %2683 = vst.msk [vmem:[#allocation2 + $0x40] sm:$0xff] %vm1363_vm1, %v2663_v43  ;;  %v2464_v0 = vld [vmem:[#allocation2 + $0x58] sm:$0xff]  ;;  %v2407_v4 = vadd.f32 %v2364_v62, %v2205_v59  ;;  %v2626_v5 = vpop.f32.mrb[55].mxu1 }
 0x1fe   : > { %v2666_v9 = vadd.f32 %v6302_v20, %v2464_v0  ;;  %v2463_v10 = vld [vmem:[#allocation2 + $0x50] sm:$0xff]  ;;  %2428 = vst.msk [vmem:[#allocation2 + $0x78] sm:$0xff] %vm1363_vm1, %v2408_v48 }
 0x1ff   : > { %v2665_v11 = vadd.f32 %v2606_v6, %v2463_v10  ;;  %2427 = vst.msk [vmem:[#allocation2 + $0x70] sm:$0xff] %vm1363_vm1, %v2407_v4  ;;  %v6249_v51 = vpop.f32.mrb[56].mxu0  ;;  %v2719_v6 = vld [vmem:[#allocation2 + $0x18] sm:$0xff] }
 0x200   : > { %2686 = vst.msk [vmem:[#allocation2 + $0x58] sm:$0xff] %vm1363_vm1, %v2666_v9  ;;  %v2410_v42 = vadd.f32 %v6249_v51, %v2208_v12  ;;  %v6311_v49 = vpop.f32.mrb[56].mxu1  ;;  %v2374_v14 = vpop.f32.mrb[57].mxu0  ;;  %v2722_v12 = vld [vmem:[#allocation2 + $0x30] sm:$0xff] }
 0x201   : > { %2685 = vst.msk [vmem:[#allocation2 + $0x50] sm:$0xff] %vm1363_vm1, %v2665_v11  ;;  %v2466_v22 = vld [vmem:[#allocation2 + $0x68] sm:$0xff]  ;;  %v2409_v30 = vadd.f32 %v2374_v14, %v2207_v58  ;;  %v2636_v57 = vpop.f32.mrb[57].mxu1 }
 0x202   : > { %v2668_v44 = vadd.f32 %v6305_v23, %v2466_v22  ;;  %v2465_v56 = vld [vmem:[#allocation2 + $0x60] sm:$0xff]  ;;  %2430 = vst.msk [vmem:[#allocation2 + $0x88] sm:$0xff] %vm1363_vm1, %v2410_v42 }
 0x203   : > { %v2667_v15 = vadd.f32 %v2616_v36, %v2465_v56  ;;  %2429 = vst.msk [vmem:[#allocation2 + $0x80] sm:$0xff] %vm1363_vm1, %v2409_v30  ;;  %v6252_v34 = vpop.f32.mrb[58].mxu0  ;;  %v2721_v36 = vld [vmem:[#allocation2 + $0x28] sm:$0xff] }
 0x204   : > { %2688 = vst.msk [vmem:[#allocation2 + $0x68] sm:$0xff] %vm1363_vm1, %v2668_v44  ;;  %v2412_v41 = vadd.f32 %v6252_v34, %v2210_v29  ;;  %v6314_v45 = vpop.f32.mrb[58].mxu1  ;;  %v2384_v35 = vpop.f32.mrb[59].mxu0  ;;  %v2724_v29 = vld [vmem:[#allocation2 + $0x40] sm:$0xff] }
 0x205   : > { %2687 = vst.msk [vmem:[#allocation2 + $0x60] sm:$0xff] %vm1363_vm1, %v2667_v15  ;;  %v2468_v21 = vld [vmem:[#allocation2 + $0x78] sm:$0xff]  ;;  %v2411_v25 = vadd.f32 %v2384_v35, %v2209_v52  ;;  %v2646_v24 = vpop.f32.mrb[59].mxu1 }
 0x206   : > { %v2670_v32 = vadd.f32 %v6308_v55, %v2468_v21  ;;  %v2467_v53 = vld [vmem:[#allocation2 + $0x70] sm:$0xff]  ;;  %2432 = vst.msk [vmem:[#allocation2 + $0x98] sm:$0xff] %vm1363_vm1, %v2412_v41 }
 0x207   : > { %v2669_v60 = vadd.f32 %v2626_v5, %v2467_v53  ;;  %2431 = vst.msk [vmem:[#allocation2 + $0x90] sm:$0xff] %vm1363_vm1, %v2411_v25  ;;  %v6349_v40 = vpop.f32.mrb[60].mxu0  ;;  %v2723_v5 = vld [vmem:[#allocation2 + $0x38] sm:$0xff] }
 0x208   : > { %2690 = vst.msk [vmem:[#allocation2 + $0x78] sm:$0xff] %vm1363_vm1, %v2670_v32  ;;  %v2919_v54 = vadd.f32 %v6349_v40, %v2717_v39  ;;  %v6411_v2 = vpop.f32.mrb[60].mxu1  ;;  %v2819_v50 = vpop.f32.mrb[61].mxu0  ;;  %v2726_v39 = vld [vmem:[#allocation2 + $0x50] sm:$0xff] }
 0x209   : > { %2689 = vst.msk [vmem:[#allocation2 + $0x70] sm:$0xff] %vm1363_vm1, %v2669_v60  ;;  %v2470_v19 = vld [vmem:[#allocation2 + $0x88] sm:$0xff]  ;;  %v2918_v20 = vadd.f32 %v2819_v50, %v2716_v1  ;;  %v3081_v61 = vpop.f32.mrb[61].mxu1 }
 0x20a   : > { %v2672_v63 = vadd.f32 %v6311_v49, %v2470_v19  ;;  %v2469_v31 = vld [vmem:[#allocation2 + $0x80] sm:$0xff]  ;;  %2939 = vst.msk [vmem:[#allocation2 + $0x8] sm:$0xff] %vm1363_vm1, %v2919_v54 }
 0x20b   : > { %v2671_v3 = vadd.f32 %v2636_v57, %v2469_v31  ;;  %2938 = vst.msk [vmem:[#allocation2] sm:$0xff] %vm1363_vm1, %v2918_v20  ;;  %v6352_v7 = vpop.f32.mrb[62].mxu0  ;;  %v2725_v57 = vld [vmem:[#allocation2 + $0x48] sm:$0xff] }
 0x20c   : > { %2692 = vst.msk [vmem:[#allocation2 + $0x88] sm:$0xff] %vm1363_vm1, %v2672_v63  ;;  %v2921_v8 = vadd.f32 %v6352_v7, %v2719_v6  ;;  %v6414_v13 = vpop.f32.mrb[62].mxu1  ;;  %v2829_v17 = vpop.f32.mrb[63].mxu0  ;;  %v2728_v6 = vld [vmem:[#allocation2 + $0x60] sm:$0xff] }
 0x20d   : > { %2691 = vst.msk [vmem:[#allocation2 + $0x80] sm:$0xff] %vm1363_vm1, %v2671_v3  ;;  %v2472_v18 = vld [vmem:[#allocation2 + $0x98] sm:$0xff]  ;;  %v2920_v23 = vadd.f32 %v2829_v17, %v2718_v16  ;;  %v3091_v26 = vpop.f32.mrb[63].mxu1 }
 0x20e   : > { %v2674_v27 = vadd.f32 %v6314_v45, %v2472_v18  ;;  %v2471_v28 = vld [vmem:[#allocation2 + $0x90] sm:$0xff]  ;;  %2941 = vst.msk [vmem:[#allocation2 + $0x18] sm:$0xff] %vm1363_vm1, %v2921_v8 }
 0x20f   : > { %v2673_v33 = vadd.f32 %v2646_v24, %v2471_v28  ;;  %2940 = vst.msk [vmem:[#allocation2 + $0x10] sm:$0xff] %vm1363_vm1, %v2920_v23  ;;  %v6355_v37 = vpop.f32.mrb[64].mxu0  ;;  %v2727_v24 = vld [vmem:[#allocation2 + $0x58] sm:$0xff] }
 0x210   : > { %2694 = vst.msk [vmem:[#allocation2 + $0x98] sm:$0xff] %vm1363_vm1, %v2674_v27  ;;  %v2923_v38 = vadd.f32 %v6355_v37, %v2721_v36  ;;  %v6417_v43 = vpop.f32.mrb[64].mxu1  ;;  %v2839_v47 = vpop.f32.mrb[65].mxu0  ;;  %v2730_v36 = vld [vmem:[#allocation2 + $0x70] sm:$0xff] }
 0x211   : > { %2693 = vst.msk [vmem:[#allocation2 + $0x90] sm:$0xff] %vm1363_vm1, %v2673_v33  ;;  %v2979_v48 = vld [vmem:[#allocation2 + $0x8] sm:$0xff]  ;;  %v2922_v55 = vadd.f32 %v2839_v47, %v2720_v46  ;;  %v3101_v59 = vpop.f32.mrb[65].mxu1 }
 0x212   : > { %v3181_v62 = vadd.f32 %v6411_v2, %v2979_v48  ;;  %v2978_v0 = vld [vmem:[#allocation2] sm:$0xff]  ;;  %2943 = vst.msk [vmem:[#allocation2 + $0x28] sm:$0xff] %vm1363_vm1, %v2923_v38 }
 0x213   : > { %v3180_v4 = vadd.f32 %v3081_v61, %v2978_v0  ;;  %2942 = vst.msk [vmem:[#allocation2 + $0x20] sm:$0xff] %vm1363_vm1, %v2922_v55  ;;  %v6358_v9 = vpop.f32.mrb[66].mxu0  ;;  %v2729_v61 = vld [vmem:[#allocation2 + $0x68] sm:$0xff] }
 0x214   : > { %3201 = vst.msk [vmem:[#allocation2 + $0x8] sm:$0xff] %vm1363_vm1, %v3181_v62  ;;  %v2925_v10 = vadd.f32 %v6358_v9, %v2723_v5  ;;  %v6420_v11 = vpop.f32.mrb[66].mxu1  ;;  %v2849_v51 = vpop.f32.mrb[67].mxu0  ;;  %v2732_v5 = vld [vmem:[#allocation2 + $0x80] sm:$0xff] }
 0x215   : > { %3200 = vst.msk [vmem:[#allocation2] sm:$0xff] %vm1363_vm1, %v3180_v4  ;;  %v2981_v42 = vld [vmem:[#allocation2 + $0x18] sm:$0xff]  ;;  %v2924_v49 = vadd.f32 %v2849_v51, %v2722_v12  ;;  %v3111_v58 = vpop.f32.mrb[67].mxu1 }
 0x216   : > { %v3183_v14 = vadd.f32 %v6414_v13, %v2981_v42  ;;  %v2980_v22 = vld [vmem:[#allocation2 + $0x10] sm:$0xff]  ;;  %2945 = vst.msk [vmem:[#allocation2 + $0x38] sm:$0xff] %vm1363_vm1, %v2925_v10 }
 0x217   : > { %v3182_v30 = vadd.f32 %v3091_v26, %v2980_v22  ;;  %2944 = vst.msk [vmem:[#allocation2 + $0x30] sm:$0xff] %vm1363_vm1, %v2924_v49  ;;  %v6361_v44 = vpop.f32.mrb[68].mxu0  ;;  %v2731_v26 = vld [vmem:[#allocation2 + $0x78] sm:$0xff] }
 0x218   : > { %3203 = vst.msk [vmem:[#allocation2 + $0x18] sm:$0xff] %vm1363_vm1, %v3183_v14  ;;  %v2927_v56 = vadd.f32 %v6361_v44, %v2725_v57  ;;  %v6423_v15 = vpop.f32.mrb[68].mxu1  ;;  %v2859_v34 = vpop.f32.mrb[69].mxu0  ;;  %v2734_v57 = vld [vmem:[#allocation2 + $0x90] sm:$0xff] }
 0x219   : > { %3202 = vst.msk [vmem:[#allocation2 + $0x10] sm:$0xff] %vm1363_vm1, %v3182_v30  ;;  %v2983_v41 = vld [vmem:[#allocation2 + $0x28] sm:$0xff]  ;;  %v2926_v45 = vadd.f32 %v2859_v34, %v2724_v29  ;;  %v3121_v52 = vpop.f32.mrb[69].mxu1 }
 0x21a   : > { %v3185_v35 = vadd.f32 %v6417_v43, %v2983_v41  ;;  %v2982_v21 = vld [vmem:[#allocation2 + $0x20] sm:$0xff]  ;;  %2947 = vst.msk [vmem:[#allocation2 + $0x48] sm:$0xff] %vm1363_vm1, %v2927_v56 }
 0x21b   : > { %v3184_v25 = vadd.f32 %v3101_v59, %v2982_v21  ;;  %2946 = vst.msk [vmem:[#allocation2 + $0x40] sm:$0xff] %vm1363_vm1, %v2926_v45  ;;  %v6364_v32 = vpop.f32.mrb[70].mxu0  ;;  %v2733_v59 = vld [vmem:[#allocation2 + $0x88] sm:$0xff] }
 0x21c   : > { %3205 = vst.msk [vmem:[#allocation2 + $0x28] sm:$0xff] %vm1363_vm1, %v3185_v35  ;;  %v2929_v53 = vadd.f32 %v6364_v32, %v2727_v24  ;;  %v6426_v60 = vpop.f32.mrb[70].mxu1  ;;  %v2869_v40 = vpop.f32.mrb[71].mxu0  ;;  %v3240_v32 = vld [vmem:[#allocation2] sm:$0xff] }
 0x21d   : > { %3204 = vst.msk [vmem:[#allocation2 + $0x20] sm:$0xff] %vm1363_vm1, %v3184_v25  ;;  %v2985_v54 = vld [vmem:[#allocation2 + $0x38] sm:$0xff]  ;;  %v2928_v2 = vadd.f32 %v2869_v40, %v2726_v39  ;;  %v3131_v1 = vpop.f32.mrb[71].mxu1 }
 0x21e   : > { %v3187_v50 = vadd.f32 %v6420_v11, %v2985_v54  ;;  %v2984_v19 = vld [vmem:[#allocation2 + $0x30] sm:$0xff]  ;;  %2949 = vst.msk [vmem:[#allocation2 + $0x58] sm:$0xff] %vm1363_vm1, %v2929_v53 }
 0x21f   : > { %v3186_v20 = vadd.f32 %v3111_v58, %v2984_v19  ;;  %2948 = vst.msk [vmem:[#allocation2 + $0x50] sm:$0xff] %vm1363_vm1, %v2928_v2  ;;  %v6367_v63 = vpop.f32.mrb[72].mxu0  ;;  %v2735_v58 = vld [vmem:[#allocation2 + $0x98] sm:$0xff] }
 0x220   : > { %3207 = vst.msk [vmem:[#allocation2 + $0x38] sm:$0xff] %vm1363_vm1, %v3187_v50  ;;  %v2931_v31 = vadd.f32 %v6367_v63, %v2729_v61  ;;  %v6429_v3 = vpop.f32.mrb[72].mxu1  ;;  %v2879_v7 = vpop.f32.mrb[73].mxu0  ;;  %v3243_v61 = vld [vmem:[#allocation2 + $0x18] sm:$0xff] }
 0x221   : > { %3206 = vst.msk [vmem:[#allocation2 + $0x30] sm:$0xff] %vm1363_vm1, %v3186_v20  ;;  %v2987_v8 = vld [vmem:[#allocation2 + $0x48] sm:$0xff]  ;;  %v2930_v13 = vadd.f32 %v2879_v7, %v2728_v6  ;;  %v3141_v16 = vpop.f32.mrb[73].mxu1  ;;  %v3242_v7 = vld [vmem:[#allocation2 + $0x10] sm:$0xff] }
 0x222   : > { %v3189_v17 = vadd.f32 %v6423_v15, %v2987_v8  ;;  %v2986_v18 = vld [vmem:[#allocation2 + $0x40] sm:$0xff]  ;;  %2951 = vst.msk [vmem:[#allocation2 + $0x68] sm:$0xff] %vm1363_vm1, %v2931_v31 }
 0x223   : > { %v3188_v23 = vadd.f32 %v3121_v52, %v2986_v18  ;;  %2950 = vst.msk [vmem:[#allocation2 + $0x60] sm:$0xff] %vm1363_vm1, %v2930_v13  ;;  %v6370_v27 = vpop.f32.mrb[74].mxu0  ;;  %v3241_v52 = vld [vmem:[#allocation2 + $0x8] sm:$0xff] }
 0x224   : > { %3209 = vst.msk [vmem:[#allocation2 + $0x48] sm:$0xff] %vm1363_vm1, %v3189_v17  ;;  %v2933_v28 = vadd.f32 %v6370_v27, %v2731_v26  ;;  %v6432_v33 = vpop.f32.mrb[74].mxu1  ;;  %v2889_v37 = vpop.f32.mrb[75].mxu0 }
 0x225   : > { %3208 = vst.msk [vmem:[#allocation2 + $0x40] sm:$0xff] %vm1363_vm1, %v3188_v23  ;;  %v2989_v38 = vld [vmem:[#allocation2 + $0x58] sm:$0xff]  ;;  %v2932_v43 = vadd.f32 %v2889_v37, %v2730_v36  ;;  %v3151_v46 = vpop.f32.mrb[75].mxu1  ;;  %v3245_v36 = vld [vmem:[#allocation2 + $0x28] sm:$0xff] }
 0x226   : > { %v3191_v47 = vadd.f32 %v6426_v60, %v2989_v38  ;;  %v2988_v48 = vld [vmem:[#allocation2 + $0x50] sm:$0xff]  ;;  %2953 = vst.msk [vmem:[#allocation2 + $0x78] sm:$0xff] %vm1363_vm1, %v2933_v28 }
 0x227   : > { %v3190_v55 = vadd.f32 %v3131_v1, %v2988_v48  ;;  %2952 = vst.msk [vmem:[#allocation2 + $0x70] sm:$0xff] %vm1363_vm1, %v2932_v43  ;;  %v6373_v62 = vpop.f32.mrb[76].mxu0 }
 0x228   : > { %3211 = vst.msk [vmem:[#allocation2 + $0x58] sm:$0xff] %vm1363_vm1, %v3191_v47  ;;  %v2935_v0 = vadd.f32 %v6373_v62, %v2733_v59  ;;  %v6435_v4 = vpop.f32.mrb[76].mxu1  ;;  %v2899_v9 = vpop.f32.mrb[77].mxu0  ;;  %v3244_v47 = vld [vmem:[#allocation2 + $0x20] sm:$0xff] }
 0x229   : > { %3210 = vst.msk [vmem:[#allocation2 + $0x50] sm:$0xff] %vm1363_vm1, %v3190_v55  ;;  %v2991_v10 = vld [vmem:[#allocation2 + $0x68] sm:$0xff]  ;;  %v2934_v11 = vadd.f32 %v2899_v9, %v2732_v5  ;;  %v3161_v12 = vpop.f32.mrb[77].mxu1  ;;  %v3247_v5 = vld [vmem:[#allocation2 + $0x38] sm:$0xff] }
 0x22a   : > { %v3193_v51 = vadd.f32 %v6429_v3, %v2991_v10  ;;  %v2990_v42 = vld [vmem:[#allocation2 + $0x60] sm:$0xff]  ;;  %2955 = vst.msk [vmem:[#allocation2 + $0x88] sm:$0xff] %vm1363_vm1, %v2935_v0 }
 0x22b   : > { %v3192_v49 = vadd.f32 %v3141_v16, %v2990_v42  ;;  %2954 = vst.msk [vmem:[#allocation2 + $0x80] sm:$0xff] %vm1363_vm1, %v2934_v11  ;;  %v6376_v14 = vpop.f32.mrb[78].mxu0 }
 0x22c   : > { %3213 = vst.msk [vmem:[#allocation2 + $0x68] sm:$0xff] %vm1363_vm1, %v3193_v51  ;;  %v2937_v22 = vadd.f32 %v6376_v14, %v2735_v58  ;;  %v6438_v30 = vpop.f32.mrb[78].mxu1  ;;  %v2909_v44 = vpop.f32.mrb[79].mxu0  ;;  %v3246_v51 = vld [vmem:[#allocation2 + $0x30] sm:$0xff] }
 0x22d   : > { %3212 = vst.msk [vmem:[#allocation2 + $0x60] sm:$0xff] %vm1363_vm1, %v3192_v49  ;;  %v2993_v56 = vld [vmem:[#allocation2 + $0x78] sm:$0xff]  ;;  %v2936_v15 = vadd.f32 %v2909_v44, %v2734_v57  ;;  %v3171_v29 = vpop.f32.mrb[79].mxu1  ;;  %v3249_v57 = vld [vmem:[#allocation2 + $0x48] sm:$0xff] }
 0x22e   : > { %v3195_v34 = vadd.f32 %v6432_v33, %v2993_v56  ;;  %v2992_v41 = vld [vmem:[#allocation2 + $0x70] sm:$0xff]  ;;  %2957 = vst.msk [vmem:[#allocation2 + $0x98] sm:$0xff] %vm1363_vm1, %v2937_v22 }
 0x22f   : > { %v3194_v45 = vadd.f32 %v3151_v46, %v2992_v41  ;;  %2956 = vst.msk [vmem:[#allocation2 + $0x90] sm:$0xff] %vm1363_vm1, %v2936_v15  ;;  %v6473_v35 = vpop.f32.mrb[80].mxu0  ;;  %v3251_v21 = vld [vmem:[#allocation2 + $0x58] sm:$0xff] }
 0x230   : > { %3215 = vst.msk [vmem:[#allocation2 + $0x78] sm:$0xff] %vm1363_vm1, %v3195_v34  ;;  %v3443_v25 = vadd.f32 %v6473_v35, %v3241_v52  ;;  %v6488_v24 = vpop.f32.mrb[80].mxu1  ;;  %v3343_v53 = vpop.f32.mrb[81].mxu0  ;;  %v3250_v60 = vld [vmem:[#allocation2 + $0x50] sm:$0xff]  ;;  %v3248_v34 = vld [vmem:[#allocation2 + $0x40] sm:$0xff] }
 0x231   : > { %3214 = vst.msk [vmem:[#allocation2 + $0x70] sm:$0xff] %vm1363_vm1, %v3194_v45  ;;  %v2995_v39 = vld [vmem:[#allocation2 + $0x88] sm:$0xff]  ;;  %v3453_v40 = vadd.f32 %v6488_v24, %v3251_v21  ;;  %v3442_v54 = vadd.f32 %v3343_v53, %v3240_v32  ;;  %v3393_v2 = vpop.f32.mrb[81].mxu1  ;;  %v3615_v24 = vld [vmem:[%s8648_s3] sm:$0xff] (!%p5515_p1)  ;;  %v3617_v53 = vld [vmem:[%s8648_s3 + $0x10] sm:$0xff] (!%p5515_p1) }
 0x232   : > { %v3197_v1 = vadd.f32 %v6435_v4, %v2995_v39  ;;  %v2994_v50 = vld [vmem:[#allocation2 + $0x80] sm:$0xff]  ;;  %3463 = vst.msk [vmem:[#allocation2 + $0x8] sm:$0xff] %vm1363_vm1, %v3443_v25  ;;  %v3452_v19 = vadd.f32 %v3393_v2, %v3250_v60  ;;  %v3616_v32 = vld [vmem:[%s8648_s3 + $0x8] sm:$0xff] (!%p5515_p1)  ;;  %v3507_v60 = vlaneseq (!%p5515_p1) }
 0x233   : > { %v3196_v20 = vadd.f32 %v3161_v12, %v2994_v50  ;;  %3473 = vst.msk [vmem:[#allocation2 + $0x58] sm:$0xff] %vm1363_vm1, %v3453_v40  ;;  %3462 = vst.msk [vmem:[#allocation2] sm:$0xff] %vm1363_vm1, %v3442_v54  ;;  %v6476_v63 = vpop.f32.mrb[82].mxu0  ;;  %v3253_v31 = vld [vmem:[#allocation2 + $0x68] sm:$0xff]  ;;  %v6885_v39 = vpack.c.bf16 (!%p5515_p1), %v3616_v32, %v3615_v24  ;;  %v3618_v40 = vld [vmem:[%s8648_s3 + $0x18] sm:$0xff] (!%p5515_p1) }
 0x234   : > { %3217 = vst.msk [vmem:[#allocation2 + $0x88] sm:$0xff] %vm1363_vm1, %v3197_v1  ;;  %3472 = vst.msk [vmem:[#allocation2 + $0x50] sm:$0xff] %vm1363_vm1, %v3452_v19  ;;  %v3445_v3 = vadd.f32 %v6476_v63, %v3243_v61  ;;  %v6491_v6 = vpop.f32.mrb[82].mxu1  ;;  %v3353_v8 = vpop.f32.mrb[83].mxu0  ;;  %v3252_v13 = vld [vmem:[#allocation2 + $0x60] sm:$0xff]  ;;  %v6889_v54 = vpack.c.bf16 (!%p5515_p1), %v3618_v40, %v3617_v53  ;;  %v3620_v1 = vld [vmem:[%s8648_s3 + $0x28] sm:$0xff] (!%p5515_p1) }
 0x235   : > { %3216 = vst.msk [vmem:[#allocation2 + $0x80] sm:$0xff] %vm1363_vm1, %v3196_v20  ;;  %v2997_v16 = vld [vmem:[#allocation2 + $0x98] sm:$0xff]  ;;  %v3455_v17 = vadd.f32 %v6491_v6, %v3253_v31  ;;  %v3444_v18 = vadd.f32 %v3353_v8, %v3242_v7  ;;  %v3403_v23 = vpop.f32.mrb[83].mxu1  ;;  %v3619_v2 = vld [vmem:[%s8648_s3 + $0x20] sm:$0xff] (!%p5515_p1)  ;;  %v8351_v50 = vshrl.u32 (!%p5515_p1), %v3507_v60, 7  ;;  %6886 = vmatprep.subr.bf16.mxu0 (!%p5515_p1), %v6885_v39  ;;  %6921 = vmatprep.subr.bf16.mxu1 (!%p5515_p1), %v6885_v39  ;;  %v3621_v20 = vld [vmem:[%s8648_s3 + $0x30] sm:$0xff] (!%p5515_p1) }
 0x236   : > { %v3199_v26 = vadd.f32 %v6438_v30, %v2997_v16  ;;  %v2996_v27 = vld [vmem:[#allocation2 + $0x90] sm:$0xff]  ;;  %3465 = vst.msk [vmem:[#allocation2 + $0x18] sm:$0xff] %vm1363_vm1, %v3445_v3  ;;  %v3454_v28 = vadd.f32 %v3403_v23, %v3252_v13  ;;  %v3486_v19 = vld [vmem:[%s8647_s2] sm:$0x3] (!%p5515_p1)  ;;  %6888 = vmatpush3.bf16.msra.mxu0 (!%p5515_p1), %v6885_v39  ;;  %6925 = vmatpush3.bf16.msra.mxu1 (!%p5515_p1), %v6885_v39  ;;  %v3622_v61 = vld [vmem:[%s8648_s3 + $0x38] sm:$0xff] (!%p5515_p1) }
 0x237   : > { %v3198_v33 = vadd.f32 %v3171_v29, %v2996_v27  ;;  %3475 = vst.msk [vmem:[#allocation2 + $0x68] sm:$0xff] %vm1363_vm1, %v3455_v17  ;;  %3464 = vst.msk [vmem:[#allocation2 + $0x10] sm:$0xff] %vm1363_vm1, %v3444_v18  ;;  %v6479_v37 = vpop.f32.mrb[84].mxu0  ;;  %v3255_v38 = vld [vmem:[#allocation2 + $0x78] sm:$0xff]  ;;  %v3509_v63 = vsub.s32 (!%p5515_p1), 0, %v8351_v50  ;;  %v3533_v31 = vsub.s32 (!%p5515_p1), 1, %v8351_v50  ;;  %6890 = vmatprep.subr.bf16.mxu0 (!%p5515_p1), %v6889_v54  ;;  %6922 = vmatprep.subr.bf16.mxu1 (!%p5515_p1), %v6889_v54 }
 0x238   : > { %3219 = vst.msk [vmem:[#allocation2 + $0x98] sm:$0xff] %vm1363_vm1, %v3199_v26  ;;  %3474 = vst.msk [vmem:[#allocation2 + $0x60] sm:$0xff] %vm1363_vm1, %v3454_v28  ;;  %v3447_v43 = vadd.f32 %v6479_v37, %v3245_v36  ;;  %v6494_v46 = vpop.f32.mrb[84].mxu1  ;;  %v3363_v48 = vpop.f32.mrb[85].mxu0  ;;  %v3254_v55 = vld [vmem:[#allocation2 + $0x70] sm:$0xff]  ;;  %v6893_v3 = vpack.c.bf16 (!%p5515_p1), %v3620_v1, %v3619_v2  ;;  %v6897_v26 = vpack.c.bf16 (!%p5515_p1), %v3622_v61, %v3621_v20 }
 0x239   : > { %3218 = vst.msk [vmem:[#allocation2 + $0x90] sm:$0xff] %vm1363_vm1, %v3198_v33  ;;  %v3457_v59 = vadd.f32 %v6494_v46, %v3255_v38  ;;  %v3446_v62 = vadd.f32 %v3363_v48, %v3244_v47  ;;  %v3413_v0 = vpop.f32.mrb[85].mxu1  ;;  %v3488_v8 = vld [vmem:[#allocation2 + $0x8] sm:$0xff] (!%p5515_p1)  ;;  %v8364_v13 = vrot.slane (!%p5515_p1), %v3486_v19, %v3509_v63  ;;  %v8366_v16 = vrot.slane (!%p5515_p1), %v3486_v19, %v3533_v31 }
 0x23a   : > { %3467 = vst.msk [vmem:[#allocation2 + $0x28] sm:$0xff] %vm1363_vm1, %v3447_v43  ;;  %v3456_v4 = vadd.f32 %v3413_v0, %v3254_v55  ;;  %v3487_v6 = vld [vmem:[#allocation2] sm:$0xff] (!%p5515_p1)  ;;  %v3498_v17 = vld [vmem:[#allocation2 + $0x58] sm:$0xff] (!%p5515_p1)  ;;  %6892 = vmatpush3.bf16.msra.mxu0 (!%p5515_p1), %v6889_v54  ;;  %6926 = vmatpush3.bf16.msra.mxu1 (!%p5515_p1), %v6889_v54 }
 0x23b   : > { %3477 = vst.msk [vmem:[#allocation2 + $0x78] sm:$0xff] %vm1363_vm1, %v3457_v59  ;;  %3466 = vst.msk [vmem:[#allocation2 + $0x20] sm:$0xff] %vm1363_vm1, %v3446_v62  ;;  %v6482_v9 = vpop.f32.mrb[86].mxu0  ;;  %v3257_v10 = vld [vmem:[#allocation2 + $0x88] sm:$0xff]  ;;  %v3497_v7 = vld [vmem:[#allocation2 + $0x50] sm:$0xff] (!%p5515_p1)  ;;  %v3511_v28 = vmul.f32 (!%p5515_p1), %v8364_v13, %v3487_v6  ;;  %v3512_v36 = vmul.f32 (!%p5515_p1), %v8364_v13, %v3488_v8  ;;  %6894 = vmatprep.subr.bf16.mxu0 (!%p5515_p1), %v6893_v3  ;;  %6923 = vmatprep.subr.bf16.mxu1 (!%p5515_p1), %v6893_v3 }
 0x23c   : > { %3476 = vst.msk [vmem:[#allocation2 + $0x70] sm:$0xff] %vm1363_vm1, %v3456_v4  ;;  %v3449_v11 = vadd.f32 %v6482_v9, %v3247_v5  ;;  %v6497_v12 = vpop.f32.mrb[86].mxu1  ;;  %v3373_v42 = vpop.f32.mrb[87].mxu0  ;;  %v3256_v49 = vld [vmem:[#allocation2 + $0x80] sm:$0xff]  ;;  %v3521_v33 = vmul.f32 (!%p5515_p1), %v8364_v13, %v3497_v7  ;;  %v3522_v38 = vmul.f32 (!%p5515_p1), %v8364_v13, %v3498_v17 }
 0x23d   : > { %v3459_v58 = vadd.f32 %v6497_v12, %v3257_v10  ;;  %v3448_v14 = vadd.f32 %v3373_v42, %v3246_v51  ;;  %v3423_v22 = vpop.f32.mrb[87].mxu1  ;;  %v3490_v27 = vld [vmem:[#allocation2 + $0x18] sm:$0xff] (!%p5515_p1)  ;;  %v3535_v47 = vadd.f32 (!%p5515_p1), %v8366_v16, %v3511_v28  ;;  %v3536_v55 = vadd.f32 (!%p5515_p1), %v8366_v16, %v3512_v36 }
 0x23e   : > { %3469 = vst.msk [vmem:[#allocation2 + $0x38] sm:$0xff] %vm1363_vm1, %v3449_v11  ;;  %v3458_v30 = vadd.f32 %v3423_v22, %v3256_v49  ;;  %3485 = sbr.rel (%p5515_p1) target bundleno = 1698 (0x6a2), region = 132  ;;  %v3489_v18 = vld [vmem:[#allocation2 + $0x10] sm:$0xff] (!%p5515_p1)  ;;  %v3500_v37 = vld [vmem:[#allocation2 + $0x68] sm:$0xff] (!%p5515_p1)  ;;  %v3545_v48 = vadd.f32 (!%p5515_p1), %v8366_v16, %v3521_v33  ;;  %v3514_v59 = vmul.f32 (!%p5515_p1), %v8364_v13, %v3490_v27  ;;  %v3546_v62 = vadd.f32 (!%p5515_p1), %v8366_v16, %v3522_v38 }
 0x23f   : > { %3479 = vst.msk [vmem:[#allocation2 + $0x88] sm:$0xff] %vm1363_vm1, %v3459_v58  ;;  %3468 = vst.msk [vmem:[#allocation2 + $0x30] sm:$0xff] %vm1363_vm1, %v3448_v14  ;;  %v6485_v44 = vpop.f32.mrb[88].mxu0  ;;  %v3259_v56 = vld [vmem:[#allocation2 + $0x98] sm:$0xff]  ;;  %v3499_v23 = vld [vmem:[#allocation2 + $0x60] sm:$0xff] (!%p5515_p1)  ;;  %v3513_v43 = vmul.f32 (!%p5515_p1), %v8364_v13, %v3489_v18  ;;  %v3524_v5 = vmul.f32 (!%p5515_p1), %v8364_v13, %v3500_v37  ;;  %6896 = vmatpush3.bf16.msra.mxu0 (!%p5515_p1), %v6893_v3  ;;  %6927 = vmatpush3.bf16.msra.mxu1 (!%p5515_p1), %v6893_v3  ;;  %v3555_v12 = vmax.f32 (!%p5515_p1), %v3535_v47, 0.0 }
 0x240   : > { %3478 = vst.msk [vmem:[#allocation2 + $0x80] sm:$0xff] %vm1363_vm1, %v3458_v30  ;;  %v3451_v15 = vadd.f32 %v6485_v44, %v3249_v57  ;;  %v6500_v29 = vpop.f32.mrb[88].mxu1  ;;  %v3383_v41 = vpop.f32.mrb[89].mxu0  ;;  %v3258_v45 = vld [vmem:[#allocation2 + $0x90] sm:$0xff]  ;;  %v3523_v46 = vmul.f32 (!%p5515_p1), %v8364_v13, %v3499_v23  ;;  %v3565_v51 = vmax.f32 (!%p5515_p1), %v3545_v48, 0.0  ;;  %v3556_v42 = vmax.f32 (!%p5515_p1), %v3536_v55, 0.0  ;;  %6898 = vmatprep.subr.bf16.mxu0 (!%p5515_p1), %v6897_v26  ;;  %6924 = vmatprep.subr.bf16.mxu1 (!%p5515_p1), %v6897_v26 }
 0x241   : > { %v3461_v52 = vadd.f32 %v6500_v29, %v3259_v56  ;;  %v3450_v35 = vadd.f32 %v3383_v41, %v3248_v34  ;;  %v3433_v21 = vpop.f32.mrb[89].mxu1  ;;  %v3537_v0 = vadd.f32 (!%p5515_p1), %v8366_v16, %v3513_v43  ;;  %v3492_v11 = vld [vmem:[#allocation2 + $0x28] sm:$0xff] (!%p5515_p1)  ;;  %v3538_v49 = vadd.f32 (!%p5515_p1), %v8366_v16, %v3514_v59  ;;  %3575 = vst.msk [vmem:[#allocation2] sm:$0xff] (!%p5515_p1), %vm1363_vm1, %v3555_v12 }
 0x242   : > { %3471 = vst.msk [vmem:[#allocation2 + $0x48] sm:$0xff] %vm1363_vm1, %v3451_v15  ;;  %v3460_v25 = vadd.f32 %v3433_v21, %v3258_v45  ;;  %v3547_v4 = vadd.f32 (!%p5515_p1), %v8366_v16, %v3523_v46  ;;  %v3491_v9 = vld [vmem:[#allocation2 + $0x20] sm:$0xff] (!%p5515_p1)  ;;  %v3502_v58 = vld [vmem:[#allocation2 + $0x78] sm:$0xff] (!%p5515_p1)  ;;  %v3566_v30 = vmax.f32 (!%p5515_p1), %v3546_v62, 0.0  ;;  %v3548_v56 = vadd.f32 (!%p5515_p1), %v8366_v16, %v3524_v5  ;;  %3585 = vst.msk [vmem:[#allocation2 + $0x50] sm:$0xff] (!%p5515_p1), %vm1363_vm1, %v3565_v51 }
 0x243   : > { %3481 = vst.msk [vmem:[#allocation2 + $0x98] sm:$0xff] %vm1363_vm1, %v3461_v52  ;;  %3470 = vst.msk [vmem:[#allocation2 + $0x40] sm:$0xff] %vm1363_vm1, %v3450_v35  ;;  %v3501_v10 = vld [vmem:[#allocation2 + $0x70] sm:$0xff] (!%p5515_p1)  ;;  %v3557_v57 = vmax.f32 (!%p5515_p1), %v3537_v0, 0.0  ;;  %v3558_v15 = vmax.f32 (!%p5515_p1), %v3538_v49, 0.0  ;;  %v3515_v29 = vmul.f32 (!%p5515_p1), %v8364_v13, %v3491_v9  ;;  %v3516_v41 = vmul.f32 (!%p5515_p1), %v8364_v13, %v3492_v11  ;;  %6900 = vmatpush3.bf16.msra.mxu0 (!%p5515_p1), %v6897_v26 }
 0x244   : > { %3480 = vst.msk [vmem:[#allocation2 + $0x90] sm:$0xff] %vm1363_vm1, %v3460_v25  ;;  %v3567_v44 = vmax.f32 (!%p5515_p1), %v3547_v4, 0.0  ;;  %3576 = vst.msk [vmem:[#allocation2 + $0x8] sm:$0xff] (!%p5515_p1), %vm1363_vm1, %v3556_v42  ;;  %v3525_v34 = vmul.f32 (!%p5515_p1), %v8364_v13, %v3501_v10  ;;  %v3568_v52 = vmax.f32 (!%p5515_p1), %v3548_v56, 0.0  ;;  %v3526_v35 = vmul.f32 (!%p5515_p1), %v8364_v13, %v3502_v58  ;;  %6928 = vmatpush3.bf16.msra.mxu1 (!%p5515_p1), %v6897_v26 }
 0x245   : > { %v3494_v45 = vld [vmem:[#allocation2 + $0x38] sm:$0xff]  ;;  %3586 = vst.msk [vmem:[#allocation2 + $0x58] sm:$0xff] %vm1363_vm1, %v3566_v30  ;;  %3577 = vst.msk [vmem:[#allocation2 + $0x10] sm:$0xff] %vm1363_vm1, %v3557_v57  ;;  %v3539_v32 = vadd.f32 %v8366_v16, %v3515_v29  ;;  %v3540_v60 = vadd.f32 %v8366_v16, %v3516_v41  ;;  %v8451_v29 = vld [vmem:[%s8651_s6] sm:$0xff] }
 0x246   : > { %v3493_v14 = vld [vmem:[#allocation2 + $0x30] sm:$0xff]  ;;  %3587 = vst.msk [vmem:[#allocation2 + $0x60] sm:$0xff] %vm1363_vm1, %v3567_v44  ;;  %v3504_v24 = vld [vmem:[#allocation2 + $0x88] sm:$0xff]  ;;  %3578 = vst.msk [vmem:[#allocation2 + $0x18] sm:$0xff] %vm1363_vm1, %v3558_v15  ;;  %v3549_v53 = vadd.f32 %v8366_v16, %v3525_v34  ;;  %v3550_v39 = vadd.f32 %v8366_v16, %v3526_v35  ;;  %v3518_v2 = vmul.f32 %v8364_v13, %v3494_v45 }
 0x247   : > { %v3503_v22 = vld [vmem:[#allocation2 + $0x80] sm:$0xff]  ;;  %v3517_v21 = vmul.f32 %v8364_v13, %v3493_v14  ;;  %3588 = vst.msk [vmem:[#allocation2 + $0x68] sm:$0xff] %vm1363_vm1, %v3568_v52  ;;  %v3559_v61 = vmax.f32 %v3539_v32, 0.0  ;;  %v3560_v31 = vmax.f32 %v3540_v60, 0.0  ;;  %v3528_v3 = vmul.f32 %v8364_v13, %v3504_v24  ;;  %v8456_v34 = vld [vmem:[%s8651_s6 + $0x8] sm:$0xff] }
 0x248   : > { %v3527_v25 = vmul.f32 %v8364_v13, %v3503_v22  ;;  %v3569_v63 = vmax.f32 %v3549_v53, 0.0  ;;  %v3570_v7 = vmax.f32 %v3550_v39, 0.0  ;;  %v3542_v18 = vadd.f32 %v8366_v16, %v3518_v2  ;;  %v3595_v33 = vld [vmem:[#allocation2] sm:$0xff]  ;;  %v8461_v41 = vld [vmem:[%s8651_s6 + $0x10] sm:$0xf] }
 0x249   : > { %v3541_v40 = vadd.f32 %v8366_v16, %v3517_v21  ;;  %v3496_v20 = vld [vmem:[#allocation2 + $0x48] sm:$0xff]  ;;  %3579 = vst.msk [vmem:[#allocation2 + $0x20] sm:$0xff] %vm1363_vm1, %v3559_v61  ;;  %3580 = vst.msk [vmem:[#allocation2 + $0x28] sm:$0xff] %vm1363_vm1, %v3560_v31  ;;  %v3552_v23 = vadd.f32 %v8366_v16, %v3528_v3  ;;  %v3605_v36 = vld [vmem:[#allocation2 + $0x50] sm:$0xff]  ;;  %6517 = vmatprep.mubr.msk.f32.mxu0 %vm1363_vm1, %v3595_v33 }
 0x24a   : > { %v3551_v54 = vadd.f32 %v8366_v16, %v3527_v25  ;;  %v3495_v1 = vld [vmem:[#allocation2 + $0x40] sm:$0xff]  ;;  %v3506_v6 = vld [vmem:[#allocation2 + $0x98] sm:$0xff]  ;;  %3589 = vst.msk [vmem:[#allocation2 + $0x70] sm:$0xff] %vm1363_vm1, %v3569_v63  ;;  %v3520_v28 = vmul.f32 %v8364_v13, %v3496_v20  ;;  %3590 = vst.msk [vmem:[#allocation2 + $0x78] sm:$0xff] %vm1363_vm1, %v3570_v7  ;;  %v3562_v38 = vmax.f32 %v3542_v18, 0.0  ;;  %6532 = vmatprep.mubr.msk.f32.mxu1 %vm1363_vm1, %v3605_v36 }
 0x24b   : > { %v3505_v19 = vld [vmem:[#allocation2 + $0x90] sm:$0xff]  ;;  %v3561_v8 = vmax.f32 %v3541_v40, 0.0  ;;  %v3519_v26 = vmul.f32 %v8364_v13, %v3495_v1  ;;  %v3596_v37 = vld [vmem:[#allocation2 + $0x8] sm:$0xff]  ;;  %v3530_v43 = vmul.f32 %v8364_v13, %v3506_v6  ;;  %v3572_v55 = vmax.f32 %v3552_v23, 0.0  ;;  %v5516_v45 = vld [vmem:[%s8649_s4] ss:$0 sm:$0xff] }
 0x24c   : > { %v3571_v17 = vmax.f32 %v3551_v54, 0.0  ;;  %v3529_v27 = vmul.f32 %v8364_v13, %v3505_v19  ;;  %v3606_v46 = vld [vmem:[#allocation2 + $0x58] sm:$0xff]  ;;  %v3597_v47 = vld [vmem:[#allocation2 + $0x10] sm:$0xff]  ;;  %v3544_v0 = vadd.f32 %v8366_v16, %v3520_v28  ;;  %6518 = vmatmul.mubr.msk.f32.vlgmr.msra.gmra.mrb[0].mxu0 %vm1363_vm1, %v3596_v37  ;;  %3582 = vst.msk [vmem:[#allocation2 + $0x38] sm:$0xff] %vm1363_vm1, %v3562_v38 }
 0x24d   : > { %3581 = vst.msk [vmem:[#allocation2 + $0x30] sm:$0xff] %vm1363_vm1, %v3561_v8  ;;  %v3607_v48 = vld [vmem:[#allocation2 + $0x60] sm:$0xff]  ;;  %v3543_v59 = vadd.f32 %v8366_v16, %v3519_v26  ;;  %6533 = vmatmul.mubr.msk.f32.vlgmr.msra.gmra.mrb[0].mxu1 %vm1363_vm1, %v3606_v46  ;;  %v3554_v13 = vadd.f32 %v8366_v16, %v3530_v43  ;;  %6520 = vmatprep.mubr.msk.f32.mxu0 %vm1363_vm1, %v3597_v47  ;;  %v3598_v4 = vld [vmem:[#allocation2 + $0x18] sm:$0xff]  ;;  %3592 = vst.msk [vmem:[#allocation2 + $0x88] sm:$0xff] %vm1363_vm1, %v3572_v55 }
 0x24e   : > { %3591 = vst.msk [vmem:[#allocation2 + $0x80] sm:$0xff] %vm1363_vm1, %v3571_v17  ;;  %v3553_v62 = vadd.f32 %v8366_v16, %v3529_v27  ;;  %6535 = vmatprep.mubr.msk.f32.mxu1 %vm1363_vm1, %v3607_v48  ;;  %v3608_v5 = vld [vmem:[#allocation2 + $0x68] sm:$0xff]  ;;  %v3564_v11 = vmax.f32 %v3544_v0, 0.0 }
 0x24f   : > { %v3563_v9 = vmax.f32 %v3543_v59, 0.0  ;;  %v3574_v12 = vmax.f32 %v3554_v13, 0.0 }
 0x250   : > { %v3573_v10 = vmax.f32 %v3553_v62, 0.0  ;;  %3584 = vst.msk [vmem:[#allocation2 + $0x48] sm:$0xff] %vm1363_vm1, %v3564_v11  ;;  %6521 = vmatmul.mubr.msk.f32.gmra.mrb[2].mxu0 %vm1363_vm1, %v3598_v4  ;;  %v3599_v16 = vld [vmem:[#allocation2 + $0x20] sm:$0xff]  ;;  %v3600_v42 = vld [vmem:[#allocation2 + $0x28] sm:$0xff] }
 0x251   : > { %3583 = vst.msk [vmem:[#allocation2 + $0x40] sm:$0xff] %vm1363_vm1, %v3563_v9  ;;  %6536 = vmatmul.mubr.msk.f32.gmra.mrb[2].mxu1 %vm1363_vm1, %v3608_v5  ;;  %v3609_v51 = vld [vmem:[#allocation2 + $0x70] sm:$0xff]  ;;  %3594 = vst.msk [vmem:[#allocation2 + $0x98] sm:$0xff] %vm1363_vm1, %v3574_v12  ;;  %6523 = vmatprep.mubr.msk.f32.mxu0 %vm1363_vm1, %v3599_v16  ;;  %v3610_v49 = vld [vmem:[#allocation2 + $0x78] sm:$0xff] }
 0x252   : > { %3593 = vst.msk [vmem:[#allocation2 + $0x90] sm:$0xff] %vm1363_vm1, %v3573_v10  ;;  %6538 = vmatprep.mubr.msk.f32.mxu1 %vm1363_vm1, %v3609_v51 }
 0x253   : > { %v3602_v22 = vld [vmem:[#allocation2 + $0x38] sm:$0xff] }
 0x254   : > { %v3601_v58 = vld [vmem:[#allocation2 + $0x30] sm:$0xff]  ;;  %6524 = vmatmul.mubr.msk.f32.gmra.mrb[4].mxu0 %vm1363_vm1, %v3600_v42  ;;  %v3612_v30 = vld [vmem:[#allocation2 + $0x88] sm:$0xff] }
 0x255   : > { %v3611_v14 = vld [vmem:[#allocation2 + $0x80] sm:$0xff]  ;;  %6539 = vmatmul.mubr.msk.f32.gmra.mrb[4].mxu1 %vm1363_vm1, %v3610_v49  ;;  %6526 = vmatprep.mubr.msk.f32.mxu0 %vm1363_vm1, %v3601_v58 }
 0x256   : > { %6541 = vmatprep.mubr.msk.f32.mxu1 %vm1363_vm1, %v3611_v14 }
 0x257   : > { %v3604_v56 = vld [vmem:[#allocation2 + $0x48] sm:$0xff] }
 0x258   : > { %v3603_v57 = vld [vmem:[#allocation2 + $0x40] sm:$0xff]  ;;  %6527 = vmatmul.mubr.msk.f32.gmra.mrb[6].mxu0 %vm1363_vm1, %v3602_v22  ;;  %v3614_v15 = vld [vmem:[#allocation2 + $0x98] sm:$0xff] }
 0x259   : > { %v3613_v44 = vld [vmem:[#allocation2 + $0x90] sm:$0xff]  ;;  %6542 = vmatmul.mubr.msk.f32.gmra.mrb[6].mxu1 %vm1363_vm1, %v3612_v30  ;;  %6529 = vmatprep.mubr.msk.f32.mxu0 %vm1363_vm1, %v3603_v57 }
 0x25a   : > { %6544 = vmatprep.mubr.msk.f32.mxu1 %vm1363_vm1, %v3613_v44 }
 0x25c   : > { %6530 = vmatmul.mubr.msk.f32.gmra.mrb[8].mxu0 %vm1363_vm1, %v3604_v56 }
 0x25d   : > { %6545 = vmatmul.mubr.msk.f32.gmra.mrb[8].mxu1 %vm1363_vm1, %v3614_v15 }
 0x31f   : > { %v6519_v52 = vpop.f32.mrb[0].mxu0 }
 0x320   : > { %v6534_v35 = vpop.f32.mrb[0].mxu1  ;;  %v8466_v21 = vadd.f32 %v6519_v52, %v5516_v45  ;;  %v3756_v24 = vpop.f32.mrb[1].mxu0 }
 0x321   : > { %v8468_v25 = vadd.f32 %v6534_v35, %v5516_v45  ;;  %v3806_v32 = vpop.f32.mrb[1].mxu1  ;;  %v8470_v53 = vadd.f32 %v5516_v45, %v3756_v24 }
 0x322   : > { %v8472_v60 = vadd.f32 %v5516_v45, %v3806_v32 }
 0x323   : > { %v6522_v39 = vpop.f32.mrb[2].mxu0 }
 0x324   : > { %v6537_v40 = vpop.f32.mrb[2].mxu1  ;;  %v8474_v54 = vadd.f32 %v6522_v39, %v5516_v45  ;;  %v3766_v1 = vpop.f32.mrb[3].mxu0 }
 0x325   : > { %v8476_v2 = vadd.f32 %v6537_v40, %v5516_v45  ;;  %v3816_v19 = vpop.f32.mrb[3].mxu1  ;;  %v8478_v20 = vadd.f32 %v5516_v45, %v3766_v1 }
 0x326   : > { %v8480_v61 = vadd.f32 %v5516_v45, %v3816_v19 }
 0x327   : > { %v6525_v63 = vpop.f32.mrb[4].mxu0 }
 0x328   : > { %v6540_v31 = vpop.f32.mrb[4].mxu1  ;;  %v8482_v3 = vadd.f32 %v6525_v63, %v5516_v45  ;;  %v3776_v7 = vpop.f32.mrb[5].mxu0 }
 0x329   : > { %v8484_v6 = vadd.f32 %v6540_v31, %v5516_v45  ;;  %v3826_v8 = vpop.f32.mrb[5].mxu1  ;;  %v8486_v17 = vadd.f32 %v5516_v45, %v3776_v7 }
 0x32a   : > { %v8488_v18 = vadd.f32 %v5516_v45, %v3826_v8 }
 0x32b   : > { %v6528_v23 = vpop.f32.mrb[6].mxu0 }
 0x32c   : > { %v6543_v26 = vpop.f32.mrb[6].mxu1  ;;  %v8490_v27 = vadd.f32 %v6528_v23, %v5516_v45  ;;  %v3786_v33 = vpop.f32.mrb[7].mxu0 }
 0x32d   : > { %v8492_v28 = vadd.f32 %v6543_v26, %v5516_v45  ;;  %v3836_v36 = vpop.f32.mrb[7].mxu1  ;;  %v8494_v37 = vadd.f32 %v5516_v45, %v3786_v33 }
 0x32e   : > { %v8496_v38 = vadd.f32 %v5516_v45, %v3836_v36 }
 0x32f   : > { %v6531_v43 = vpop.f32.mrb[8].mxu0 }
 0x330   : > { %v6546_v46 = vpop.f32.mrb[8].mxu1  ;;  %v8498_v47 = vadd.f32 %v6531_v43, %v5516_v45  ;;  %v3796_v55 = vpop.f32.mrb[9].mxu0 }
 0x331   : > { %v8500_v48 = vadd.f32 %v6546_v46, %v5516_v45  ;;  %v3846_v59 = vpop.f32.mrb[9].mxu1  ;;  %v8502_v62 = vadd.f32 %v5516_v45, %v3796_v55 }
 0x332   : > { %v8504_v0 = vadd.f32 %v5516_v45, %v3846_v59 }
 0x333 LB: >> { %3899 = vxpose.xlu1.b32.start [1/2] (short) (narrow) %v8478_v20, 8  ;;  %3867 = vxpose.xlu0.b32.start [1/2] (short) (narrow) %v8470_v53, 8  ;;  %v7106_v5 = vmov 1983009808   ;;  %v7107_v14 = vmov 1934713408   ;;  %s7103_s10 = sphi %s8506_s10, %s3863_s10  }
 0x334   : >> { %v4190_v9 = vunpack.c.l.s4 %v7106_v5  ;;  %v4254_v22 = vunpack.c.l.s4 %v7107_v14  ;;  %s5537_s11 = sshll.u32 %s7103_s10, 3  ;;  %vm4611_vm2 = vcmask 80896   ;;  %vm5016_vm3 = vcmask 130048   ;;  %s3863_s10 = sadd.s32 1, %s7103_s10  }
 0x335   : >> { %s3865_s24 = scalar_lea.vmem %s8650_s5, %s5537_s11  ;;  %vm6903_vm4 = vmpackc.low %vm5016_vm3, %vm5016_vm3  ;;  %vm7110_vm5 = vmmov 0   ;;  %s5147_s26 = scalar_lea.vmem %s7621_s18, %s5537_s11  ;;  %vm5148_vm6 = vcmask 162816  }
 0x336   : >> { %v4191_v12 = vunpack.c.0.s8 %v4190_v9  ;;  %v4255_v15 = vunpack.c.0.s8 %v4254_v22  ;;  %p3860_p2 = scmp.ge.s32.totalorder %s3863_s10, 3  }
 0x337   : >> { %3900 = vxpose.xlu1.b32.end [2/2] (short) (narrow) %v8474_v54, 8  ;;  %3868 = vxpose.xlu0.b32.end [2/2] (short) (narrow) %v8466_v21, 8 }
 0x338   : >> { %v4194_v42 = vsub.s32 %v4191_v12, %v8351_v50  ;;  %v8533_v39 = vsub.s32 %v4255_v15, %v8351_v50 }
 0x33b   : >> { %3963 = vxpose.xlu1.b32.start [1/2] (short) (narrow) %v8494_v37, 8  ;;  %3931 = vxpose.xlu0.b32.start [1/2] (short) (narrow) %v8486_v17, 8 }
 0x33f   : >> { %3964 = vxpose.xlu1.b32.end [2/2] (short) (narrow) %v8490_v27, 8  ;;  %3932 = vxpose.xlu0.b32.end [2/2] (short) (narrow) %v8482_v3, 8 }
 0x343   : >> { %4027 = vxpose.xlu1.b32.start [1/2] (short) (narrow) %v8472_v60, 8  ;;  %3995 = vxpose.xlu0.b32.start [1/2] (short) (narrow) %v8502_v62, 8 }
 0x347   : >> { %4028 = vxpose.xlu1.b32.end [2/2] (short) (narrow) %v8468_v25, 8  ;;  %3996 = vxpose.xlu0.b32.end [2/2] (short) (narrow) %v8498_v47, 8 }
 0x34b   : >> { %4091 = vxpose.xlu1.b32.start [1/2] (short) (narrow) %v8488_v18, 8  ;;  %4059 = vxpose.xlu0.b32.start [1/2] (short) (narrow) %v8480_v61, 8 }
 0x34f   : >> { %4092 = vxpose.xlu1.b32.end [2/2] (short) (narrow) %v8484_v6, 8  ;;  %4060 = vxpose.xlu0.b32.end [2/2] (short) (narrow) %v8476_v2, 8 }
 0x353   : >> { %4155 = vxpose.xlu1.b32.start [1/2] (short) (narrow) %v8504_v0, 8  ;;  %4123 = vxpose.xlu0.b32.start [1/2] (short) (narrow) %v8496_v38, 8 }
 0x357   : >> { %4156 = vxpose.xlu1.b32.end [2/2] (short) (narrow) %v8500_v48, 8  ;;  %4124 = vxpose.xlu0.b32.end [2/2] (short) (narrow) %v8492_v28, 8 }
 0x3b3   : >> { %v3915_v13 = vpop.trf.xlu1  ;;  %v3883_v4 = vpop.trf.xlu0 }
 0x3bb   : >> { %v3979_v10 = vpop.trf.xlu1  ;;  %v3947_v11 = vpop.trf.xlu0 }
 0x3bc   : >> { %v4203_v49 = vcombine.low %v3915_v13, %v3979_v10  ;;  %v4187_v58 = vcombine.low %v3883_v4, %v3947_v11  ;;  %v4204_v55 = vcombine.high %v3915_v13, %v3979_v10  ;;  %v4188_v59 = vcombine.high %v3883_v4, %v3947_v11 }
 0x3be   : >> { %v4211_v30 = vrot.slane %v4203_v49, %v4194_v42  ;;  %v4195_v57 = vrot.slane %v4187_v58, %v4194_v42  ;;  %v3866_v49 = vld [vmem:[%s3865_s24] sm:$0xff]  ;;  %v7108_v58 = vmov 0.0   ;;  %v4218_v14 = vrot.slane %v4204_v55, %v4194_v42 }
 0x3bf   : >> { %6547 = vmatprep.subr.msk.mxu0 %vm4611_vm2, %v3866_v49  ;;  %v4202_v22 = vrot.slane %v4188_v59, %v4194_v42  ;;  %6579 = vmatprep.mubr.msk.f32.mxu1 %vm7110_vm5, %v7108_v58 }
 0x3c0   : >> { %v4251_v32 = vcombine.low %v4195_v57, %v4211_v30  ;;  %v4252_v5 = vcombine.high %v4195_v57, %v4211_v30  ;;  %6548 = vmatpush3.xpose.msk.msra.mxu0 %vm4611_vm2, %v3866_v49 }
 0x3c2   : >> { %v4259_v31 = vrot.slane %v4251_v32, %v8533_v39  ;;  %v4266_v30 = vrot.slane %v4252_v5, %v8533_v39 }
 0x3c3   : >> { %v4043_v16 = vpop.trf.xlu1  ;;  %v4011_v51 = vpop.trf.xlu0 }
 0x3cb   : >> { %v4107_v44 = vpop.trf.xlu1  ;;  %v4075_v56 = vpop.trf.xlu0 }
 0x3cc   : >> { %v4235_v45 = vcombine.low %v4043_v16, %v4107_v44  ;;  %v4219_v52 = vcombine.low %v4011_v51, %v4075_v56  ;;  %v4236_v7 = vcombine.high %v4043_v16, %v4107_v44  ;;  %v4220_v26 = vcombine.high %v4011_v51, %v4075_v56 }
 0x3ce   : >> { %v4243_v35 = vrot.slane %v4235_v45, %v4194_v42  ;;  %v4227_v24 = vrot.slane %v4219_v52, %v4194_v42  ;;  %v4250_v12 = vrot.slane %v4236_v7, %v4194_v42  ;;  %v4234_v16 = vrot.slane %v4220_v26, %v4194_v42 }
 0x3cf   : >> { %v4268_v7 = vcombine.high %v4202_v22, %v4218_v14 }
 0x3d0   : >> { %v4283_v40 = vcombine.low %v4227_v24, %v4243_v35  ;;  %v4284_v43 = vcombine.high %v4227_v24, %v4243_v35  ;;  %v4299_v44 = vcombine.low %v4234_v16, %v4250_v12  ;;  %v4267_v35 = vcombine.low %v4202_v22, %v4218_v14 }
 0x3d1   : >> { %v4282_v26 = vrot.slane %v4268_v7, %v8533_v39  ;;  %v6902_v14 = vpack.c.bf16 %v8456_v34, %v8451_v29  ;;  %v7109_v22 = vmov 0.0|0.0  }
 0x3d2   : >> { %v4291_v1 = vrot.slane %v4283_v40, %v8533_v39  ;;  %v4298_v51 = vrot.slane %v4284_v43, %v8533_v39  ;;  %v4307_v24 = vrot.slane %v4299_v44, %v8533_v39  ;;  %6929 = vmatprep.subr.bf16.mxu1 %v7109_v22  ;;  %6901 = vmatprep.subr.bf16.mxu0 %v7109_v22 }
 0x3d3   : >> { %v4171_v19 = vpop.trf.xlu1  ;;  %v4139_v63 = vpop.trf.xlu0  ;;  %6931 = vmatpush3.bf16.xpose.msk.msra.mxu1 %vm6903_vm4, %v6902_v14 }
 0x3d4   : >> { %v4344_v8 = vrot.slane %v4171_v19, %v4194_v42  ;;  %v4329_v23 = vrot.slane %v4139_v63, %v4194_v42  ;;  %v4316_v33 = vcombine.high %v4259_v31, %v4291_v1  ;;  %v4315_v36 = vcombine.low %v4259_v31, %v4291_v1  ;;  %6930 = vmatprep.subr.mxu1 %v7108_v58 }
 0x3d5   : >> { %v4337_v13 = vcombine.high %v4171_v19, %v7108_v58  ;;  %v4322_v4 = vcombine.high %v4139_v63, %v7108_v58  ;;  %v4317_v57 = vcombine.low %v4266_v30, %v4298_v51  ;;  %v4318_v45 = vcombine.high %v4266_v30, %v4298_v51 }
 0x3d6   : >> { %v4352_v46 = vcombine.low %v4329_v23, %v4344_v8  ;;  %4419 = vxpose.xlu1.b32.start [1/2] (short) (narrow) %v4316_v33, 16  ;;  %4387 = vxpose.xlu0.b32.start [1/2] (short) (narrow) %v4315_v36, 16  ;;  %v4353_v10 = vcombine.high %v4329_v23, %v4344_v8  ;;  %v4275_v1 = vrot.slane %v4267_v35, %v8533_v39 }
 0x3d7   : >> { %v4351_v56 = vrot.slane %v4337_v13, %v4194_v42  ;;  %v4336_v15 = vrot.slane %v4322_v4, %v4194_v42  ;;  %v4300_v63 = vcombine.high %v4234_v16, %v4250_v12 }
 0x3d8   : >> { %v4360_v9 = vrot.slane %v4352_v46, %v8533_v39  ;;  %v4367_v52 = vrot.slane %v4353_v10, %v8533_v39  ;;  %v4319_v19 = vcombine.low %v4275_v1, %v4307_v24  ;;  %v4320_v31 = vcombine.high %v4275_v1, %v4307_v24 }
 0x3d9   : >> { %v4368_v32 = vcombine.low %v4336_v15, %v4351_v56  ;;  %v4314_v8 = vrot.slane %v4300_v63, %v8533_v39  ;;  %v4369_v33 = vcombine.high %v4336_v15, %v4351_v56 }
 0x3da   : >> { %v4377_v11 = vcombine.high %v4360_v9, %v7108_v58  ;;  %4388 = vxpose.xlu0.b32.end [2/2] (short) (narrow) %v4360_v9, 16  ;;  %v4378_v40 = vcombine.high %v4367_v52, %v7108_v58 }
 0x3db   : >> { %v4376_v42 = vrot.slane %v4368_v32, %v8533_v39  ;;  %v4321_v36 = vcombine.low %v4282_v26, %v4314_v8  ;;  %v4386_v43 = vrot.slane %v4369_v33, %v8533_v39  ;;  %6932 = vmatpush3.xpose.msk.msra.mxu1 %vm5016_vm3, %v8461_v41 }
 0x3dc   : >> { %4420 = vxpose.xlu1.b32.end [2/2] (short) (narrow) %v4377_v11, 16 }
 0x3dd   : >> { %v4379_v23 = vcombine.high %v4376_v42, %v7108_v58 }
 0x3de   : >> { %4451 = vxpose.xlu0.b32.start [1/2] (short) (narrow) %v4317_v57, 16 }
 0x3e0   : >> { %4483 = vxpose.xlu1.b32.start [1/2] (short) (narrow) %v4318_v45, 16 }
 0x3e2   : >> { %4452 = vxpose.xlu0.b32.end [2/2] (short) (narrow) %v4367_v52, 16 }
 0x3e4   : >> { %4484 = vxpose.xlu1.b32.end [2/2] (short) (narrow) %v4378_v40, 16 }
 0x3e6   : >> { %4515 = vxpose.xlu0.b32.start [1/2] (short) (narrow) %v4319_v19, 16 }
 0x3e8   : >> { %4547 = vxpose.xlu1.b32.start [1/2] (short) (narrow) %v4320_v31, 16 }
 0x3ea   : >> { %4516 = vxpose.xlu0.b32.end [2/2] (short) (narrow) %v4376_v42, 16 }
 0x3ec   : >> { %4548 = vxpose.xlu1.b32.end [2/2] (short) (narrow) %v4379_v23, 16 }
 0x3ee   : >> { %4579 = vxpose.xlu0.b32.start [1/2] (short) (narrow) %v4321_v36, 16 }
 0x3f2   : >> { %4580 = vxpose.xlu0.b32.end [2/2] (short) (narrow) %v4386_v43, 16 }
 0x456   : >> { %v4403_v46 = vpop.trf.xlu0 }
 0x457   : >> { %6549 = vmatprep.mubr.msk.f32.mxu0 %vm4611_vm2, %v4403_v46 }
 0x458   : >> { %v4435_v55 = vpop.trf.xlu1 }
 0x45a   : >> { %v4404_v59 = vpop.trf.xlu0 }
 0x45b   : >> { %6550 = vmatmul.mubr.msk.f32.vlgmr.msra.gmra.mrb[0].mxu0 %vm4611_vm2, %v4404_v59 }
 0x45c   : >> { %v4436_v5 = vpop.trf.xlu1  ;;  %6552 = vmatprep.mubr.msk.f32.mxu0 %vm4611_vm2, %v4435_v55  ;;  %6904 = vmatpush3.bf16.xpose.msk.msra.mxu0 %vm6903_vm4, %v6902_v14 }
 0x45d   : >> { %6574 = vmatprep.subr.mxu0 %v7108_v58 }
 0x45e   : >> { %v4467_v9 = vpop.trf.xlu0 }
 0x45f   : >> { %6553 = vmatmul.mubr.msk.f32.gmra.mrb[2].mxu0 %vm4611_vm2, %v4436_v5 }
 0x460   : >> { %v4499_v12 = vpop.trf.xlu1  ;;  %6555 = vmatprep.mubr.msk.f32.mxu0 %vm4611_vm2, %v4467_v9 }
 0x462   : >> { %v4468_v16 = vpop.trf.xlu0 }
 0x463   : >> { %6556 = vmatmul.mubr.msk.f32.gmra.mrb[4].mxu0 %vm4611_vm2, %v4468_v16 }
 0x464   : >> { %v4500_v39 = vpop.trf.xlu1  ;;  %6558 = vmatprep.mubr.msk.f32.mxu0 %vm4611_vm2, %v4499_v12  ;;  %6575 = vmatpush3.xpose.msk.msra.mxu0 %vm5016_vm3, %v8461_v41 }
 0x466   : >> { %v4531_v51 = vpop.trf.xlu0 }
 0x467   : >> { %6559 = vmatmul.mubr.msk.f32.gmra.mrb[6].mxu0 %vm4611_vm2, %v4500_v39 }
 0x468   : >> { %v4563_v49 = vpop.trf.xlu1  ;;  %6561 = vmatprep.mubr.msk.f32.mxu0 %vm4611_vm2, %v4531_v51 }
 0x46a   : >> { %v4532_v13 = vpop.trf.xlu0 }
 0x46b   : >> { %6562 = vmatmul.mubr.msk.f32.gmra.mrb[8].mxu0 %vm4611_vm2, %v4532_v13 }
 0x46c   : >> { %6564 = vmatprep.mubr.msk.f32.mxu0 %vm4611_vm2, %v4563_v49  ;;  %v4564_v4 = vpop.trf.xlu1 }
 0x46e   : >> { %v4595_v10 = vpop.trf.xlu0 }
 0x46f   : >> { %6565 = vmatmul.mubr.msk.f32.gmra.mrb[10].mxu0 %vm4611_vm2, %v4564_v4 }
 0x470   : >> { %6567 = vmatprep.mubr.msk.f32.mxu0 %vm4611_vm2, %v4595_v10 }
 0x472   : >> { %v4596_v11 = vpop.trf.xlu0 }
 0x473   : >> { %6568 = vmatmul.mubr.msk.f32.gmra.mrb[12].mxu0 %vm4611_vm2, %v4596_v11 }
 0x474   : >> { %6576 = vmatprep.mubr.msk.f32.mxu0 %vm7110_vm5, %v7108_v58 }
 0x52e   : >> { %v6551_v30 = vpop.f32.mrb[0].mxu0 }
 0x52f   : >> { %v4723_v57 = vpop.f32.mrb[1].mxu0 }
 0x532   : >> { %v6554_v44 = vpop.f32.mrb[2].mxu0 }
 0x533   : >> { %v4733_v56 = vpop.f32.mrb[3].mxu0 }
 0x534   : >> { %4824 = vxpose.xlu1.b32.start [1/2] (short) (narrow) %v4733_v56, 8 }
 0x536   : >> { %v6557_v15 = vpop.f32.mrb[4].mxu0 }
 0x537   : >> { %v4743_v45 = vpop.f32.mrb[5].mxu0 }
 0x538   : >> { %4825 = vxpose.xlu1.b32.end [2/2] (short) (narrow) %v6554_v44, 8  ;;  %4856 = vxpose.xlu0.b32.start [1/2] (short) (narrow) %v4743_v45, 8 }
 0x53a   : >> { %v6560_v52 = vpop.f32.mrb[6].mxu0 }
 0x53b   : >> { %v4753_v35 = vpop.f32.mrb[7].mxu0 }
 0x53c   : >> { %4857 = vxpose.xlu0.b32.end [2/2] (short) (narrow) %v6557_v15, 8  ;;  %4888 = vxpose.xlu1.b32.start [1/2] (short) (narrow) %v4753_v35, 8 }
 0x53e   : >> { %v6563_v24 = vpop.f32.mrb[8].mxu0 }
 0x53f   : >> { %v4763_v32 = vpop.f32.mrb[9].mxu0 }
 0x540   : >> { %4889 = vxpose.xlu1.b32.end [2/2] (short) (narrow) %v6560_v52, 8  ;;  %4920 = vxpose.xlu0.b32.start [1/2] (short) (narrow) %v4763_v32, 8 }
 0x542   : >> { %v6566_v40 = vpop.f32.mrb[10].mxu0 }
 0x543   : >> { %v4773_v1 = vpop.f32.mrb[11].mxu0 }
 0x544   : >> { %4921 = vxpose.xlu0.b32.end [2/2] (short) (narrow) %v6563_v24, 8  ;;  %4952 = vxpose.xlu1.b32.start [1/2] (short) (narrow) %v4773_v1, 8 }
 0x546   : >> { %v6569_v19 = vpop.f32.mrb[12].mxu0 }
 0x547   : >> { %v4783_v63 = vpop.f32.mrb[13].mxu0 }
 0x548   : >> { %4792 = vxpose.xlu0.b32.start [1/2] (short) (narrow) %v4723_v57, 8  ;;  %4953 = vxpose.xlu1.b32.end [2/2] (short) (narrow) %v6566_v40, 8 }
 0x54c   : >> { %4793 = vxpose.xlu0.b32.end [2/2] (short) (narrow) %v6551_v30, 8  ;;  %4984 = vxpose.xlu1.b32.start [1/2] (short) (narrow) %v4783_v63, 8 }
 0x550   : >> { %4985 = vxpose.xlu1.b32.end [2/2] (short) (narrow) %v6569_v19, 8 }
 0x5b4   : >> { %v4840_v31 = vpop.trf.xlu1 }
 0x5b5   : >> { %6580 = vmatmul.mubr.msk.f32.vlgmr.msra.gmra.mrb[0].mxu1 %vm5016_vm3, %v4840_v31 }
 0x5b6   : >> { %6582 = vmatprep.mubr.msk.f32.mxu1 %vm7110_vm5, %v7108_v58 }
 0x5b8   : >> { %v4872_v42 = vpop.trf.xlu0 }
 0x5b9   : >> { %6583 = vmatmul.mubr.msk.f32.gmra.mrb[2].mxu1 %vm5016_vm3, %v4872_v42 }
 0x5ba   : >> { %6585 = vmatprep.mubr.msk.f32.mxu1 %vm7110_vm5, %v7108_v58 }
 0x5bc   : >> { %v4904_v7 = vpop.trf.xlu1 }
 0x5bd   : >> { %6586 = vmatmul.mubr.msk.f32.gmra.mrb[4].mxu1 %vm5016_vm3, %v4904_v7 }
 0x5be   : >> { %6588 = vmatprep.mubr.msk.f32.mxu1 %vm7110_vm5, %v7108_v58 }
 0x5c0   : >> { %v4936_v8 = vpop.trf.xlu0 }
 0x5c1   : >> { %6589 = vmatmul.mubr.msk.f32.gmra.mrb[6].mxu1 %vm5016_vm3, %v4936_v8 }
 0x5c2   : >> { %6591 = vmatprep.mubr.msk.f32.mxu1 %vm7110_vm5, %v7108_v58 }
 0x5c4   : >> { %v4968_v23 = vpop.trf.xlu1 }
 0x5c5   : >> { %6592 = vmatmul.mubr.msk.f32.gmra.mrb[8].mxu1 %vm5016_vm3, %v4968_v23 }
 0x5c6   : >> { %6594 = vmatprep.mubr.msk.f32.mxu1 %vm7110_vm5, %v7108_v58 }
 0x5c8   : >> { %v4808_v26 = vpop.trf.xlu0 }
 0x5c9   : >> { %6577 = vmatmul.mubr.msk.f32.vlgmr.msra.gmra.mrb[14].mxu0 %vm5016_vm3, %v4808_v26 }
 0x5cc   : >> { %v5000_v33 = vpop.trf.xlu1 }
 0x5cd   : >> { %6595 = vmatmul.mubr.msk.f32.gmra.mrb[10].mxu1 %vm5016_vm3, %v5000_v33 }
 0x688   : >> { %v5118_v36 = vpop.f32.mrb[0].mxu1 }
 0x689   : >> { %5150 = vst.msk [vmem:[%s5147_s26 + $0x18] sm:$0xff] %vm5148_vm6, %v5118_v36  ;;  %v6581_v43 = vpop.f32.mrb[1].mxu1 }
 0x68c   : >> { %v5123_v46 = vpop.f32.mrb[2].mxu1 }
 0x68d   : >> { %5151 = vst.msk [vmem:[%s5147_s26 + $0x30] sm:$0xff] %vm5148_vm6, %v5123_v46  ;;  %v6584_v55 = vpop.f32.mrb[3].mxu1 }
 0x690   : >> { %v5128_v59 = vpop.f32.mrb[4].mxu1 }
 0x691   : >> { %5152 = vst.msk [vmem:[%s5147_s26 + $0x48] sm:$0xff] %vm5148_vm6, %v5128_v59  ;;  %v6587_v58 = vpop.f32.mrb[5].mxu1 }
 0x694   : >> { %v5133_v5 = vpop.f32.mrb[6].mxu1 }
 0x695   : >> { %5153 = vst.msk [vmem:[%s5147_s26 + $0x60] sm:$0xff] %vm5148_vm6, %v5133_v5  ;;  %v6590_v9 = vpop.f32.mrb[7].mxu1 }
 0x698   : >> { %v5138_v12 = vpop.f32.mrb[8].mxu1 }
 0x699   : >> { %5154 = vst.msk [vmem:[%s5147_s26 + $0x78] sm:$0xff] %vm5148_vm6, %v5138_v12  ;;  %v6593_v16 = vpop.f32.mrb[9].mxu1 }
 0x69b   : > { %3862 = sbr.rel (!%p3860_p2) target bundleno = 819 (0x333), region = 194 }
 0x69c   : >> { %v5113_v39 = vpop.f32.mrb[14].mxu0 }
 0x69d   : >> { %5149 = vst.msk [vmem:[%s5147_s26] sm:$0xff] %vm5148_vm6, %v5113_v39  ;;  %v6578_v51 = vpop.f32.mrb[15].mxu0 }
 0x6a0   : >> { %v5143_v49 = vpop.f32.mrb[10].mxu1 }
 0x6a1   : >> { %5155 = vst.msk [vmem:[%s5147_s26 + $0x90] sm:$0xff] %vm5148_vm6, %v5143_v49  ;;  %v6596_v13 = vpop.f32.mrb[11].mxu1 }
 0x6a2 PF: > { %s17_s9 = sadd.s32 1, %s7099_s9   ;;  %s8665_s22 = sld [smem:[#allocation5_spill]] }
 0x6a3   : > { %p14_p3 = scmp.ge.s32.totalorder %s17_s9, 6   ;;  %s8666_s17 = sld [smem:[#allocation6_spill]] }
 0x6a4   : > { %s8667_s24 = smov %s7071_s25  ;;  %s8668_s25 = smov %s7216_s15 }
 0x6a5   : > { %s8669_s26 = smov %s7079_s27  ;;  %s8670_s27 = smov %s7226_s20 }
 0x6a6   : > { %s8671_s28 = smov %s7091_s30  ;;  %s8672_s29 = smov %s7095_s8 }
 0x6a7   :  { %16 = sbr.rel (!%p14_p3) target bundleno = 5 (0x5), region = 205 }
 0x6a8   : > { %s8673_s30 = smov %s8665_s22 }
 0x6a9   : > { %s8674_s8 = smov %s8666_s17 }

</bundles_post_ra>
